<compile_context>
chip_gen: v7x
topology: tpu7x:2x2x1
jax: 0.10.0
libtpu: 0.0.40
codegen_flags: <defaults>
</compile_context>

<pallas_src>
import jax
import jax.numpy as jnp
from jax import lax
from jax.experimental import pallas as pl
from jax.experimental.pallas import tpu as pltpu

# ---------------------------------------------------------------------------
# Network constants.
# ---------------------------------------------------------------------------
C_IN, C1, K1, S1 = 2, 4, 6, 2       # conv1
C2, K2, S2 = 16, 6, 4               # conv2
H1 = W1 = 38                        # conv1 output spatial size
HO = WO = 9                         # conv2 output spatial size
NS = HO * WO                        # 81 conv2 output positions
S_PAD = 128                         # padded to one full lane tile
N_TAPS = K2 * K2                    # 36 conv2 kernel taps
PATCH1 = C_IN * K1 * K1             # 72 = conv1 patch length
KBD = N_TAPS * PATCH1               # 2592 = block-diag conv1 contraction dim
M1 = N_TAPS * C1                    # 144 = block-diag conv1 output rows
HID = 256
FC1_K = C2 * S_PAD                  # 2048 = padded fc1 contraction dim


# ---------------------------------------------------------------------------
# Fused Pallas kernel: one batch element per grid step, all matmuls on MXU.
# ---------------------------------------------------------------------------
def _policy_kernel(p_ref, wbd_ref, w2f_ref, b2_ref, wf1_ref, bf1_ref,
                   wf2_ref, bf2_ref, o_ref):
    p = p_ref[0]                                           # [2592, 128] bf16

    # conv1 via block-diagonal weights: one MXU dot (K=2592), then ReLU.
    y1 = jnp.dot(wbd_ref[...], p, preferred_element_type=jnp.float32)
    y1 = jnp.maximum(y1, 0.0).astype(jnp.bfloat16)         # [144, 128]

    # conv2: one MXU dot (K=144) + bias + ReLU.
    y2 = jnp.dot(w2f_ref[...], y1, preferred_element_type=jnp.float32)
    y2 = jnp.maximum(y2 + b2_ref[...], 0.0)                # [16, 128] f32

    # Flatten (channel, spatial) -> 2048 lanes; fc1 as one K=2048 MXU dot.
    h_in = jnp.concatenate([y2[c:c + 1, :] for c in range(C2)],
                           axis=1).astype(jnp.bfloat16)    # [1, 2048]
    h = jnp.dot(h_in, wf1_ref[...], preferred_element_type=jnp.float32)
    h = jnp.maximum(h + bf1_ref[...], 0.0)                 # [1, 256]

    # fc2 (VPU multiply + lane reduce) + sigmoid; lane-dense output row.
    logit = jnp.sum(h * wf2_ref[...], axis=-1, keepdims=True) + bf2_ref[...]
    o_ref[0] = jnp.broadcast_to(jax.nn.sigmoid(logit), (1, S_PAD))


def _fused_forward(p, kp):
    """p: [B, 2592, 128] bf16 tap-stacked patches; kp: kernel-ready params."""
    B = p.shape[0]
    inputs = (p, kp["wbd"], kp["w2f"], kp["b2"], kp["wf1"], kp["bf1"],
              kp["wf2"], kp["bf2"])

    def resident(a):                   # weights: constant block index => stay
        zeros = (0,) * a.ndim          # resident in VMEM across grid steps
        return pl.BlockSpec(a.shape, lambda b, z=zeros: z)

    in_specs = [pl.BlockSpec((1, KBD, S_PAD), lambda b: (b, 0, 0))]
    in_specs += [resident(a) for a in inputs[1:]]

    flops = 2 * B * (M1 * KBD * S_PAD      # conv1 (block-diag) matmul
                     + C2 * M1 * S_PAD     # conv2 matmul
                     + FC1_K * HID         # fc1 matmul
                     + HID)                # fc2
    bytes_accessed = (sum(a.size * a.dtype.itemsize for a in inputs)
                      + B * S_PAD * 4)

    out = pl.pallas_call(
        _policy_kernel,
        out_shape=jax.ShapeDtypeStruct((B, 1, S_PAD), jnp.float32),
        grid=(B,),
        in_specs=in_specs,
        out_specs=pl.BlockSpec((1, 1, S_PAD), lambda b: (b, 0, 0)),
        compiler_params=pltpu.CompilerParams(
            dimension_semantics=("parallel",),
            vmem_limit_bytes=32 * 1024 * 1024),
        cost_estimate=pl.CostEstimate(flops=flops, transcendentals=2 * B,
                                      bytes_accessed=bytes_accessed),
    )(*inputs)
    return out[:, 0, :1]               # [B, 1]


# ---------------------------------------------------------------------------
# JAX glue: conv1 im2col with conv2 taps stacked along sublanes (pure layout).
#   P[b, j*72 + r, s] = x[b, ci, 2*(4*oh+kh2)+kh1, 2*(4*ow+kw2)+kw1]
#     r = ci*36 + kh1*6 + kw1,  j = kh2*6 + kw2,  s = oh*9 + ow  (81 -> 128 pad)
# ---------------------------------------------------------------------------
def build_conv_patches(x):
    B = x.shape[0]
    rows = []
    for kh1 in range(K1):
        for kw1 in range(K1):
            rows.append(x[:, :, kh1:kh1 + S1 * (H1 - 1) + 1:S1,
                          kw1:kw1 + S1 * (W1 - 1) + 1:S1])      # [B, 2, 38, 38]
    c1 = jnp.stack(rows, axis=2).reshape(B, PATCH1, H1, W1)     # rows=(ci,kh,kw)
    blocks = []
    for kh2 in range(K2):
        for kw2 in range(K2):
            blk = c1[:, :, kh2:kh2 + S2 * (HO - 1) + 1:S2,
                     kw2:kw2 + S2 * (WO - 1) + 1:S2]            # [B, 72, 9, 9]
            blk = blk.reshape(B, PATCH1, NS)
            blk = jnp.pad(blk, ((0, 0), (0, 0), (0, S_PAD - NS)))
            blocks.append(blk)
    p = jnp.concatenate(blocks, axis=1)                          # [B, 2592, 128]
    return p.astype(jnp.bfloat16)


# ---------------------------------------------------------------------------
# One-time weight re-layout (done at init, NOT per forward).
# ---------------------------------------------------------------------------
def prepare_params(params):
    w1 = params["conv1_w"].reshape(C1, PATCH1)                   # [4, 72]
    # Block-diagonal conv1 weight: Wbd[j*4+ci, j*72+r] = w1[ci, r].
    wbd = jnp.kron(jnp.eye(N_TAPS, dtype=jnp.float32), w1)       # [144, 2592]
    wbd = wbd.astype(jnp.bfloat16)
    # Flattened conv2 weight: W2f[co, j*4+ci] = conv2_w[co, ci, kh2, kw2].
    w2f = params["conv2_w"].transpose(0, 2, 3, 1).reshape(C2, M1)
    w2f = w2f.astype(jnp.bfloat16)                               # [16, 144]
    b2 = params["conv2_b"].reshape(C2, 1)                        # f32
    # fc1 weights, spatial axis zero-padded 81 -> 128, flattened to K=2048.
    wf1 = params["fc1_w"].T.reshape(C2, NS, HID)                 # [16, 81, 256]
    wf1 = jnp.pad(wf1, ((0, 0), (0, S_PAD - NS), (0, 0)))
    wf1 = wf1.reshape(FC1_K, HID).astype(jnp.bfloat16)           # [2048, 256]
    bf1 = params["fc1_b"].reshape(1, HID)
    wf2 = params["fc2_w"].reshape(1, HID)
    bf2 = params["fc2_b"].reshape(1, 1)
    return dict(wbd=wbd, w2f=w2f, b2=b2, wf1=wf1, bf1=bf1, wf2=wf2, bf2=bf2)


@jax.jit
def policy_network_forward(x, kparams):
    """x: [B, 2, 80, 80] f32 -> [B, 1] f32 (sigmoid probabilities)."""
    p = build_conv_patches(x)
    return _fused_forward(p, kparams)


# ---------------------------------------------------------------------------
# Deterministic synthetic params (PyTorch-like shapes) and pure-JAX reference.
# ---------------------------------------------------------------------------
def init_params(key):
    ks = jax.random.split(key, 6)
    return {
        "conv1_w": 0.05 * jax.random.normal(ks[0], (4, 2, 6, 6), jnp.float32),
        "conv2_w": 0.05 * jax.random.normal(ks[1], (16, 4, 6, 6), jnp.float32),
        "conv2_b": 0.05 * jax.random.normal(ks[2], (16,), jnp.float32),
        "fc1_w": 0.02 * jax.random.normal(ks[3], (256, 1296), jnp.float32),
        "fc1_b": 0.02 * jax.random.normal(ks[4], (256,), jnp.float32),
        "fc2_w": 0.05 * jax.random.normal(ks[5], (1, 256), jnp.float32),
        "fc2_b": jnp.zeros((1,), jnp.float32),
    }


def reference_forward(x, params):
    # Mirrors the kernel's bf16 quantization points (inputs/weights/activations
    # feeding MXU dots are bf16; accumulation and biases are f32).
    q = lambda a: a.astype(jnp.bfloat16).astype(jnp.float32)
    dn = ("NCHW", "OIHW", "NCHW")
    y = lax.conv_general_dilated(q(x), q(params["conv1_w"]), (2, 2), "VALID",
                                 dimension_numbers=dn)
    y = q(jnp.maximum(y, 0.0))
    y = lax.conv_general_dilated(y, q(params["conv2_w"]), (4, 4), "VALID",
                                 dimension_numbers=dn)
    y = jnp.maximum(y + params["conv2_b"][None, :, None, None], 0.0)
    y = q(y).reshape(x.shape[0], -1)
    y = jnp.maximum(y @ q(params["fc1_w"]).T + params["fc1_b"], 0.0)
    return jax.nn.sigmoid(y @ params["fc2_w"].T + params["fc2_b"])


if __name__ == "__main__":
    key = jax.random.PRNGKey(0)
    pkey, xkey = jax.random.split(key)
    params = init_params(pkey)
    kparams = prepare_params(params)

    # Pong-style input: batch=2, 2 channels (current + prev frame), 80x80.
    x = jax.random.normal(xkey, (2, 2, 80, 80), jnp.float32)

    out = jax.block_until_ready(policy_network_forward(x, kparams))
    ref = jax.block_until_ready(reference_forward(x, params))

    assert out.shape == (2, 1), out.shape
    assert jnp.allclose(out, ref, atol=5e-3, rtol=5e-3), (out, ref)
    print("KERNEL_OK")
</pallas_src>

<mosaic_0001>
module attributes {stable_mosaic.version = 11 : i64} {
  func.func @_policy_kernel(%arg0: i32, %arg1: memref<1x2592x128xbf16, #tpu.memory_space<vmem>>, %arg2: memref<144x2592xbf16, #tpu.memory_space<vmem>>, %arg3: memref<16x144xbf16, #tpu.memory_space<vmem>>, %arg4: memref<16x1xf32, #tpu.memory_space<vmem>>, %arg5: memref<2048x256xbf16, #tpu.memory_space<vmem>>, %arg6: memref<1x256xf32, #tpu.memory_space<vmem>>, %arg7: memref<1x256xf32, #tpu.memory_space<vmem>>, %arg8: memref<1x1xf32, #tpu.memory_space<vmem>>, %arg9: memref<1x1x128xf32, #tpu.memory_space<vmem>>) attributes {dimension_semantics = [#tpu.dimension_semantics<parallel>], iteration_bounds = array<i64: 2>, scalar_prefetch = 0 : i64, scratch_operands = 0 : i64, tpu.core_type = #tpu.core_type<tc>, window_params = [{transform_indices = @transform_0, window_bounds = array<i64: 1, 2592, 128>}, {pipeline_mode = #tpu.pipeline_mode<synchronous>, transform_indices = @transform_1, window_bounds = array<i64: 144, 2592>}, {pipeline_mode = #tpu.pipeline_mode<synchronous>, transform_indices = @transform_2, window_bounds = array<i64: 16, 144>}, {pipeline_mode = #tpu.pipeline_mode<synchronous>, transform_indices = @transform_3, window_bounds = array<i64: 16, 1>}, {pipeline_mode = #tpu.pipeline_mode<synchronous>, transform_indices = @transform_4, window_bounds = array<i64: 2048, 256>}, {pipeline_mode = #tpu.pipeline_mode<synchronous>, transform_indices = @transform_5, window_bounds = array<i64: 1, 256>}, {pipeline_mode = #tpu.pipeline_mode<synchronous>, transform_indices = @transform_6, window_bounds = array<i64: 1, 256>}, {pipeline_mode = #tpu.pipeline_mode<synchronous>, transform_indices = @transform_7, window_bounds = array<i64: 1, 1>}, {transform_indices = @transform_8, window_bounds = array<i64: 1, 1, 128>}]} {
    %c0 = arith.constant 0 : index
    %c0_0 = arith.constant 0 : index
    %c0_1 = arith.constant 0 : index
    %0 = vector.load %arg1[%c0, %c0_0, %c0_1] : memref<1x2592x128xbf16, #tpu.memory_space<vmem>>, vector<1x2592x128xbf16>
    %1 = vector.shape_cast %0 : vector<1x2592x128xbf16> to vector<2592x128xbf16>
    %c0_2 = arith.constant 0 : index
    %c0_3 = arith.constant 0 : index
    %2 = vector.load %arg2[%c0_2, %c0_3] : memref<144x2592xbf16, #tpu.memory_space<vmem>>, vector<144x2592xbf16>
    %cst = arith.constant dense<0.000000e+00> : vector<144x128xf32>
    %3 = tpu.matmul %2, %1, %cst {dimension_numbers = #tpu.dot_dimension_numbers<[1], [0], [0], [1], [0, 0, 1, 1], [], []>} : vector<144x2592xbf16>, vector<2592x128xbf16>, vector<144x128xf32> -> vector<144x128xf32>
    %cst_4 = arith.constant 0.000000e+00 : f32
    %4 = vector.broadcast %cst_4 : f32 to vector<144x128xf32>
    %5 = arith.maximumf %3, %4 : vector<144x128xf32>
    %6 = arith.truncf %5 : vector<144x128xf32> to vector<144x128xbf16>
    %c0_5 = arith.constant 0 : index
    %c0_6 = arith.constant 0 : index
    %7 = vector.load %arg3[%c0_5, %c0_6] : memref<16x144xbf16, #tpu.memory_space<vmem>>, vector<16x144xbf16>
    %cst_7 = arith.constant dense<0.000000e+00> : vector<16x128xf32>
    %8 = tpu.matmul %7, %6, %cst_7 {dimension_numbers = #tpu.dot_dimension_numbers<[1], [0], [0], [1], [0, 0, 1, 1], [], []>} : vector<16x144xbf16>, vector<144x128xbf16>, vector<16x128xf32> -> vector<16x128xf32>
    %c0_8 = arith.constant 0 : index
    %c0_9 = arith.constant 0 : index
    %9 = vector.load %arg4[%c0_8, %c0_9] : memref<16x1xf32, #tpu.memory_space<vmem>>, vector<16x1xf32>
    %10 = vector.broadcast %9 : vector<16x1xf32> to vector<16x128xf32>
    %11 = arith.addf %8, %10 : vector<16x128xf32>
    %cst_10 = arith.constant 0.000000e+00 : f32
    %12 = vector.broadcast %cst_10 : f32 to vector<16x128xf32>
    %13 = arith.maximumf %11, %12 : vector<16x128xf32>
    %14 = vector.extract_strided_slice %13 {offsets = [0, 0], sizes = [1, 128], strides = [1, 1]} : vector<16x128xf32> to vector<1x128xf32>
    %15 = vector.extract_strided_slice %13 {offsets = [1, 0], sizes = [1, 128], strides = [1, 1]} : vector<16x128xf32> to vector<1x128xf32>
    %16 = vector.extract_strided_slice %13 {offsets = [2, 0], sizes = [1, 128], strides = [1, 1]} : vector<16x128xf32> to vector<1x128xf32>
    %17 = vector.extract_strided_slice %13 {offsets = [3, 0], sizes = [1, 128], strides = [1, 1]} : vector<16x128xf32> to vector<1x128xf32>
    %18 = vector.extract_strided_slice %13 {offsets = [4, 0], sizes = [1, 128], strides = [1, 1]} : vector<16x128xf32> to vector<1x128xf32>
    %19 = vector.extract_strided_slice %13 {offsets = [5, 0], sizes = [1, 128], strides = [1, 1]} : vector<16x128xf32> to vector<1x128xf32>
    %20 = vector.extract_strided_slice %13 {offsets = [6, 0], sizes = [1, 128], strides = [1, 1]} : vector<16x128xf32> to vector<1x128xf32>
    %21 = vector.extract_strided_slice %13 {offsets = [7, 0], sizes = [1, 128], strides = [1, 1]} : vector<16x128xf32> to vector<1x128xf32>
    %22 = vector.extract_strided_slice %13 {offsets = [8, 0], sizes = [1, 128], strides = [1, 1]} : vector<16x128xf32> to vector<1x128xf32>
    %23 = vector.extract_strided_slice %13 {offsets = [9, 0], sizes = [1, 128], strides = [1, 1]} : vector<16x128xf32> to vector<1x128xf32>
    %24 = vector.extract_strided_slice %13 {offsets = [10, 0], sizes = [1, 128], strides = [1, 1]} : vector<16x128xf32> to vector<1x128xf32>
    %25 = vector.extract_strided_slice %13 {offsets = [11, 0], sizes = [1, 128], strides = [1, 1]} : vector<16x128xf32> to vector<1x128xf32>
    %26 = vector.extract_strided_slice %13 {offsets = [12, 0], sizes = [1, 128], strides = [1, 1]} : vector<16x128xf32> to vector<1x128xf32>
    %27 = vector.extract_strided_slice %13 {offsets = [13, 0], sizes = [1, 128], strides = [1, 1]} : vector<16x128xf32> to vector<1x128xf32>
    %28 = vector.extract_strided_slice %13 {offsets = [14, 0], sizes = [1, 128], strides = [1, 1]} : vector<16x128xf32> to vector<1x128xf32>
    %29 = vector.extract_strided_slice %13 {offsets = [15, 0], sizes = [1, 128], strides = [1, 1]} : vector<16x128xf32> to vector<1x128xf32>
    %30 = tpu.concatenate %14, %15, %16, %17, %18, %19, %20, %21, %22, %23, %24, %25, %26, %27, %28, %29 in 1 : vector<1x128xf32>, vector<1x128xf32>, vector<1x128xf32>, vector<1x128xf32>, vector<1x128xf32>, vector<1x128xf32>, vector<1x128xf32>, vector<1x128xf32>, vector<1x128xf32>, vector<1x128xf32>, vector<1x128xf32>, vector<1x128xf32>, vector<1x128xf32>, vector<1x128xf32>, vector<1x128xf32>, vector<1x128xf32> -> vector<1x2048xf32>
    %31 = arith.truncf %30 : vector<1x2048xf32> to vector<1x2048xbf16>
    %c0_11 = arith.constant 0 : index
    %c0_12 = arith.constant 0 : index
    %32 = vector.load %arg5[%c0_11, %c0_12] : memref<2048x256xbf16, #tpu.memory_space<vmem>>, vector<2048x256xbf16>
    %cst_13 = arith.constant dense<0.000000e+00> : vector<1x256xf32>
    %33 = tpu.matmul %31, %32, %cst_13 {dimension_numbers = #tpu.dot_dimension_numbers<[1], [0], [0], [1], [0, 0, 1, 1], [], []>} : vector<1x2048xbf16>, vector<2048x256xbf16>, vector<1x256xf32> -> vector<1x256xf32>
    %c0_14 = arith.constant 0 : index
    %c0_15 = arith.constant 0 : index
    %34 = vector.load %arg6[%c0_14, %c0_15] : memref<1x256xf32, #tpu.memory_space<vmem>>, vector<1x256xf32>
    %35 = arith.addf %33, %34 : vector<1x256xf32>
    %cst_16 = arith.constant 0.000000e+00 : f32
    %36 = vector.broadcast %cst_16 : f32 to vector<1x256xf32>
    %37 = arith.maximumf %35, %36 : vector<1x256xf32>
    %c0_17 = arith.constant 0 : index
    %c0_18 = arith.constant 0 : index
    %38 = vector.load %arg7[%c0_17, %c0_18] : memref<1x256xf32, #tpu.memory_space<vmem>>, vector<1x256xf32>
    %39 = arith.mulf %37, %38 : vector<1x256xf32>
    %cst_19 = arith.constant dense<0.000000e+00> : vector<1xf32>
    %40 = vector.multi_reduction <add>, %39, %cst_19 [1] : vector<1x256xf32> to vector<1xf32>
    %41 = vector.shape_cast %40 : vector<1xf32> to vector<1x1xf32>
    %c0_20 = arith.constant 0 : index
    %c0_21 = arith.constant 0 : index
    %42 = vector.load %arg8[%c0_20, %c0_21] : memref<1x1xf32, #tpu.memory_space<vmem>>, vector<1x1xf32>
    %43 = arith.addf %41, %42 : vector<1x1xf32>
    %44 = arith.negf %43 : vector<1x1xf32>
    %45 = math.exp %44 : vector<1x1xf32>
    %cst_22 = arith.constant 1.000000e+00 : f32
    %46 = vector.broadcast %cst_22 : f32 to vector<1x1xf32>
    %47 = arith.addf %46, %45 : vector<1x1xf32>
    %48 = arith.divf %46, %47 : vector<1x1xf32>
    %49 = vector.shape_cast %48 : vector<1x1xf32> to vector<1x1xf32>
    %50 = vector.broadcast %49 : vector<1x1xf32> to vector<1x128xf32>
    %c0_23 = arith.constant 0 : index
    %c0_24 = arith.constant 0 : index
    %c0_25 = arith.constant 0 : index
    %51 = vector.load %arg9[%c0_23, %c0_24, %c0_25] : memref<1x1x128xf32, #tpu.memory_space<vmem>>, vector<1x1x128xf32>
    %52 = vector.shape_cast %51 : vector<1x1x128xf32> to vector<1x128xf32>
    %53 = vector.shape_cast %50 : vector<1x128xf32> to vector<1x1x128xf32>
    tpu.vector_store %arg9[%c0_23, %c0_24, %c0_25], %53 {strides = array<i32>} : memref<1x1x128xf32, #tpu.memory_space<vmem>>, vector<1x1x128xf32>,
    return
  }
  func.func @transform_0(%arg0: i32) -> (i32, i32, i32) {
    %c0_i32 = arith.constant 0 : i32
    %c0_i32_0 = arith.constant 0 : i32
    %c0_i32_1 = arith.constant 0 : i32
    return %arg0, %c0_i32, %c0_i32_0 : i32, i32, i32
  }
  func.func @transform_1(%arg0: i32) -> (i32, i32) {
    %c0_i32 = arith.constant 0 : i32
    %c0_i32_0 = arith.constant 0 : i32
    %c0_i32_1 = arith.constant 0 : i32
    return %c0_i32, %c0_i32_0 : i32, i32
  }
  func.func @transform_2(%arg0: i32) -> (i32, i32) {
    %c0_i32 = arith.constant 0 : i32
    %c0_i32_0 = arith.constant 0 : i32
    %c0_i32_1 = arith.constant 0 : i32
    return %c0_i32, %c0_i32_0 : i32, i32
  }
  func.func @transform_3(%arg0: i32) -> (i32, i32) {
    %c0_i32 = arith.constant 0 : i32
    %c0_i32_0 = arith.constant 0 : i32
    %c0_i32_1 = arith.constant 0 : i32
    return %c0_i32, %c0_i32_0 : i32, i32
  }
  func.func @transform_4(%arg0: i32) -> (i32, i32) {
    %c0_i32 = arith.constant 0 : i32
    %c0_i32_0 = arith.constant 0 : i32
    %c0_i32_1 = arith.constant 0 : i32
    return %c0_i32, %c0_i32_0 : i32, i32
  }
  func.func @transform_5(%arg0: i32) -> (i32, i32) {
    %c0_i32 = arith.constant 0 : i32
    %c0_i32_0 = arith.constant 0 : i32
    %c0_i32_1 = arith.constant 0 : i32
    return %c0_i32, %c0_i32_0 : i32, i32
  }
  func.func @transform_6(%arg0: i32) -> (i32, i32) {
    %c0_i32 = arith.constant 0 : i32
    %c0_i32_0 = arith.constant 0 : i32
    %c0_i32_1 = arith.constant 0 : i32
    return %c0_i32, %c0_i32_0 : i32, i32
  }
  func.func @transform_7(%arg0: i32) -> (i32, i32) {
    %c0_i32 = arith.constant 0 : i32
    %c0_i32_0 = arith.constant 0 : i32
    %c0_i32_1 = arith.constant 0 : i32
    return %c0_i32, %c0_i32_0 : i32, i32
  }
  func.func @transform_8(%arg0: i32) -> (i32, i32, i32) {
    %c0_i32 = arith.constant 0 : i32
    %c0_i32_0 = arith.constant 0 : i32
    %c0_i32_1 = arith.constant 0 : i32
    return %arg0, %c0_i32, %c0_i32_0 : i32, i32, i32
  }
}

</mosaic_0001>

<bundles_post_ra>
// kernel: policy_network_forward.1
= control target key start
LH: loop header
LB: loop body
LE: loop exit
PB: predicated region body
PF: predicated region fallthrough
CT: control target
= control target key end

     0   :  { %s8359_s29 = smov 0   ;;  %s10560_s0 = inlined_call_operand.vmem [shape: bf16[2,2592,128], index: 0, kind: input, shape index: {}]   ;;  %s10561_s1 = inlined_call_operand.vmem [shape: bf16[144,2592], index: 1, kind: input, shape index: {}]   ;;  %s10562_s2 = inlined_call_operand.vmem [shape: bf16[16,144], index: 2, kind: input, shape index: {}]   ;;  %s10563_s3 = inlined_call_operand.vmem [shape: f32[16,1], index: 3, kind: input, shape index: {}]   ;;  %s10564_s4 = inlined_call_operand.vmem [shape: bf16[2048,256], index: 4, kind: input, shape index: {}]   ;;  %s10565_s5 = inlined_call_operand.vmem [shape: f32[1,256], index: 5, kind: input, shape index: {}]   ;;  %s10566_s6 = inlined_call_operand.vmem [shape: f32[1,256], index: 6, kind: input, shape index: {}]   ;;  %s10567_s7 = inlined_call_operand.<no memory space> [shape: f32[1,1], index: 7, kind: input, shape index: {}]   ;;  %s10568_s8 = inlined_call_operand.vmem [shape: f32[2,1,128], index: 8, kind: output, shape index: {}]  }
   0x1   :  { %v13_v0 = vstv %s10567_s7 }
   0x2   :  { %14 = vst [vmem:[#allocation2] sm:$0x1] %v13_v0 }
   0x3 LB: > { %s6029_s30 = sadd.s32 4294967295, %s8306_s29   ;;  %p6033_p0 = scmp.ge.s32.totalorder %s8306_s29, 1  ;;  %s8306_s29 = sphi %s8359_s29, %s20_s29  }
   0x4   : > { %p264_p1 = scmp.lt.s32.totalorder %s8306_s29, 3 }
   0x6   : > { %p265_p2 = pnand %p6033_p0, %p264_p1 }
   0x8   : > { %268 = sbr.rel (%p265_p2) target bundleno = 2115 (0x843), region = 52 }
   0xf   : > { %p296_p3 = scmp.lt.s32.totalorder %s6029_s30, 1  ;;  %v7486_v1 = vld [vmem:[%s10561_s1 + $0x4] ss:$84 sps:$4 sm:$0xff]   ;;  %v7484_v19 = vld [vmem:[%s10561_s1] ss:$84 sps:$4 sm:$0xff]   ;;  %vm8309_vm0 = vmmov 0  }
  0x10   : > { %2804 = vmatprep.mubr.bf16.mxu0 %v7486_v1  ;;  %v7489_v21 = vld [vmem:[%s10561_s1 + $0xac] ss:$84 sps:$4 sm:$0xff]   ;;  %v7491_v25 = vld [vmem:[%s10561_s1 + $0xa8] ss:$84 sps:$4 sm:$0xff]   ;;  %v7496_v31 = vld [vmem:[%s10561_s1 + $0x150] ss:$84 sps:$4 sm:$0xff]  }
  0x11   : > { %s10572_s30 = smov (!%p296_p3, %s6029_s30), 1  ;;  %v7494_v26 = vld [vmem:[%s10561_s1 + $0x154] ss:$84 sps:$4 sm:$0xff]   ;;  %v7499_v32 = vld [vmem:[%s10561_s1 + $0x1fc] ss:$84 sps:$4 sm:$0xff]   ;;  %vm2744_vm1 = vcmask 261120  }
  0x12   : > { %s7454_s7 = smul.u32 1296, %s10572_s30  ;;  %v7501_v37 = vld [vmem:[%s10561_s1 + $0x1f8] ss:$84 sps:$4 sm:$0xff]   ;;  %v7506_v43 = vld [vmem:[%s10561_s1 + $0x2a0] ss:$84 sps:$4 sm:$0xff]   ;;  %vm3977_vm2 = vcmask 130048   ;;  %s303_s10 = scalar_lea.vmem %s10568_s8, %s10572_s30 }
  0x13   : > { %v7503_v38 = vld [vmem:[%s10561_s1 + $0x2a4] ss:$84 sps:$4 sm:$0xff]   ;;  %v7507_v44 = vld [vmem:[%s10561_s1 + $0x34c] ss:$84 sps:$4 sm:$0xff]   ;;  %v7510_v45 = vld [vmem:[%s10561_s1 + $0x348] ss:$84 sps:$4 sm:$0xff]  }
  0x14   : > { %s8376_s13 = scalar_lea.vmem %s10560_s0, %s7454_s7  ;;  %v7512_v46 = vld [vmem:[%s10561_s1 + $0x3f4] ss:$84 sps:$4 sm:$0xff]   ;;  %v7514_v47 = vld [vmem:[%s10561_s1 + $0x3f0] ss:$84 sps:$4 sm:$0xff]   ;;  %v7519_v49 = vld [vmem:[%s10561_s1 + $0x498] ss:$84 sps:$4 sm:$0xff]  }
  0x15   : > { %v7468_v2 = vld [vmem:[%s8376_s13 + $0x40] sm:$0xff]   ;;  %v7470_v4 = vld [vmem:[%s8376_s13 + $0x48] sm:$0xff]   ;;  %v7472_v6 = vld [vmem:[%s8376_s13 + $0x50] sm:$0xff]   ;;  %vm5962_vm3 = vcmask 1040384  }
  0x16   : > { %v7469_v3 = vld [vmem:[%s8376_s13] sm:$0xff]   ;;  %6657 = vmatprep.subr.bf16.mxu0 %v7468_v2  ;;  %v7471_v5 = vld [vmem:[%s8376_s13 + $0x8] sm:$0xff]   ;;  %v7473_v7 = vld [vmem:[%s8376_s13 + $0x10] sm:$0xff]  }
  0x17   : > { %6658 = vmatpush3.bf16.msra.mxu0 %v7469_v3  ;;  %v7474_v8 = vld [vmem:[%s8376_s13 + $0x58] sm:$0xff]   ;;  %v7476_v10 = vld [vmem:[%s8376_s13 + $0x60] sm:$0xff]   ;;  %v7478_v12 = vld [vmem:[%s8376_s13 + $0x68] sm:$0xff]  }
  0x18   : > { %6659 = vmatprep.subr.bf16.mxu0 %v7470_v4  ;;  %v7475_v9 = vld [vmem:[%s8376_s13 + $0x18] sm:$0xff]   ;;  %v7477_v11 = vld [vmem:[%s8376_s13 + $0x20] sm:$0xff]   ;;  %v7479_v13 = vld [vmem:[%s8376_s13 + $0x28] sm:$0xff]  }
  0x19   : > { %v7480_v14 = vld [vmem:[%s8376_s13 + $0x70] sm:$0xff]   ;;  %v7482_v16 = vld [vmem:[%s8376_s13 + $0x78] sm:$0xff]   ;;  %v7487_v18 = vld [vmem:[%s8376_s13 + $0xc0] sm:$0xff]  }
  0x1a   : > { %v7481_v15 = vld [vmem:[%s8376_s13 + $0x30] sm:$0xff]   ;;  %v7483_v17 = vld [vmem:[%s8376_s13 + $0x38] sm:$0xff]   ;;  %v7488_v20 = vld [vmem:[%s8376_s13 + $0x80] sm:$0xff]  }
  0x1b   : > { %6660 = vmatpush3.bf16.msra.mxu0 %v7471_v5  ;;  %v7492_v22 = vld [vmem:[%s8376_s13 + $0xc8] sm:$0xff]   ;;  %v7497_v24 = vld [vmem:[%s8376_s13 + $0xd0] sm:$0xff]   ;;  %v7502_v28 = vld [vmem:[%s8376_s13 + $0xd8] sm:$0xff]  }
  0x1c   : > { %6661 = vmatprep.subr.bf16.mxu0 %v7472_v6  ;;  %v7493_v23 = vld [vmem:[%s8376_s13 + $0x88] sm:$0xff]   ;;  %v7498_v27 = vld [vmem:[%s8376_s13 + $0x90] sm:$0xff]   ;;  %v7505_v29 = vld [vmem:[%s8376_s13 + $0x98] sm:$0xff]  }
  0x1d   : > { %v7509_v30 = vld [vmem:[%s8376_s13 + $0xe0] sm:$0xff]   ;;  %v7515_v34 = vld [vmem:[%s8376_s13 + $0xe8] sm:$0xff]   ;;  %v7520_v36 = vld [vmem:[%s8376_s13 + $0xf0] sm:$0xff]  }
  0x1e   : > { %v7511_v33 = vld [vmem:[%s8376_s13 + $0xa0] sm:$0xff]   ;;  %v7516_v35 = vld [vmem:[%s8376_s13 + $0xa8] sm:$0xff]   ;;  %v7521_v39 = vld [vmem:[%s8376_s13 + $0xb0] sm:$0xff]  }
  0x1f   : > { %6662 = vmatpush3.bf16.msra.mxu0 %v7473_v7  ;;  %v7525_v40 = vld [vmem:[%s8376_s13 + $0xf8] sm:$0xff]   ;;  %v7530_v42 = vld [vmem:[%s8376_s13 + $0x140] sm:$0xff]   ;;  %v7532_v55 = vld [vmem:[%s10561_s1 + $0xb4] ss:$84 sps:$4 sm:$0xff]  }
  0x20   : > { %6663 = vmatprep.subr.bf16.mxu0 %v7474_v8  ;;  %v7526_v41 = vld [vmem:[%s8376_s13 + $0xb8] sm:$0xff]   ;;  %v7524_v51 = vld [vmem:[%s10561_s1 + $0x540] ss:$84 sps:$4 sm:$0xff]   ;;  %v7535_v56 = vld [vmem:[%s8376_s13 + $0x148] sm:$0xff]  }
  0x21   : > { %v7517_v48 = vld [vmem:[%s10561_s1 + $0x49c] ss:$84 sps:$4 sm:$0xff]   ;;  %v7522_v50 = vld [vmem:[%s10561_s1 + $0x544] ss:$84 sps:$4 sm:$0xff]   ;;  %v7529_v52 = vld [vmem:[%s10561_s1 + $0xc] ss:$84 sps:$4 sm:$0xff]  }
  0x22   : > { %v7527_v53 = vld [vmem:[%s10561_s1 + $0x8] ss:$84 sps:$4 sm:$0xff]   ;;  %v7531_v54 = vld [vmem:[%s8376_s13 + $0x100] sm:$0xff]   ;;  %v7540_v58 = vld [vmem:[%s8376_s13 + $0x150] sm:$0xff]  }
  0x23   : > { %6664 = vmatpush3.bf16.msra.mxu0 %v7475_v9  ;;  %v7536_v57 = vld [vmem:[%s8376_s13 + $0x108] sm:$0xff]   ;;  %v7534_v59 = vld [vmem:[%s10561_s1 + $0xb0] ss:$84 sps:$4 sm:$0xff]   ;;  %v7545_v62 = vld [vmem:[%s8376_s13 + $0x158] sm:$0xff]  }
  0x24   : > { %6665 = vmatprep.subr.bf16.mxu0 %v7476_v10  ;;  %v7537_v60 = vld [vmem:[%s10561_s1 + $0x15c] ss:$84 sps:$4 sm:$0xff]   ;;  %v7552_v0 = vld [vmem:[%s8376_s13 + $0x160] sm:$0xff]   ;;  %v7539_v1 = vld [vmem:[%s10561_s1 + $0x158] ss:$84 sps:$4 sm:$0xff]  }
  0x25   : > { %v7541_v61 = vld [vmem:[%s8376_s13 + $0x110] sm:$0xff]   ;;  %v7548_v63 = vld [vmem:[%s8376_s13 + $0x118] sm:$0xff]   ;;  %v7554_v3 = vld [vmem:[%s8376_s13 + $0x120] sm:$0xff]  }
  0x26   : > { %v7542_v2 = vld [vmem:[%s10561_s1 + $0x204] ss:$84 sps:$4 sm:$0xff]   ;;  %v7558_v4 = vld [vmem:[%s8376_s13 + $0x168] sm:$0xff]   ;;  %v7563_v6 = vld [vmem:[%s8376_s13 + $0x170] sm:$0xff]  }
  0x27   : > { %6666 = vmatpush3.bf16.msra.mxu0 %v7477_v11  ;;  %v7559_v5 = vld [vmem:[%s8376_s13 + $0x128] sm:$0xff]   ;;  %v7544_v7 = vld [vmem:[%s10561_s1 + $0x200] ss:$84 sps:$4 sm:$0xff]   ;;  %v7568_v10 = vld [vmem:[%s8376_s13 + $0x178] sm:$0xff]  }
  0x28   : > { %6667 = vmatprep.subr.bf16.mxu0 %v7478_v12  ;;  %v7546_v8 = vld [vmem:[%s10561_s1 + $0x2ac] ss:$84 sps:$4 sm:$0xff]   ;;  %v7564_v9 = vld [vmem:[%s8376_s13 + $0x130] sm:$0xff]   ;;  %v7569_v11 = vld [vmem:[%s8376_s13 + $0x138] sm:$0xff]  }
  0x29   : > { %v7573_v12 = vld [vmem:[%s8376_s13 + $0x1c0] sm:$0xff]  }
  0x2b   : > { %6668 = vmatpush3.bf16.msra.mxu0 %v7479_v13  ;;  %v7549_v13 = vld [vmem:[%s10561_s1 + $0x2a8] ss:$84 sps:$4 sm:$0xff]  }
  0x2c   : > { %6669 = vmatprep.subr.bf16.mxu0 %v7480_v14  ;;  %v7550_v14 = vld [vmem:[%s10561_s1 + $0x354] ss:$84 sps:$4 sm:$0xff]  }
  0x2f   : > { %6670 = vmatpush3.bf16.msra.mxu0 %v7481_v15  ;;  %v7553_v15 = vld [vmem:[%s10561_s1 + $0x350] ss:$84 sps:$4 sm:$0xff]  }
  0x30   : > { %6671 = vmatprep.subr.bf16.mxu0 %v7482_v16  ;;  %v7555_v16 = vld [vmem:[%s10561_s1 + $0x3fc] ss:$84 sps:$4 sm:$0xff]  }
  0x33   : > { %6672 = vmatpush3.bf16.msra.mxu0 %v7483_v17  ;;  %v7557_v17 = vld [vmem:[%s10561_s1 + $0x3f8] ss:$84 sps:$4 sm:$0xff]  }
  0x34   : > { %6727 = vmatprep.subr.bf16.mxu0 %v7487_v18  ;;  %v7560_v18 = vld [vmem:[%s10561_s1 + $0x4a4] ss:$84 sps:$4 sm:$0xff]  }
  0x36   : > { %2805 = vmatmul.mubr.bf16.vlgmr.msra.gmra.mrb[0].mxu0 %v7484_v19  ;;  %v7562_v19 = vld [vmem:[%s10561_s1 + $0x4a0] ss:$84 sps:$4 sm:$0xff]  }
  0x37   : > { %6728 = vmatpush3.bf16.msra.mxu0 %v7488_v20  ;;  %2812 = vmatprep.mubr.bf16.mxu0 %v7489_v21  ;;  %v7565_v20 = vld [vmem:[%s10561_s1 + $0x54c] ss:$84 sps:$4 sm:$0xff]   ;;  %v7567_v21 = vld [vmem:[%s10561_s1 + $0x548] ss:$84 sps:$4 sm:$0xff]  }
  0x38   : > { %6729 = vmatprep.subr.bf16.mxu0 %v7492_v22  ;;  %v7572_v22 = vld [vmem:[%s10561_s1 + $0x14] ss:$84 sps:$4 sm:$0xff]  }
  0x3b   : > { %6730 = vmatpush3.bf16.msra.mxu0 %v7493_v23  ;;  %v7570_v23 = vld [vmem:[%s10561_s1 + $0x10] ss:$84 sps:$4 sm:$0xff]  }
  0x3c   : > { %6731 = vmatprep.subr.bf16.mxu0 %v7497_v24  ;;  %v7574_v24 = vld [vmem:[%s8376_s13 + $0x180] sm:$0xff]  }
  0x3e   : > { %2813 = vmatmul.mubr.bf16.gmra.mrb[4].mxu0 %v7491_v25  ;;  %v7575_v25 = vld [vmem:[%s10561_s1 + $0xbc] ss:$84 sps:$4 sm:$0xff]  }
  0x3f   : > { %2820 = vmatprep.mubr.bf16.mxu0 %v7494_v26  ;;  %6732 = vmatpush3.bf16.msra.mxu0 %v7498_v27  ;;  %v7578_v26 = vld [vmem:[%s8376_s13 + $0x1c8] sm:$0xff]  }
  0x40   : > { %6733 = vmatprep.subr.bf16.mxu0 %v7502_v28  ;;  %v7579_v27 = vld [vmem:[%s8376_s13 + $0x188] sm:$0xff]   ;;  %v7583_v28 = vld [vmem:[%s8376_s13 + $0x1d0] sm:$0xff]  }
  0x43   : > { %6734 = vmatpush3.bf16.msra.mxu0 %v7505_v29  ;;  %v7577_v29 = vld [vmem:[%s10561_s1 + $0xb8] ss:$84 sps:$4 sm:$0xff]  }
  0x44   : > { %6735 = vmatprep.subr.bf16.mxu0 %v7509_v30  ;;  %v7580_v30 = vld [vmem:[%s10561_s1 + $0x164] ss:$84 sps:$4 sm:$0xff]  }
  0x46   : > { %2821 = vmatmul.mubr.bf16.gmra.mrb[8].mxu0 %v7496_v31  ;;  %v7584_v31 = vld [vmem:[%s8376_s13 + $0x190] sm:$0xff]  }
  0x47   : > { %2828 = vmatprep.mubr.bf16.mxu0 %v7499_v32  ;;  %6736 = vmatpush3.bf16.msra.mxu0 %v7511_v33  ;;  %v7588_v32 = vld [vmem:[%s8376_s13 + $0x1d8] sm:$0xff]  }
  0x48   : > { %6737 = vmatprep.subr.bf16.mxu0 %v7515_v34  ;;  %v7591_v33 = vld [vmem:[%s8376_s13 + $0x198] sm:$0xff]   ;;  %v7595_v34 = vld [vmem:[%s8376_s13 + $0x1e0] sm:$0xff]  }
  0x4b   : > { %6738 = vmatpush3.bf16.msra.mxu0 %v7516_v35  ;;  %v7582_v35 = vld [vmem:[%s10561_s1 + $0x160] ss:$84 sps:$4 sm:$0xff]  }
  0x4c   : > { %6739 = vmatprep.subr.bf16.mxu0 %v7520_v36  ;;  %v7585_v36 = vld [vmem:[%s10561_s1 + $0x20c] ss:$84 sps:$4 sm:$0xff]  }
  0x4e   : > { %2829 = vmatmul.mubr.bf16.gmra.mrb[12].mxu0 %v7501_v37  ;;  %v7597_v37 = vld [vmem:[%s8376_s13 + $0x1a0] sm:$0xff]  }
  0x4f   : > { %2836 = vmatprep.mubr.bf16.mxu0 %v7503_v38  ;;  %6740 = vmatpush3.bf16.msra.mxu0 %v7521_v39  ;;  %v7601_v38 = vld [vmem:[%s8376_s13 + $0x1e8] sm:$0xff]  }
  0x50   : > { %6741 = vmatprep.subr.bf16.mxu0 %v7525_v40  ;;  %v7602_v39 = vld [vmem:[%s8376_s13 + $0x1a8] sm:$0xff]   ;;  %v7606_v40 = vld [vmem:[%s8376_s13 + $0x1f0] sm:$0xff]  }
  0x53   : > { %6742 = vmatpush3.bf16.msra.mxu0 %v7526_v41  ;;  %v7587_v41 = vld [vmem:[%s10561_s1 + $0x208] ss:$84 sps:$4 sm:$0xff]  }
  0x54   : > { %6797 = vmatprep.subr.bf16.mxu0 %v7530_v42  ;;  %v7589_v42 = vld [vmem:[%s10561_s1 + $0x2b4] ss:$84 sps:$4 sm:$0xff]  }
  0x56   : > { %2837 = vmatmul.mubr.bf16.gmra.mrb[16].mxu0 %v7506_v43  ;;  %v7607_v43 = vld [vmem:[%s8376_s13 + $0x1b0] sm:$0xff]  }
  0x57   : > { %2844 = vmatprep.mubr.bf16.mxu0 %v7507_v44  ;;  %v7611_v44 = vld [vmem:[%s8376_s13 + $0x1f8] sm:$0xff]  }
  0x5e   : > { %2845 = vmatmul.mubr.bf16.gmra.mrb[20].mxu0 %v7510_v45  ;;  %v7612_v45 = vld [vmem:[%s8376_s13 + $0x1b8] sm:$0xff]  }
  0x5f   : > { %2852 = vmatprep.mubr.bf16.mxu0 %v7512_v46  ;;  %v7616_v46 = vld [vmem:[%s8376_s13 + $0x240] sm:$0xff]  }
  0x66   : > { %2853 = vmatmul.mubr.bf16.gmra.mrb[24].mxu0 %v7514_v47  ;;  %v7592_v47 = vld [vmem:[%s10561_s1 + $0x2b0] ss:$84 sps:$4 sm:$0xff]  }
  0x67   : > { %2860 = vmatprep.mubr.bf16.mxu0 %v7517_v48  ;;  %v7593_v48 = vld [vmem:[%s10561_s1 + $0x35c] ss:$84 sps:$4 sm:$0xff]  }
  0x6e   : > { %2861 = vmatmul.mubr.bf16.gmra.mrb[28].mxu0 %v7519_v49  ;;  %v7596_v49 = vld [vmem:[%s10561_s1 + $0x358] ss:$84 sps:$4 sm:$0xff]  }
  0x6f   : > { %2868 = vmatprep.mubr.bf16.mxu0 %v7522_v50  ;;  %v7598_v50 = vld [vmem:[%s10561_s1 + $0x404] ss:$84 sps:$4 sm:$0xff]  }
  0x76   : > { %2869 = vmatmul.mubr.bf16.gmra.mrb[32].mxu0 %v7524_v51  ;;  %v7600_v51 = vld [vmem:[%s10561_s1 + $0x400] ss:$84 sps:$4 sm:$0xff]  }
  0x77   : > { %2909 = vmatprep.mubr.bf16.mxu0 %v7529_v52  ;;  %v7603_v52 = vld [vmem:[%s10561_s1 + $0x4ac] ss:$84 sps:$4 sm:$0xff]  }
  0x7e   : > { %2910 = vmatmul.mubr.bf16.vlgmr.msra.gmra.mrb[36].mxu0 %v7527_v53  ;;  %v7605_v53 = vld [vmem:[%s10561_s1 + $0x4a8] ss:$84 sps:$4 sm:$0xff]  }
  0x7f   : > { %6798 = vmatpush3.bf16.msra.mxu0 %v7531_v54  ;;  %2917 = vmatprep.mubr.bf16.mxu0 %v7532_v55  ;;  %v7608_v54 = vld [vmem:[%s10561_s1 + $0x554] ss:$84 sps:$4 sm:$0xff]   ;;  %v7610_v55 = vld [vmem:[%s10561_s1 + $0x550] ss:$84 sps:$4 sm:$0xff]  }
  0x80   : > { %6799 = vmatprep.subr.bf16.mxu0 %v7535_v56  ;;  %v7615_v56 = vld [vmem:[%s10561_s1 + $0x1c] ss:$84 sps:$4 sm:$0xff]  }
  0x83   : > { %6800 = vmatpush3.bf16.msra.mxu0 %v7536_v57  ;;  %v7613_v57 = vld [vmem:[%s10561_s1 + $0x18] ss:$84 sps:$4 sm:$0xff]  }
  0x84   : > { %6801 = vmatprep.subr.bf16.mxu0 %v7540_v58 }
  0x86   : > { %2918 = vmatmul.mubr.bf16.gmra.mrb[40].mxu0 %v7534_v59  ;;  %v7617_v59 = vld [vmem:[%s8376_s13 + $0x200] sm:$0xff]  }
  0x87   : > { %2925 = vmatprep.mubr.bf16.mxu0 %v7537_v60  ;;  %6802 = vmatpush3.bf16.msra.mxu0 %v7541_v61 }
  0x88   : > { %6803 = vmatprep.subr.bf16.mxu0 %v7545_v62 }
  0x8b   : > { %6804 = vmatpush3.bf16.msra.mxu0 %v7548_v63  ;;  %v7618_v63 = vld [vmem:[%s10561_s1 + $0xc4] ss:$84 sps:$4 sm:$0xff]  }
  0x8c   : > { %6805 = vmatprep.subr.bf16.mxu0 %v7552_v0 }
  0x8e   : > { %2926 = vmatmul.mubr.bf16.gmra.mrb[44].mxu0 %v7539_v1  ;;  %v7621_v1 = vld [vmem:[%s8376_s13 + $0x248] sm:$0xff]  }
  0x8f   : > { %2933 = vmatprep.mubr.bf16.mxu0 %v7542_v2  ;;  %6806 = vmatpush3.bf16.msra.mxu0 %v7554_v3  ;;  %v7622_v3 = vld [vmem:[%s8376_s13 + $0x208] sm:$0xff]  }
  0x90   : > { %6807 = vmatprep.subr.bf16.mxu0 %v7558_v4  ;;  %v7626_v4 = vld [vmem:[%s8376_s13 + $0x250] sm:$0xff]  }
  0x93   : > { %6808 = vmatpush3.bf16.msra.mxu0 %v7559_v5  ;;  %v7620_v5 = vld [vmem:[%s10561_s1 + $0xc0] ss:$84 sps:$4 sm:$0xff]  }
  0x94   : > { %6809 = vmatprep.subr.bf16.mxu0 %v7563_v6 }
  0x96   : > { %2934 = vmatmul.mubr.bf16.gmra.mrb[48].mxu0 %v7544_v7  ;;  %v7623_v7 = vld [vmem:[%s10561_s1 + $0x16c] ss:$84 sps:$4 sm:$0xff]  }
  0x97   : > { %2941 = vmatprep.mubr.bf16.mxu0 %v7546_v8  ;;  %6810 = vmatpush3.bf16.msra.mxu0 %v7564_v9 }
  0x98   : > { %6811 = vmatprep.subr.bf16.mxu0 %v7568_v10 }
  0x9b   : > { %6812 = vmatpush3.bf16.msra.mxu0 %v7569_v11  ;;  %v7627_v11 = vld [vmem:[%s8376_s13 + $0x210] sm:$0xff]  }
  0x9c   : > { %6867 = vmatprep.subr.bf16.mxu0 %v7573_v12 }
  0x9e   : > { %2942 = vmatmul.mubr.bf16.gmra.mrb[52].mxu0 %v7549_v13  ;;  %v7631_v13 = vld [vmem:[%s8376_s13 + $0x258] sm:$0xff]  }
  0x9f   : > { %2949 = vmatprep.mubr.bf16.mxu0 %v7550_v14 }
  0xa6   : > { %2950 = vmatmul.mubr.bf16.gmra.mrb[56].mxu0 %v7553_v15  ;;  %v7634_v15 = vld [vmem:[%s8376_s13 + $0x218] sm:$0xff]  }
  0xa7   : > { %2957 = vmatprep.mubr.bf16.mxu0 %v7555_v16  ;;  %v7638_v16 = vld [vmem:[%s8376_s13 + $0x260] sm:$0xff]  }
  0xae   : > { %2958 = vmatmul.mubr.bf16.gmra.mrb[60].mxu0 %v7557_v17  ;;  %v7625_v17 = vld [vmem:[%s10561_s1 + $0x168] ss:$84 sps:$4 sm:$0xff]  }
  0xaf   : > { %2965 = vmatprep.mubr.bf16.mxu0 %v7560_v18 }
  0xb6   : > { %2966 = vmatmul.mubr.bf16.gmra.mrb[64].mxu0 %v7562_v19  ;;  %v7628_v19 = vld [vmem:[%s10561_s1 + $0x214] ss:$84 sps:$4 sm:$0xff]  }
  0xb7   : > { %2973 = vmatprep.mubr.bf16.mxu0 %v7565_v20 }
  0xbe   : > { %2974 = vmatmul.mubr.bf16.gmra.mrb[68].mxu0 %v7567_v21 }
  0xbf   : > { %3014 = vmatprep.mubr.bf16.mxu0 %v7572_v22 }
  0xc6   : > { %3015 = vmatmul.mubr.bf16.vlgmr.msra.gmra.mrb[72].mxu0 %v7570_v23  ;;  %v7640_v23 = vld [vmem:[%s8376_s13 + $0x220] sm:$0xff]  }
  0xc7   : > { %6868 = vmatpush3.bf16.msra.mxu0 %v7574_v24  ;;  %3022 = vmatprep.mubr.bf16.mxu0 %v7575_v25  ;;  %v7644_v25 = vld [vmem:[%s8376_s13 + $0x268] sm:$0xff]  }
  0xc8   : > { %6869 = vmatprep.subr.bf16.mxu0 %v7578_v26 }
  0xcb   : > { %6870 = vmatpush3.bf16.msra.mxu0 %v7579_v27  ;;  %v7645_v27 = vld [vmem:[%s8376_s13 + $0x228] sm:$0xff]  }
  0xcc   : > { %6871 = vmatprep.subr.bf16.mxu0 %v7583_v28  ;;  %v7649_v28 = vld [vmem:[%s8376_s13 + $0x270] sm:$0xff]  }
  0xce   : > { %3023 = vmatmul.mubr.bf16.gmra.mrb[76].mxu0 %v7577_v29  ;;  %v7630_v29 = vld [vmem:[%s10561_s1 + $0x210] ss:$84 sps:$4 sm:$0xff]  }
  0xcf   : > { %3030 = vmatprep.mubr.bf16.mxu0 %v7580_v30  ;;  %6872 = vmatpush3.bf16.msra.mxu0 %v7584_v31  ;;  %v7632_v31 = vld [vmem:[%s10561_s1 + $0x2bc] ss:$84 sps:$4 sm:$0xff]  }
  0xd0   : > { %6873 = vmatprep.subr.bf16.mxu0 %v7588_v32 }
  0xd3   : > { %6874 = vmatpush3.bf16.msra.mxu0 %v7591_v33 }
  0xd4   : > { %6875 = vmatprep.subr.bf16.mxu0 %v7595_v34 }
  0xd6   : > { %3031 = vmatmul.mubr.bf16.gmra.mrb[80].mxu0 %v7582_v35  ;;  %v7650_v35 = vld [vmem:[%s8376_s13 + $0x230] sm:$0xff]  }
  0xd7   : > { %3038 = vmatprep.mubr.bf16.mxu0 %v7585_v36  ;;  %6876 = vmatpush3.bf16.msra.mxu0 %v7597_v37  ;;  %v7654_v37 = vld [vmem:[%s8376_s13 + $0x278] sm:$0xff]  }
  0xd8   : > { %6877 = vmatprep.subr.bf16.mxu0 %v7601_v38 }
  0xdb   : > { %6878 = vmatpush3.bf16.msra.mxu0 %v7602_v39  ;;  %v7655_v39 = vld [vmem:[%s8376_s13 + $0x238] sm:$0xff]  }
  0xdc   : > { %6879 = vmatprep.subr.bf16.mxu0 %v7606_v40  ;;  %v7659_v40 = vld [vmem:[%s8376_s13 + $0x2c0] sm:$0xff]  }
  0xde   : > { %3039 = vmatmul.mubr.bf16.gmra.mrb[84].mxu0 %v7587_v41  ;;  %v7635_v41 = vld [vmem:[%s10561_s1 + $0x2b8] ss:$84 sps:$4 sm:$0xff]  }
  0xdf   : > { %3046 = vmatprep.mubr.bf16.mxu0 %v7589_v42  ;;  %6880 = vmatpush3.bf16.msra.mxu0 %v7607_v43 }
  0xe0   : > { %6881 = vmatprep.subr.bf16.mxu0 %v7611_v44 }
  0xe3   : > { %6882 = vmatpush3.bf16.msra.mxu0 %v7612_v45 }
  0xe4   : > { %6937 = vmatprep.subr.bf16.mxu0 %v7616_v46  ;;  %v7636_v46 = vld [vmem:[%s10561_s1 + $0x364] ss:$84 sps:$4 sm:$0xff]  }
  0xe6   : > { %3047 = vmatmul.mubr.bf16.gmra.mrb[88].mxu0 %v7592_v47 }
  0xe7   : > { %3054 = vmatprep.mubr.bf16.mxu0 %v7593_v48 }
  0xee   : > { %3055 = vmatmul.mubr.bf16.gmra.mrb[92].mxu0 %v7596_v49  ;;  %v7639_v49 = vld [vmem:[%s10561_s1 + $0x360] ss:$84 sps:$4 sm:$0xff]  }
  0xef   : > { %3062 = vmatprep.mubr.bf16.mxu0 %v7598_v50 }
  0xf6   : > { %3063 = vmatmul.mubr.bf16.gmra.mrb[96].mxu0 %v7600_v51 }
  0xf7   : > { %3070 = vmatprep.mubr.bf16.mxu0 %v7603_v52 }
  0xfe   : > { %3071 = vmatmul.mubr.bf16.gmra.mrb[100].mxu0 %v7605_v53 }
  0xff   : > { %3078 = vmatprep.mubr.bf16.mxu0 %v7608_v54  ;;  %v7641_v54 = vld [vmem:[%s10561_s1 + $0x40c] ss:$84 sps:$4 sm:$0xff]  }
 0x106   : > { %3079 = vmatmul.mubr.bf16.gmra.mrb[104].mxu0 %v7610_v55 }
 0x107   : > { %3119 = vmatprep.mubr.bf16.mxu0 %v7615_v56 }
 0x109   : > { %v6673_v58 = vpop.f32.mrb[0].mxu0 }
 0x10a   : > { %v6674_v60 = vpop.f32.mrb[1].mxu0 }
 0x10b   : > { %v8609_v61 = vadd.f32 %v6674_v60, %v6673_v58  ;;  %v6676_v62 = vpop.f32.mrb[2].mxu0 }
 0x10c   : > { %v6677_v0 = vpop.f32.mrb[3].mxu0 }
 0x10d   : > { %v8615_v2 = vadd.f32 %v6677_v0, %v6676_v62 }
 0x10e   : > { %3120 = vmatmul.mubr.bf16.vlgmr.msra.gmra.mrb[108].mxu0 %v7613_v57  ;;  %v7643_v57 = vld [vmem:[%s10561_s1 + $0x408] ss:$84 sps:$4 sm:$0xff]  }
 0x10f   : > { %6938 = vmatpush3.bf16.msra.mxu0 %v7617_v59  ;;  %3127 = vmatprep.mubr.bf16.mxu0 %v7618_v63  ;;  %v7646_v63 = vld [vmem:[%s10561_s1 + $0x4b4] ss:$84 sps:$4 sm:$0xff]  }
 0x110   : > { %6939 = vmatprep.subr.bf16.mxu0 %v7621_v1 }
 0x111   : > { %v6679_v6 = vpop.f32.mrb[4].mxu0 }
 0x112   : > { %v6680_v8 = vpop.f32.mrb[5].mxu0 }
 0x113   : > { %v8625_v9 = vadd.f32 %v6680_v8, %v6679_v6  ;;  %v6682_v10 = vpop.f32.mrb[6].mxu0  ;;  %6940 = vmatpush3.bf16.msra.mxu0 %v7622_v3  ;;  %v7648_v3 = vld [vmem:[%s10561_s1 + $0x4b0] ss:$84 sps:$4 sm:$0xff]  }
 0x114   : > { %v6683_v12 = vpop.f32.mrb[7].mxu0  ;;  %6941 = vmatprep.subr.bf16.mxu0 %v7626_v4  ;;  %v7651_v8 = vld [vmem:[%s10561_s1 + $0x55c] ss:$84 sps:$4 sm:$0xff]  }
 0x115   : > { %v8629_v14 = vadd.f32 %v6683_v12, %v6682_v10  ;;  %v7727_v12 = vld [vmem:[%s8376_s13 + $0x3c0] sm:$0xff]  }
 0x116   : > { %3128 = vmatmul.mubr.bf16.gmra.mrb[112].mxu0 %v7620_v5  ;;  %7147 = vmatprep.subr.bf16.mxu1 %v7727_v12 }
 0x117   : > { %3135 = vmatprep.mubr.bf16.mxu0 %v7623_v7  ;;  %6942 = vmatpush3.bf16.msra.mxu0 %v7627_v11 }
 0x118   : > { %6943 = vmatprep.subr.bf16.mxu0 %v7631_v13  ;;  %v7728_v13 = vld [vmem:[%s8376_s13 + $0x380] sm:$0xff]  }
 0x119   : > { %v6685_v18 = vpop.f32.mrb[8].mxu0  ;;  %7148 = vmatpush3.bf16.msra.mxu1 %v7728_v13  ;;  %v7668_v13 = vld [vmem:[%s10561_s1 + $0x170] ss:$84 sps:$4 sm:$0xff]  }
 0x11a   : > { %v6686_v20 = vpop.f32.mrb[9].mxu0 }
 0x11b   : > { %v8639_v21 = vadd.f32 %v6686_v20, %v6685_v18  ;;  %v6688_v22 = vpop.f32.mrb[10].mxu0  ;;  %6944 = vmatpush3.bf16.msra.mxu0 %v7634_v15  ;;  %v7653_v15 = vld [vmem:[%s10561_s1 + $0x558] ss:$84 sps:$4 sm:$0xff]  }
 0x11c   : > { %v6689_v24 = vpop.f32.mrb[11].mxu0  ;;  %6945 = vmatprep.subr.bf16.mxu0 %v7638_v16  ;;  %v7729_v18 = vld [vmem:[%s8376_s13 + $0x3c8] sm:$0xff]  }
 0x11d   : > { %v8643_v26 = vadd.f32 %v6689_v24, %v6688_v22  ;;  %v7658_v22 = vld [vmem:[%s10561_s1 + $0x24] ss:$84 sps:$4 sm:$0xff]   ;;  %7149 = vmatprep.subr.bf16.mxu1 %v7729_v18 }
 0x11e   : > { %3136 = vmatmul.mubr.bf16.gmra.mrb[116].mxu0 %v7625_v17  ;;  %v7683_v18 = vld [vmem:[%s8376_s13 + $0x2a0] sm:$0xff]  }
 0x11f   : > { %3143 = vmatprep.mubr.bf16.mxu0 %v7628_v19  ;;  %6946 = vmatpush3.bf16.msra.mxu0 %v7640_v23  ;;  %v7732_v23 = vld [vmem:[%s8376_s13 + $0x388] sm:$0xff]  }
 0x120   : > { %6947 = vmatprep.subr.bf16.mxu0 %v7644_v25  ;;  %7150 = vmatpush3.bf16.msra.mxu1 %v7732_v23  ;;  %v7687_v23 = vld [vmem:[%s8376_s13 + $0x2e8] sm:$0xff]  }
 0x121   : > { %v6691_v30 = vpop.f32.mrb[12].mxu0 }
 0x122   : > { %v6692_v32 = vpop.f32.mrb[13].mxu0 }
 0x123   : > { %v8653_v33 = vadd.f32 %v6692_v32, %v6691_v30  ;;  %v6694_v34 = vpop.f32.mrb[14].mxu0  ;;  %6948 = vmatpush3.bf16.msra.mxu0 %v7645_v27  ;;  %v7736_v27 = vld [vmem:[%s8376_s13 + $0x3d0] sm:$0xff]  }
 0x124   : > { %v6695_v36 = vpop.f32.mrb[15].mxu0  ;;  %6949 = vmatprep.subr.bf16.mxu0 %v7649_v28  ;;  %v7737_v28 = vld [vmem:[%s8376_s13 + $0x390] sm:$0xff]   ;;  %7151 = vmatprep.subr.bf16.mxu1 %v7736_v27 }
 0x125   : > { %v8657_v38 = vadd.f32 %v6695_v36, %v6694_v34  ;;  %7152 = vmatpush3.bf16.msra.mxu1 %v7737_v28  ;;  %v7738_v34 = vld [vmem:[%s8376_s13 + $0x3d8] sm:$0xff]  }
 0x126   : > { %3144 = vmatmul.mubr.bf16.gmra.mrb[120].mxu0 %v7630_v29  ;;  %v7656_v29 = vld [vmem:[%s10561_s1 + $0x20] ss:$84 sps:$4 sm:$0xff]   ;;  %7153 = vmatprep.subr.bf16.mxu1 %v7738_v34  ;;  %v7763_v28 = vld [vmem:[%s10561_s1 + $0x3c] ss:$84 sps:$4 sm:$0xff]  }
 0x127   : > { %3151 = vmatprep.mubr.bf16.mxu0 %v7632_v31  ;;  %6950 = vmatpush3.bf16.msra.mxu0 %v7650_v35  ;;  %v7660_v31 = vld [vmem:[%s8376_s13 + $0x280] sm:$0xff]  }
 0x128   : > { %6951 = vmatprep.subr.bf16.mxu0 %v7654_v37  ;;  %v7661_v37 = vld [vmem:[%s10561_s1 + $0xcc] ss:$84 sps:$4 sm:$0xff]   ;;  %3539 = vmatprep.mubr.bf16.mxu1 %v7763_v28 }
 0x129   : > { %v6697_v42 = vpop.f32.mrb[16].mxu0 }
 0x12a   : > { %v6698_v43 = vpop.f32.mrb[17].mxu0 }
 0x12b   : > { %v8664_v44 = vadd.f32 %v6698_v43, %v6697_v42  ;;  %v6700_v45 = vpop.f32.mrb[18].mxu0  ;;  %6952 = vmatpush3.bf16.msra.mxu0 %v7655_v39  ;;  %v7741_v39 = vld [vmem:[%s8376_s13 + $0x398] sm:$0xff]  }
 0x12c   : > { %v6701_v47 = vpop.f32.mrb[19].mxu0  ;;  %7007 = vmatprep.subr.bf16.mxu0 %v7659_v40  ;;  %7154 = vmatpush3.bf16.msra.mxu1 %v7741_v39  ;;  %v7675_v39 = vld [vmem:[%s10561_s1 + $0x2c4] ss:$84 sps:$4 sm:$0xff]  }
 0x12d   : > { %v8669_v48 = vadd.f32 %v6701_v47, %v6700_v45  ;;  %v7745_v45 = vld [vmem:[%s8376_s13 + $0x3e0] sm:$0xff]   ;;  %v7669_v47 = vld [vmem:[%s8376_s13 + $0x2d0] sm:$0xff]  }
 0x12e   : > { %3152 = vmatmul.mubr.bf16.gmra.mrb[124].mxu0 %v7635_v41  ;;  %v7664_v41 = vld [vmem:[%s8376_s13 + $0x2c8] sm:$0xff]   ;;  %7155 = vmatprep.subr.bf16.mxu1 %v7745_v45 }
 0x12f   : > { %3159 = vmatprep.mubr.bf16.mxu0 %v7636_v46  ;;  %v7665_v46 = vld [vmem:[%s8376_s13 + $0x288] sm:$0xff]  }
 0x131   : > { %v6703_v50 = vpop.f32.mrb[20].mxu0 }
 0x132   : > { %v6704_v51 = vpop.f32.mrb[21].mxu0 }
 0x133   : > { %v8674_v52 = vadd.f32 %v6704_v51, %v6703_v50  ;;  %v6706_v53 = vpop.f32.mrb[22].mxu0  ;;  %v7746_v50 = vld [vmem:[%s8376_s13 + $0x3a0] sm:$0xff]  }
 0x134   : > { %v6707_v55 = vpop.f32.mrb[23].mxu0  ;;  %7156 = vmatpush3.bf16.msra.mxu1 %v7746_v50  ;;  %v7698_v50 = vld [vmem:[%s8376_s13 + $0x2b8] sm:$0xff]  }
 0x135   : > { %v8679_v56 = vadd.f32 %v6707_v55, %v6706_v53  ;;  %v7666_v53 = vld [vmem:[%s10561_s1 + $0x174] ss:$84 sps:$4 sm:$0xff]  }
 0x136   : > { %3160 = vmatmul.mubr.bf16.gmra.mrb[128].mxu0 %v7639_v49  ;;  %v7747_v55 = vld [vmem:[%s8376_s13 + $0x3e8] sm:$0xff]  }
 0x137   : > { %3167 = vmatprep.mubr.bf16.mxu0 %v7641_v54  ;;  %7157 = vmatprep.subr.bf16.mxu1 %v7747_v55 }
 0x139   : > { %v6709_v58 = vpop.f32.mrb[24].mxu0 }
 0x13a   : > { %v6710_v59 = vpop.f32.mrb[25].mxu0 }
 0x13b   : > { %v8684_v60 = vadd.f32 %v6710_v59, %v6709_v58  ;;  %v6712_v62 = vpop.f32.mrb[26].mxu0  ;;  %v7670_v58 = vld [vmem:[%s8376_s13 + $0x290] sm:$0xff]   ;;  %v7750_v59 = vld [vmem:[%s8376_s13 + $0x3a8] sm:$0xff]  }
 0x13c   : > { %v6713_v0 = vpop.f32.mrb[27].mxu0  ;;  %7158 = vmatpush3.bf16.msra.mxu1 %v7750_v59 }
 0x13d   : > { %v8689_v1 = vadd.f32 %v6713_v0, %v6712_v62 }
 0x13e   : > { %3168 = vmatmul.mubr.bf16.gmra.mrb[132].mxu0 %v7643_v57 }
 0x13f   : > { %3175 = vmatprep.mubr.bf16.mxu0 %v7646_v63  ;;  %v7674_v63 = vld [vmem:[%s8376_s13 + $0x2d8] sm:$0xff]  }
 0x141   : > { %v6715_v4 = vpop.f32.mrb[28].mxu0 }
 0x142   : > { %v6716_v5 = vpop.f32.mrb[29].mxu0 }
 0x143   : > { %v8694_v6 = vadd.f32 %v6716_v5, %v6715_v4  ;;  %v6718_v7 = vpop.f32.mrb[30].mxu0  ;;  %v7753_v4 = vld [vmem:[%s8376_s13 + $0x3f0] sm:$0xff]   ;;  %v7677_v5 = vld [vmem:[%s8376_s13 + $0x298] sm:$0xff]  }
 0x144   : > { %v6719_v10 = vpop.f32.mrb[31].mxu0  ;;  %7159 = vmatprep.subr.bf16.mxu1 %v7753_v4 }
 0x145   : > { %v8699_v11 = vadd.f32 %v6719_v10, %v6718_v7  ;;  %v7681_v10 = vld [vmem:[%s8376_s13 + $0x2e0] sm:$0xff]  }
 0x146   : > { %3176 = vmatmul.mubr.bf16.gmra.mrb[136].mxu0 %v7648_v3 }
 0x147   : > { %3183 = vmatprep.mubr.bf16.mxu0 %v7651_v8  ;;  %v7755_v8 = vld [vmem:[%s8376_s13 + $0x3b0] sm:$0xff]  }
 0x148   : > { %7160 = vmatpush3.bf16.msra.mxu1 %v7755_v8 }
 0x149   : > { %v6721_v16 = vpop.f32.mrb[32].mxu0 }
 0x14a   : > { %v6722_v17 = vpop.f32.mrb[33].mxu0 }
 0x14b   : > { %v8707_v19 = vadd.f32 %v6722_v17, %v6721_v16  ;;  %v6724_v20 = vpop.f32.mrb[34].mxu0 }
 0x14c   : > { %v6725_v24 = vpop.f32.mrb[35].mxu0 }
 0x14d   : > { %v8713_v25 = vadd.f32 %v6725_v24, %v6724_v20  ;;  %v7760_v20 = vld [vmem:[%s8376_s13 + $0x3b8] sm:$0xff]  }
 0x14e   : > { %3184 = vmatmul.mubr.bf16.gmra.mrb[140].mxu0 %v7653_v15  ;;  %v7756_v15 = vld [vmem:[%s8376_s13 + $0x3f8] sm:$0xff]  }
 0x14f   : > { %3224 = vmatprep.mubr.bf16.mxu0 %v7658_v22  ;;  %7161 = vmatprep.subr.bf16.mxu1 %v7756_v15 }
 0x150   : > { %7162 = vmatpush3.bf16.msra.mxu1 %v7760_v20 }
 0x151   : > { %v6743_v30 = vpop.f32.mrb[36].mxu0 }
 0x152   : > { %v6744_v32 = vpop.f32.mrb[37].mxu0 }
 0x153   : > { %v6745_v35 = vadd.f32 %v6744_v32, %v6743_v30  ;;  %v6746_v36 = vpop.f32.mrb[38].mxu0  ;;  %v7688_v30 = vld [vmem:[%s8376_s13 + $0x2a8] sm:$0xff]  }
 0x154   : > { %v6747_v40 = vpop.f32.mrb[39].mxu0 }
 0x155   : > { %v6748_v42 = vadd.f32 %v6747_v40, %v6746_v36  ;;  %v8728_v43 = vadd.f32 %v6745_v35, %v8609_v61  ;;  %v7663_v61 = vld [vmem:[%s10561_s1 + $0xc8] ss:$84 sps:$4 sm:$0xff]   ;;  %v7673_v35 = vld [vmem:[%s10561_s1 + $0x218] ss:$84 sps:$4 sm:$0xff]  }
 0x156   : > { %3225 = vmatmul.mubr.bf16.vlgmr.msra.gmra.mrb[144].mxu0 %v7656_v29  ;;  %v7761_v29 = vld [vmem:[%s10561_s1 + $0x38] ss:$84 sps:$4 sm:$0xff]  }
 0x157   : > { %7008 = vmatpush3.bf16.msra.mxu0 %v7660_v31  ;;  %3232 = vmatprep.mubr.bf16.mxu0 %v7661_v37  ;;  %v8734_v49 = vadd.f32 %v6748_v42, %v8615_v2 }
 0x158   : > { %7009 = vmatprep.subr.bf16.mxu0 %v7664_v41  ;;  %3540 = vmatmul.mubr.bf16.vlgmr.msra.gmra.mrb[0].mxu1 %v7761_v29  ;;  %v7697_v41 = vld [vmem:[%s8376_s13 + $0x2f8] sm:$0xff]  }
 0x159   : > { %v6749_v51 = vpop.f32.mrb[40].mxu0 }
 0x15a   : > { %v6750_v54 = vpop.f32.mrb[41].mxu0 }
 0x15b   : > { %v6751_v57 = vadd.f32 %v6750_v54, %v6749_v51  ;;  %v6752_v2 = vpop.f32.mrb[42].mxu0  ;;  %7010 = vmatpush3.bf16.msra.mxu0 %v7665_v46  ;;  %v7769_v46 = vld [vmem:[%s10561_s1 + $0xe4] ss:$84 sps:$4 sm:$0xff]   ;;  %v7678_v54 = vld [vmem:[%s10561_s1 + $0x2c0] ss:$84 sps:$4 sm:$0xff]  }
 0x15c   : > { %v6753_v62 = vpop.f32.mrb[43].mxu0  ;;  %7011 = vmatprep.subr.bf16.mxu0 %v7669_v47  ;;  %v7771_v47 = vld [vmem:[%s10561_s1 + $0xe0] ss:$84 sps:$4 sm:$0xff]   ;;  %3547 = vmatprep.mubr.bf16.mxu1 %v7769_v46 }
 0x15d   : > { %v6754_v0 = vadd.f32 %v6753_v62, %v6752_v2  ;;  %v8748_v3 = vadd.f32 %v6751_v57, %v8625_v9  ;;  %v7702_v51 = vld [vmem:[%s8376_s13 + $0x340] sm:$0xff]  }
 0x15e   : > { %3233 = vmatmul.mubr.bf16.gmra.mrb[148].mxu0 %v7663_v61  ;;  %v7679_v2 = vld [vmem:[%s10561_s1 + $0x36c] ss:$84 sps:$4 sm:$0xff]  }
 0x15f   : > { %3240 = vmatprep.mubr.bf16.mxu0 %v7666_v53  ;;  %7012 = vmatpush3.bf16.msra.mxu0 %v7670_v58  ;;  %v8753_v7 = vadd.f32 %v6754_v0, %v8629_v14  ;;  %v7671_v14 = vld [vmem:[%s10561_s1 + $0x21c] ss:$84 sps:$4 sm:$0xff]   ;;  %v7777_v62 = vld [vmem:[%s10561_s1 + $0x18c] ss:$84 sps:$4 sm:$0xff]  }
 0x160   : > { %7013 = vmatprep.subr.bf16.mxu0 %v7674_v63  ;;  %3548 = vmatmul.mubr.bf16.gmra.mrb[4].mxu1 %v7771_v47  ;;  %v7779_v63 = vld [vmem:[%s10561_s1 + $0x188] ss:$84 sps:$4 sm:$0xff]   ;;  %v7696_v47 = vld [vmem:[%s10561_s1 + $0x560] ss:$84 sps:$4 sm:$0xff]  }
 0x161   : > { %v6755_v12 = vpop.f32.mrb[44].mxu0  ;;  %3555 = vmatprep.mubr.bf16.mxu1 %v7777_v62 }
 0x162   : > { %v6756_v9 = vpop.f32.mrb[45].mxu0 }
 0x163   : > { %v6757_v16 = vadd.f32 %v6756_v9, %v6755_v12  ;;  %v6758_v17 = vpop.f32.mrb[46].mxu0  ;;  %7014 = vmatpush3.bf16.msra.mxu0 %v7677_v5  ;;  %v7684_v12 = vld [vmem:[%s10561_s1 + $0x414] ss:$84 sps:$4 sm:$0xff]  }
 0x164   : > { %v6759_v22 = vpop.f32.mrb[47].mxu0  ;;  %7015 = vmatprep.subr.bf16.mxu0 %v7681_v10 }
 0x165   : > { %v6760_v24 = vadd.f32 %v6759_v22, %v6758_v17  ;;  %v8768_v27 = vadd.f32 %v6757_v16, %v8639_v21  ;;  %v7692_v21 = vld [vmem:[%s8376_s13 + $0x2f0] sm:$0xff]  }
 0x166   : > { %3241 = vmatmul.mubr.bf16.gmra.mrb[152].mxu0 %v7668_v13  ;;  %v7787_v16 = vld [vmem:[%s10561_s1 + $0x230] ss:$84 sps:$4 sm:$0xff]  }
 0x167   : > { %3248 = vmatprep.mubr.bf16.mxu0 %v7671_v14  ;;  %7016 = vmatpush3.bf16.msra.mxu0 %v7683_v18  ;;  %v8778_v31 = vadd.f32 %v6760_v24, %v8643_v26  ;;  %v7693_v26 = vld [vmem:[%s8376_s13 + $0x2b0] sm:$0xff]  }
 0x168   : > { %7017 = vmatprep.subr.bf16.mxu0 %v7687_v23  ;;  %3556 = vmatmul.mubr.bf16.gmra.mrb[8].mxu1 %v7779_v63  ;;  %v7689_v23 = vld [vmem:[%s10561_s1 + $0x4bc] ss:$84 sps:$4 sm:$0xff]  }
 0x169   : > { %v6761_v32 = vpop.f32.mrb[48].mxu0  ;;  %v7699_v63 = vld [vmem:[%s10561_s1 + $0x28] ss:$84 sps:$4 sm:$0xff]  }
 0x16a   : > { %v6762_v34 = vpop.f32.mrb[49].mxu0 }
 0x16b   : > { %v6763_v36 = vadd.f32 %v6762_v34, %v6761_v32  ;;  %v6764_v37 = vpop.f32.mrb[50].mxu0  ;;  %7018 = vmatpush3.bf16.msra.mxu0 %v7688_v30  ;;  %v7795_v30 = vld [vmem:[%s10561_s1 + $0x2d8] ss:$84 sps:$4 sm:$0xff]  }
 0x16c   : > { %v6765_v40 = vpop.f32.mrb[51].mxu0  ;;  %7019 = vmatprep.subr.bf16.mxu0 %v7692_v21 }
 0x16d   : > { %v6766_v42 = vadd.f32 %v6765_v40, %v6764_v37  ;;  %v8790_v45 = vadd.f32 %v6763_v36, %v8653_v33  ;;  %v7694_v37 = vld [vmem:[%s10561_s1 + $0x564] ss:$84 sps:$4 sm:$0xff]  }
 0x16e   : > { %3249 = vmatmul.mubr.bf16.gmra.mrb[156].mxu0 %v7673_v35 }
 0x16f   : > { %3256 = vmatprep.mubr.bf16.mxu0 %v7675_v39  ;;  %7020 = vmatpush3.bf16.msra.mxu0 %v7693_v26  ;;  %v8800_v61 = vadd.f32 %v6766_v42, %v8657_v38 }
 0x170   : > { %7021 = vmatprep.subr.bf16.mxu0 %v7697_v41  ;;  %v7803_v41 = vld [vmem:[%s10561_s1 + $0x380] ss:$84 sps:$4 sm:$0xff]  }
 0x171   : > { %v6767_v33 = vpop.f32.mrb[52].mxu0 }
 0x172   : > { %v6768_v53 = vpop.f32.mrb[53].mxu0 }
 0x173   : > { %v6769_v55 = vadd.f32 %v6768_v53, %v6767_v33  ;;  %v6770_v57 = vpop.f32.mrb[54].mxu0  ;;  %7022 = vmatpush3.bf16.msra.mxu0 %v7698_v50  ;;  %v7701_v33 = vld [vmem:[%s10561_s1 + $0x2c] ss:$84 sps:$4 sm:$0xff]  }
 0x174   : > { %v6771_v58 = vpop.f32.mrb[55].mxu0  ;;  %7077 = vmatprep.subr.bf16.mxu0 %v7702_v51 }
 0x175   : > { %v6772_v38 = vadd.f32 %v6771_v58, %v6770_v57  ;;  %v8810_v59 = vadd.f32 %v6769_v55, %v8664_v44  ;;  %v7682_v44 = vld [vmem:[%s10561_s1 + $0x368] ss:$84 sps:$4 sm:$0xff]   ;;  %v7808_v55 = vld [vmem:[%s10561_s1 + $0x42c] ss:$84 sps:$4 sm:$0xff]  }
 0x176   : > { %3257 = vmatmul.mubr.bf16.gmra.mrb[160].mxu0 %v7678_v54  ;;  %v7811_v57 = vld [vmem:[%s10561_s1 + $0x428] ss:$84 sps:$4 sm:$0xff]  }
 0x177   : > { %3264 = vmatprep.mubr.bf16.mxu0 %v7679_v2  ;;  %v8819_v0 = vadd.f32 %v6772_v38, %v8669_v48  ;;  %v7785_v48 = vld [vmem:[%s10561_s1 + $0x234] ss:$84 sps:$4 sm:$0xff]   ;;  %v8891_v2 = vld [vmem:[%s8376_s13 + $0x4c0] sm:$0xff]  }
 0x178   : > { %3563 = vmatprep.mubr.bf16.mxu1 %v7785_v48  ;;  %7408 = vmatprep.subr.bf16.mxu1 %v8891_v2 }
 0x179   : > { %v6773_v4 = vpop.f32.mrb[56].mxu0  ;;  %3564 = vmatmul.mubr.bf16.gmra.mrb[12].mxu1 %v7787_v16  ;;  %v7819_v16 = vld [vmem:[%s10561_s1 + $0x4d4] ss:$84 sps:$4 sm:$0xff]  }
 0x17a   : > { %v6774_v5 = vpop.f32.mrb[57].mxu0 }
 0x17b   : > { %v6775_v8 = vadd.f32 %v6774_v5, %v6773_v4  ;;  %v6776_v10 = vpop.f32.mrb[58].mxu0  ;;  %v8905_v4 = vld [vmem:[%s8376_s13 + $0x4c8] sm:$0xff]  }
 0x17c   : > { %v6777_v9 = vpop.f32.mrb[59].mxu0 }
 0x17d   : > { %v6778_v13 = vadd.f32 %v6777_v9, %v6776_v10  ;;  %v8828_v15 = vadd.f32 %v6775_v8, %v8674_v52  ;;  %v7686_v52 = vld [vmem:[%s10561_s1 + $0x410] ss:$84 sps:$4 sm:$0xff]   ;;  %v7704_v8 = vld [vmem:[%s10561_s1 + $0xd4] ss:$84 sps:$4 sm:$0xff]  }
 0x17e   : > { %3265 = vmatmul.mubr.bf16.gmra.mrb[164].mxu0 %v7682_v44  ;;  %v7703_v44 = vld [vmem:[%s8376_s13 + $0x300] sm:$0xff]   ;;  %v8912_v10 = vld [vmem:[%s8376_s13 + $0x488] sm:$0xff]  }
 0x17f   : > { %3272 = vmatprep.mubr.bf16.mxu0 %v7684_v12  ;;  %v8837_v17 = vadd.f32 %v6778_v13, %v8679_v56  ;;  %v7793_v56 = vld [vmem:[%s10561_s1 + $0x2dc] ss:$84 sps:$4 sm:$0xff]   ;;  %v7707_v9 = vld [vmem:[%s8376_s13 + $0x348] sm:$0xff]  }
 0x180   : > { %3571 = vmatprep.mubr.bf16.mxu1 %v7793_v56 }
 0x181   : > { %v6779_v14 = vpop.f32.mrb[60].mxu0  ;;  %3572 = vmatmul.mubr.bf16.gmra.mrb[16].mxu1 %v7795_v30 }
 0x182   : > { %v6780_v18 = vpop.f32.mrb[61].mxu0 }
 0x183   : > { %v6781_v20 = vadd.f32 %v6780_v18, %v6779_v14  ;;  %v6782_v22 = vpop.f32.mrb[62].mxu0  ;;  %v7822_v14 = vld [vmem:[%s10561_s1 + $0x4d0] ss:$84 sps:$4 sm:$0xff]  }
 0x184   : > { %v6783_v24 = vpop.f32.mrb[63].mxu0  ;;  %v8927_v18 = vld [vmem:[%s8376_s13 + $0x4d0] sm:$0xff]  }
 0x185   : > { %v6784_v28 = vadd.f32 %v6783_v24, %v6782_v22  ;;  %v8846_v29 = vadd.f32 %v6781_v20, %v8684_v60  ;;  %v7691_v60 = vld [vmem:[%s10561_s1 + $0x4b8] ss:$84 sps:$4 sm:$0xff]   ;;  %v8934_v20 = vld [vmem:[%s8376_s13 + $0x490] sm:$0xff]  }
 0x186   : > { %3273 = vmatmul.mubr.bf16.gmra.mrb[168].mxu0 %v7686_v52  ;;  %v7712_v22 = vld [vmem:[%s8376_s13 + $0x350] sm:$0xff]  }
 0x187   : > { %3280 = vmatprep.mubr.bf16.mxu0 %v7689_v23  ;;  %v8855_v21 = vadd.f32 %v6784_v28, %v8689_v1  ;;  %v7801_v1 = vld [vmem:[%s10561_s1 + $0x384] ss:$84 sps:$4 sm:$0xff]  }
 0x188   : > { %3579 = vmatprep.mubr.bf16.mxu1 %v7801_v1  ;;  %v8943_v28 = vld [vmem:[%s8376_s13 + $0x4d8] sm:$0xff]  }
 0x189   : > { %v6785_v32 = vpop.f32.mrb[64].mxu0  ;;  %3580 = vmatmul.mubr.bf16.gmra.mrb[20].mxu1 %v7803_v41  ;;  %v7833_v1 = vld [vmem:[%s10561_s1 + $0x578] ss:$84 sps:$4 sm:$0xff]   ;;  %v8965_v41 = vld [vmem:[%s8376_s13 + $0x4e0] sm:$0xff]  }
 0x18a   : > { %v6786_v34 = vpop.f32.mrb[65].mxu0  ;;  %3587 = vmatprep.mubr.bf16.mxu1 %v7808_v55  ;;  %v7714_v55 = vld [vmem:[%s10561_s1 + $0x224] ss:$84 sps:$4 sm:$0xff]  }
 0x18b   : > { %v6787_v35 = vadd.f32 %v6786_v34, %v6785_v32  ;;  %v6788_v36 = vpop.f32.mrb[66].mxu0  ;;  %v7709_v32 = vld [vmem:[%s10561_s1 + $0x17c] ss:$84 sps:$4 sm:$0xff]  }
 0x18c   : > { %v6789_v39 = vpop.f32.mrb[67].mxu0  ;;  %v7713_v34 = vld [vmem:[%s8376_s13 + $0x310] sm:$0xff]  }
 0x18d   : > { %v6790_v26 = vadd.f32 %v6789_v39, %v6788_v36  ;;  %v8864_v40 = vadd.f32 %v6787_v35, %v8694_v6  ;;  %v7717_v36 = vld [vmem:[%s8376_s13 + $0x358] sm:$0xff]  }
 0x18e   : > { %3281 = vmatmul.mubr.bf16.gmra.mrb[172].mxu0 %v7691_v60  ;;  %v8950_v60 = vld [vmem:[%s8376_s13 + $0x498] sm:$0xff]  }
 0x18f   : > { %3288 = vmatprep.mubr.bf16.mxu0 %v7694_v37  ;;  %v8873_v42 = vadd.f32 %v6790_v26, %v8699_v11  ;;  %v7831_v26 = vld [vmem:[%s10561_s1 + $0x57c] ss:$84 sps:$4 sm:$0xff]  }
 0x191   : > { %v6791_v46 = vpop.f32.mrb[68].mxu0  ;;  %3588 = vmatmul.mubr.bf16.gmra.mrb[24].mxu1 %v7811_v57  ;;  %v7726_v57 = vld [vmem:[%s8376_s13 + $0x320] sm:$0xff]  }
 0x192   : > { %v6792_v6 = vpop.f32.mrb[69].mxu0  ;;  %3595 = vmatprep.mubr.bf16.mxu1 %v7819_v16 }
 0x193   : > { %v6793_v50 = vadd.f32 %v6792_v6, %v6791_v46  ;;  %v6794_v51 = vpop.f32.mrb[70].mxu0  ;;  %v8972_v6 = vld [vmem:[%s8376_s13 + $0x4a0] sm:$0xff]  }
 0x194   : > { %v6795_v53 = vpop.f32.mrb[71].mxu0 }
 0x195   : > { %v6796_v54 = vadd.f32 %v6795_v53, %v6794_v51  ;;  %v8882_v11 = vadd.f32 %v6793_v50, %v8707_v19  ;;  %v8897_v19 = vld [vmem:[%s8376_s13 + $0x480] sm:$0xff]  }
 0x196   : > { %3289 = vmatmul.mubr.bf16.gmra.mrb[176].mxu0 %v7696_v47  ;;  %7416 = vmatpush3.bf16.msra.mxu1 %v8897_v19  ;;  %v7724_v47 = vld [vmem:[%s8376_s13 + $0x360] sm:$0xff]  }
 0x197   : > { %3329 = vmatprep.mubr.bf16.mxu0 %v7701_v33  ;;  %v8894_v58 = vadd.f32 %v6796_v54, %v8713_v25  ;;  %7409 = vmatprep.subr.bf16.mxu1 %v8905_v4  ;;  %v8981_v33 = vld [vmem:[%s8376_s13 + $0x4e8] sm:$0xff]  }
 0x199   : > { %v6813_v38 = vpop.f32.mrb[72].mxu0  ;;  %3596 = vmatmul.mubr.bf16.gmra.mrb[28].mxu1 %v7822_v14  ;;  %v7716_v14 = vld [vmem:[%s10561_s1 + $0x220] ss:$84 sps:$4 sm:$0xff]  }
 0x19a   : > { %v6814_v62 = vpop.f32.mrb[73].mxu0  ;;  %7417 = vmatpush3.bf16.msra.mxu1 %v8912_v10  ;;  %3603 = vmatprep.mubr.bf16.mxu1 %v7831_v26  ;;  %v7754_v26 = vld [vmem:[%s8376_s13 + $0x338] sm:$0xff]  }
 0x19b   : > { %v6815_v25 = vadd.f32 %v6814_v62, %v6813_v38  ;;  %v6816_v5 = vpop.f32.mrb[74].mxu0  ;;  %7410 = vmatprep.subr.bf16.mxu1 %v8927_v18  ;;  %v8988_v38 = vld [vmem:[%s8376_s13 + $0x4a8] sm:$0xff]  }
 0x19c   : > { %v6817_v12 = vpop.f32.mrb[75].mxu0 }
 0x19d   : > { %v8917_v13 = vadd.f32 %v6815_v25, %v8728_v43  ;;  %v6818_v48 = vadd.f32 %v6817_v12, %v6816_v5  ;;  %v7708_v43 = vld [vmem:[%s8376_s13 + $0x308] sm:$0xff]  }
 0x19e   : > { %3330 = vmatmul.mubr.bf16.vlgmr.msra.gmra.mrb[180].mxu0 %v7699_v63  ;;  %7418 = vmatpush3.bf16.msra.mxu1 %v8934_v20  ;;  %v7734_v63 = vld [vmem:[%s8376_s13 + $0x368] sm:$0xff]  }
 0x19f   : > { %v8930_v52 = vadd.f32 %v6818_v48, %v8734_v49  ;;  %7078 = vmatpush3.bf16.msra.mxu0 %v7703_v44  ;;  %3337 = vmatprep.mubr.bf16.mxu0 %v7704_v8  ;;  %v7706_v49 = vld [vmem:[%s10561_s1 + $0xd0] ss:$84 sps:$4 sm:$0xff]   ;;  %v7735_v12 = vld [vmem:[%s8376_s13 + $0x328] sm:$0xff]  }
 0x1a0   : > { %7079 = vmatprep.subr.bf16.mxu0 %v7707_v9  ;;  %7411 = vmatprep.subr.bf16.mxu1 %v8943_v28  ;;  %v8997_v44 = vld [vmem:[%s8376_s13 + $0x4f0] sm:$0xff]  }
 0x1a1   : > { %v6819_v23 = vpop.f32.mrb[76].mxu0  ;;  %3604 = vmatmul.mubr.bf16.gmra.mrb[32].mxu1 %v7833_v1  ;;  %v9004_v9 = vld [vmem:[%s8376_s13 + $0x4b0] sm:$0xff]  }
 0x1a2   : > { %v6820_v24 = vpop.f32.mrb[77].mxu0  ;;  %7419 = vmatpush3.bf16.msra.mxu1 %v8950_v60 }
 0x1a3   : > { %v6821_v56 = vadd.f32 %v6820_v24, %v6819_v23  ;;  %v6822_v30 = vpop.f32.mrb[78].mxu0  ;;  %7080 = vmatpush3.bf16.msra.mxu0 %v7708_v43  ;;  %7412 = vmatprep.subr.bf16.mxu1 %v8965_v41  ;;  %v7718_v23 = vld [vmem:[%s10561_s1 + $0x2cc] ss:$84 sps:$4 sm:$0xff]   ;;  %v7744_v24 = vld [vmem:[%s8376_s13 + $0x330] sm:$0xff]  }
 0x1a4   : > { %v6823_v35 = vpop.f32.mrb[79].mxu0  ;;  %7081 = vmatprep.subr.bf16.mxu0 %v7712_v22 }
 0x1a5   : > { %v8955_v37 = vadd.f32 %v6821_v56, %v8748_v3  ;;  %v6824_v39 = vadd.f32 %v6823_v35, %v6822_v30  ;;  %v7720_v3 = vld [vmem:[%s8376_s13 + $0x318] sm:$0xff]   ;;  %v7852_v35 = vld [vmem:[%s10561_s1 + $0xf4] ss:$84 sps:$4 sm:$0xff]  }
 0x1a6   : > { %3338 = vmatmul.mubr.bf16.gmra.mrb[184].mxu0 %v7706_v49  ;;  %7420 = vmatpush3.bf16.msra.mxu1 %v8972_v6  ;;  %v9020_v49 = vld [vmem:[%s8376_s13 + $0x4b8] sm:$0xff]  }
 0x1a7   : > { %v8968_v46 = vadd.f32 %v6824_v39, %v8753_v7  ;;  %3345 = vmatprep.mubr.bf16.mxu0 %v7709_v32  ;;  %7082 = vmatpush3.bf16.msra.mxu0 %v7713_v34  ;;  %v7711_v7 = vld [vmem:[%s10561_s1 + $0x178] ss:$84 sps:$4 sm:$0xff]  }
 0x1a8   : > { %7083 = vmatprep.subr.bf16.mxu0 %v7717_v36  ;;  %7413 = vmatprep.subr.bf16.mxu1 %v8981_v33  ;;  %v7752_v30 = vld [vmem:[%s8376_s13 + $0x378] sm:$0xff]   ;;  %v7850_v36 = vld [vmem:[%s10561_s1 + $0xf0] ss:$84 sps:$4 sm:$0xff]  }
 0x1a9   : > { %v6825_v50 = vpop.f32.mrb[80].mxu0  ;;  %3757 = vmatprep.mubr.bf16.mxu1 %v7852_v35  ;;  %v7739_v35 = vld [vmem:[%s10561_s1 + $0x4c4] ss:$84 sps:$4 sm:$0xff]  }
 0x1aa   : > { %v6826_v51 = vpop.f32.mrb[81].mxu0  ;;  %7421 = vmatpush3.bf16.msra.mxu1 %v8988_v38 }
 0x1ab   : > { %v6827_v53 = vadd.f32 %v6826_v51, %v6825_v50  ;;  %v6828_v54 = vpop.f32.mrb[82].mxu0  ;;  %7084 = vmatpush3.bf16.msra.mxu0 %v7720_v3  ;;  %7414 = vmatprep.subr.bf16.mxu1 %v8997_v44 }
 0x1ac   : > { %v6829_v62 = vpop.f32.mrb[83].mxu0  ;;  %7085 = vmatprep.subr.bf16.mxu0 %v7724_v47  ;;  %v7721_v47 = vld [vmem:[%s10561_s1 + $0x2c8] ss:$84 sps:$4 sm:$0xff]  }
 0x1ad   : > { %v8993_v25 = vadd.f32 %v6827_v53, %v8768_v27  ;;  %v6830_v5 = vadd.f32 %v6829_v62, %v6828_v54  ;;  %v7743_v27 = vld [vmem:[%s8376_s13 + $0x370] sm:$0xff]  }
 0x1ae   : > { %3346 = vmatmul.mubr.bf16.gmra.mrb[188].mxu0 %v7711_v7  ;;  %7422 = vmatpush3.bf16.msra.mxu1 %v9004_v9 }
 0x1af   : > { %v9000_v8 = vadd.f32 %v6830_v5, %v8778_v31  ;;  %3353 = vmatprep.mubr.bf16.mxu0 %v7714_v55  ;;  %7086 = vmatpush3.bf16.msra.mxu0 %v7726_v57  ;;  %v9013_v31 = vld [vmem:[%s8376_s13 + $0x4f8] sm:$0xff]  }
 0x1b0   : > { %7087 = vmatprep.subr.bf16.mxu0 %v7734_v63  ;;  %7415 = vmatprep.subr.bf16.mxu1 %v9013_v31  ;;  %v7856_v55 = vld [vmem:[%s10561_s1 + $0x19c] ss:$84 sps:$4 sm:$0xff]   ;;  %v7858_v57 = vld [vmem:[%s10561_s1 + $0x198] ss:$84 sps:$4 sm:$0xff]  }
 0x1b1   : > { %v6831_v48 = vpop.f32.mrb[84].mxu0 }
 0x1b2   : > { %v6832_v16 = vpop.f32.mrb[85].mxu0  ;;  %7423 = vmatpush3.bf16.msra.mxu1 %v9020_v49 }
 0x1b3   : > { %v6833_v43 = vadd.f32 %v6832_v16, %v6831_v48  ;;  %v6834_v22 = vpop.f32.mrb[86].mxu0  ;;  %7088 = vmatpush3.bf16.msra.mxu0 %v7735_v12  ;;  %v7730_v48 = vld [vmem:[%s10561_s1 + $0x41c] ss:$84 sps:$4 sm:$0xff]  }
 0x1b4   : > { %v6835_v56 = vpop.f32.mrb[87].mxu0  ;;  %7089 = vmatprep.subr.bf16.mxu0 %v7743_v27 }
 0x1b5   : > { %v9025_v32 = vadd.f32 %v6833_v43, %v8790_v45  ;;  %v6836_v34 = vadd.f32 %v6835_v56, %v6834_v22  ;;  %v7764_v45 = vld [vmem:[%s8376_s13 + $0x440] sm:$0xff]   ;;  %3758 = vmatmul.mubr.bf16.vlgmr.msra.gmra.mrb[36].mxu1 %v7850_v36 }
 0x1b6   : > { %3354 = vmatmul.mubr.bf16.gmra.mrb[192].mxu0 %v7716_v14  ;;  %3765 = vmatprep.mubr.bf16.mxu1 %v7856_v55  ;;  %v7862_v43 = vld [vmem:[%s10561_s1 + $0x244] ss:$84 sps:$4 sm:$0xff]   ;;  %v7864_v22 = vld [vmem:[%s10561_s1 + $0x240] ss:$84 sps:$4 sm:$0xff]  }
 0x1b7   : > { %v9035_v39 = vadd.f32 %v6836_v34, %v8800_v61  ;;  %3361 = vmatprep.mubr.bf16.mxu0 %v7718_v23  ;;  %7090 = vmatpush3.bf16.msra.mxu0 %v7744_v24  ;;  %v7722_v61 = vld [vmem:[%s10561_s1 + $0x374] ss:$84 sps:$4 sm:$0xff]  }
 0x1b8   : > { %7091 = vmatprep.subr.bf16.mxu0 %v7752_v30 }
 0x1b9   : > { %v6837_v1 = vpop.f32.mrb[88].mxu0 }
 0x1ba   : > { %v6838_v3 = vpop.f32.mrb[89].mxu0 }
 0x1bb   : > { %v6839_v50 = vadd.f32 %v6838_v3, %v6837_v1  ;;  %v6840_v51 = vpop.f32.mrb[90].mxu0  ;;  %7092 = vmatpush3.bf16.msra.mxu0 %v7754_v26  ;;  %v7870_v1 = vld [vmem:[%s10561_s1 + $0x2e8] ss:$84 sps:$4 sm:$0xff]  }
 0x1bc   : > { %v6841_v7 = vpop.f32.mrb[91].mxu0  ;;  %7217 = vmatprep.subr.bf16.mxu0 %v7764_v45  ;;  %v7868_v45 = vld [vmem:[%s10561_s1 + $0x2ec] ss:$84 sps:$4 sm:$0xff]  }
 0x1bd   : > { %v9046_v53 = vadd.f32 %v6839_v50, %v8810_v59  ;;  %v6842_v54 = vadd.f32 %v6841_v7, %v6840_v51  ;;  %3766 = vmatmul.mubr.bf16.gmra.mrb[40].mxu1 %v7858_v57  ;;  %v7725_v59 = vld [vmem:[%s10561_s1 + $0x370] ss:$84 sps:$4 sm:$0xff]   ;;  %v7748_v7 = vld [vmem:[%s10561_s1 + $0x56c] ss:$84 sps:$4 sm:$0xff]   ;;  %v7874_v57 = vld [vmem:[%s10561_s1 + $0x394] ss:$84 sps:$4 sm:$0xff]  }
 0x1be   : > { %3362 = vmatmul.mubr.bf16.gmra.mrb[196].mxu0 %v7721_v47  ;;  %3773 = vmatprep.mubr.bf16.mxu1 %v7862_v43 }
 0x1bf   : > { %v9055_v62 = vadd.f32 %v6842_v54, %v8819_v0  ;;  %3369 = vmatprep.mubr.bf16.mxu0 %v7722_v61 }
 0x1c1   : > { %v6843_v63 = vpop.f32.mrb[92].mxu0 }
 0x1c2   : > { %v6844_v5 = vpop.f32.mrb[93].mxu0 }
 0x1c3   : > { %v6845_v12 = vadd.f32 %v6844_v5, %v6843_v63  ;;  %v6846_v27 = vpop.f32.mrb[94].mxu0  ;;  %v7876_v63 = vld [vmem:[%s10561_s1 + $0x390] ss:$84 sps:$4 sm:$0xff]  }
 0x1c4   : > { %v6847_v16 = vpop.f32.mrb[95].mxu0 }
 0x1c5   : > { %v9064_v14 = vadd.f32 %v6845_v12, %v8828_v15  ;;  %v6848_v0 = vadd.f32 %v6847_v16, %v6846_v27  ;;  %3774 = vmatmul.mubr.bf16.gmra.mrb[44].mxu1 %v7864_v22  ;;  %v7733_v15 = vld [vmem:[%s10561_s1 + $0x418] ss:$84 sps:$4 sm:$0xff]   ;;  %v7759_v16 = vld [vmem:[%s10561_s1 + $0x34] ss:$84 sps:$4 sm:$0xff]   ;;  %v7880_v22 = vld [vmem:[%s10561_s1 + $0x43c] ss:$84 sps:$4 sm:$0xff]  }
 0x1c6   : > { %3370 = vmatmul.mubr.bf16.gmra.mrb[200].mxu0 %v7725_v59  ;;  %3781 = vmatprep.mubr.bf16.mxu1 %v7868_v45  ;;  %v7772_v45 = vld [vmem:[%s8376_s13 + $0x448] sm:$0xff]  }
 0x1c7   : > { %v9073_v23 = vadd.f32 %v6848_v0, %v8837_v17  ;;  %3377 = vmatprep.mubr.bf16.mxu0 %v7730_v48 }
 0x1c9   : > { %v6849_v24 = vpop.f32.mrb[96].mxu0 }
 0x1ca   : > { %v6850_v56 = vpop.f32.mrb[97].mxu0 }
 0x1cb   : > { %v6851_v30 = vadd.f32 %v6850_v56, %v6849_v24  ;;  %v6852_v34 = vpop.f32.mrb[98].mxu0  ;;  %v7882_v24 = vld [vmem:[%s10561_s1 + $0x438] ss:$84 sps:$4 sm:$0xff]  }
 0x1cc   : > { %v6853_v36 = vpop.f32.mrb[99].mxu0 }
 0x1cd   : > { %v9082_v26 = vadd.f32 %v6851_v30, %v8846_v29  ;;  %v6854_v17 = vadd.f32 %v6853_v36, %v6852_v34  ;;  %3782 = vmatmul.mubr.bf16.gmra.mrb[48].mxu1 %v7870_v1  ;;  %v7742_v29 = vld [vmem:[%s10561_s1 + $0x4c0] ss:$84 sps:$4 sm:$0xff]   ;;  %v7757_v30 = vld [vmem:[%s10561_s1 + $0x30] ss:$84 sps:$4 sm:$0xff]  }
 0x1ce   : > { %3378 = vmatmul.mubr.bf16.gmra.mrb[204].mxu0 %v7733_v15  ;;  %3789 = vmatprep.mubr.bf16.mxu1 %v7874_v57  ;;  %v7765_v36 = vld [vmem:[%s8376_s13 + $0x400] sm:$0xff]  }
 0x1cf   : > { %v9091_v3 = vadd.f32 %v6854_v17, %v8855_v21  ;;  %3385 = vmatprep.mubr.bf16.mxu0 %v7739_v35  ;;  %v7766_v17 = vld [vmem:[%s10561_s1 + $0xdc] ss:$84 sps:$4 sm:$0xff]  }
 0x1d1   : > { %v6855_v47 = vpop.f32.mrb[100].mxu0 }
 0x1d2   : > { %v6856_v50 = vpop.f32.mrb[101].mxu0 }
 0x1d3   : > { %v6857_v51 = vadd.f32 %v6856_v50, %v6855_v47  ;;  %v6858_v61 = vpop.f32.mrb[102].mxu0  ;;  %v7886_v50 = vld [vmem:[%s10561_s1 + $0x4e4] ss:$84 sps:$4 sm:$0xff]  }
 0x1d4   : > { %v6859_v54 = vpop.f32.mrb[103].mxu0 }
 0x1d5   : > { %v9100_v55 = vadd.f32 %v6857_v51, %v8864_v40  ;;  %v6860_v21 = vadd.f32 %v6859_v54, %v6858_v61  ;;  %3790 = vmatmul.mubr.bf16.gmra.mrb[52].mxu1 %v7876_v63  ;;  %v7751_v40 = vld [vmem:[%s10561_s1 + $0x568] ss:$84 sps:$4 sm:$0xff]  }
 0x1d6   : > { %3386 = vmatmul.mubr.bf16.gmra.mrb[208].mxu0 %v7742_v29  ;;  %3797 = vmatprep.mubr.bf16.mxu1 %v7880_v22  ;;  %v7888_v29 = vld [vmem:[%s10561_s1 + $0x4e0] ss:$84 sps:$4 sm:$0xff]   ;;  %v7773_v61 = vld [vmem:[%s8376_s13 + $0x408] sm:$0xff]   ;;  %v7791_v22 = vld [vmem:[%s8376_s13 + $0x418] sm:$0xff]  }
 0x1d7   : > { %v9109_v5 = vadd.f32 %v6860_v21, %v8873_v42  ;;  %3393 = vmatprep.mubr.bf16.mxu0 %v7748_v7  ;;  %v7768_v21 = vld [vmem:[%s10561_s1 + $0xd8] ss:$84 sps:$4 sm:$0xff]  }
 0x1d9   : > { %v6861_v59 = vpop.f32.mrb[104].mxu0 }
 0x1da   : > { %v6862_v12 = vpop.f32.mrb[105].mxu0 }
 0x1db   : > { %v6863_v27 = vadd.f32 %v6862_v12, %v6861_v59  ;;  %v6864_v48 = vpop.f32.mrb[106].mxu0  ;;  %v7781_v59 = vld [vmem:[%s8376_s13 + $0x410] sm:$0xff]  }
 0x1dc   : > { %v6865_v0 = vpop.f32.mrb[107].mxu0 }
 0x1dd   : > { %v9118_v42 = vadd.f32 %v6863_v27, %v8882_v11  ;;  %v6866_v43 = vadd.f32 %v6865_v0, %v6864_v48  ;;  %3798 = vmatmul.mubr.bf16.gmra.mrb[56].mxu1 %v7882_v24  ;;  %v7894_v0 = vld [vmem:[%s10561_s1 + $0x588] ss:$84 sps:$4 sm:$0xff]  }
 0x1de   : > { %3394 = vmatmul.mubr.bf16.gmra.mrb[212].mxu0 %v7751_v40  ;;  %3805 = vmatprep.mubr.bf16.mxu1 %v7886_v50  ;;  %v7788_v40 = vld [vmem:[%s8376_s13 + $0x458] sm:$0xff]   ;;  %v7810_v50 = vld [vmem:[%s8376_s13 + $0x428] sm:$0xff]  }
 0x1df   : > { %v9127_v56 = vadd.f32 %v6866_v43, %v8894_v58  ;;  %3434 = vmatprep.mubr.bf16.mxu0 %v7759_v16  ;;  %v7892_v16 = vld [vmem:[%s10561_s1 + $0x58c] ss:$84 sps:$4 sm:$0xff]  }
 0x1e1   : > { %v6883_v15 = vpop.f32.mrb[108].mxu0 }
 0x1e2   : > { %v6884_v11 = vpop.f32.mrb[109].mxu0 }
 0x1e3   : > { %v6885_v34 = vadd.f32 %v6884_v11, %v6883_v15  ;;  %v6886_v35 = vpop.f32.mrb[110].mxu0  ;;  %v7776_v11 = vld [vmem:[%s10561_s1 + $0x180] ss:$84 sps:$4 sm:$0xff]  }
 0x1e4   : > { %v6887_v58 = vpop.f32.mrb[111].mxu0 }
 0x1e5   : > { %v9138_v1 = vadd.f32 %v6885_v34, %v8917_v13  ;;  %v6888_v47 = vadd.f32 %v6887_v58, %v6886_v35  ;;  %v7780_v13 = vld [vmem:[%s8376_s13 + $0x450] sm:$0xff]   ;;  %3806 = vmatmul.mubr.bf16.gmra.mrb[60].mxu1 %v7888_v29  ;;  %v7800_v35 = vld [vmem:[%s8376_s13 + $0x420] sm:$0xff]  }
 0x1e6   : > { %3435 = vmatmul.mubr.bf16.vlgmr.msra.gmra.mrb[216].mxu0 %v7757_v30  ;;  %3813 = vmatprep.mubr.bf16.mxu1 %v7892_v16  ;;  %v7821_v29 = vld [vmem:[%s8376_s13 + $0x470] sm:$0xff]  }
 0x1e7   : > { %v9147_v51 = vadd.f32 %v6888_v47, %v8930_v52  ;;  %7218 = vmatpush3.bf16.msra.mxu0 %v7765_v36  ;;  %3442 = vmatprep.mubr.bf16.mxu0 %v7766_v17  ;;  %v7774_v52 = vld [vmem:[%s10561_s1 + $0x184] ss:$84 sps:$4 sm:$0xff]   ;;  %v7807_v17 = vld [vmem:[%s8376_s13 + $0x468] sm:$0xff]  }
 0x1e8   : > { %7219 = vmatprep.subr.bf16.mxu0 %v7772_v45 }
 0x1e9   : > { %v6889_v7 = vpop.f32.mrb[112].mxu0 }
 0x1ea   : > { %v6890_v54 = vpop.f32.mrb[113].mxu0 }
 0x1eb   : > { %v6891_v57 = vadd.f32 %v6890_v54, %v6889_v7  ;;  %v6892_v63 = vpop.f32.mrb[114].mxu0  ;;  %7220 = vmatpush3.bf16.msra.mxu0 %v7773_v61 }
 0x1ec   : > { %v6893_v12 = vpop.f32.mrb[115].mxu0  ;;  %7221 = vmatprep.subr.bf16.mxu0 %v7780_v13 }
 0x1ed   : > { %v9160_v27 = vadd.f32 %v6891_v57, %v8955_v37  ;;  %v6894_v48 = vadd.f32 %v6893_v12, %v6892_v63  ;;  %v7798_v37 = vld [vmem:[%s8376_s13 + $0x460] sm:$0xff]   ;;  %3814 = vmatmul.mubr.bf16.gmra.mrb[64].mxu1 %v7894_v0  ;;  %v7834_v63 = vld [vmem:[%s8376_s13 + $0x478] sm:$0xff]  }
 0x1ee   : > { %3443 = vmatmul.mubr.bf16.gmra.mrb[220].mxu0 %v7768_v21  ;;  %v7823_v21 = vld [vmem:[%s8376_s13 + $0x430] sm:$0xff]  }
 0x1ef   : > { %v9169_v43 = vadd.f32 %v6894_v48, %v8968_v46  ;;  %3450 = vmatprep.mubr.bf16.mxu0 %v7774_v52  ;;  %7222 = vmatpush3.bf16.msra.mxu0 %v7781_v59  ;;  %v7782_v46 = vld [vmem:[%s10561_s1 + $0x22c] ss:$84 sps:$4 sm:$0xff]   ;;  %v7792_v0 = vld [vmem:[%s10561_s1 + $0x2d0] ss:$84 sps:$4 sm:$0xff]  }
 0x1f0   : > { %7223 = vmatprep.subr.bf16.mxu0 %v7788_v40  ;;  %v7836_v40 = vld [vmem:[%s8376_s13 + $0x438] sm:$0xff]  }
 0x1f1   : > { %v6895_v24 = vpop.f32.mrb[116].mxu0 }
 0x1f2   : > { %v6896_v15 = vpop.f32.mrb[117].mxu0 }
 0x1f3   : > { %v6897_v30 = vadd.f32 %v6896_v15, %v6895_v24  ;;  %v6898_v34 = vpop.f32.mrb[118].mxu0  ;;  %7224 = vmatpush3.bf16.msra.mxu0 %v7791_v22 }
 0x1f4   : > { %v6899_v36 = vpop.f32.mrb[119].mxu0  ;;  %7225 = vmatprep.subr.bf16.mxu0 %v7798_v37 }
 0x1f5   : > { %v9182_v58 = vadd.f32 %v6897_v30, %v8993_v25  ;;  %v6900_v45 = vadd.f32 %v6899_v36, %v6898_v34  ;;  %v7784_v25 = vld [vmem:[%s10561_s1 + $0x228] ss:$84 sps:$4 sm:$0xff]  }
 0x1f6   : > { %3451 = vmatmul.mubr.bf16.gmra.mrb[224].mxu0 %v7776_v11 }
 0x1f7   : > { %v9185_v47 = vadd.f32 %v6900_v45, %v9000_v8  ;;  %3458 = vmatprep.mubr.bf16.mxu0 %v7782_v46  ;;  %7226 = vmatpush3.bf16.msra.mxu0 %v7800_v35  ;;  %v7789_v8 = vld [vmem:[%s10561_s1 + $0x2d4] ss:$84 sps:$4 sm:$0xff]   ;;  %v7799_v46 = vld [vmem:[%s10561_s1 + $0x378] ss:$84 sps:$4 sm:$0xff]  }
 0x1f8   : > { %7227 = vmatprep.subr.bf16.mxu0 %v7807_v17 }
 0x1f9   : > { %v6901_v61 = vpop.f32.mrb[120].mxu0 }
 0x1fa   : > { %v6902_v13 = vpop.f32.mrb[121].mxu0 }
 0x1fb   : > { %v6903_v7 = vadd.f32 %v6902_v13, %v6901_v61  ;;  %v6904_v54 = vpop.f32.mrb[122].mxu0  ;;  %7228 = vmatpush3.bf16.msra.mxu0 %v7810_v50  ;;  %v7806_v61 = vld [vmem:[%s10561_s1 + $0x420] ss:$84 sps:$4 sm:$0xff]  }
 0x1fc   : > { %v6905_v57 = vpop.f32.mrb[123].mxu0  ;;  %7229 = vmatprep.subr.bf16.mxu0 %v7821_v29 }
 0x1fd   : > { %v9198_v52 = vadd.f32 %v6903_v7, %v9025_v32  ;;  %v6906_v59 = vadd.f32 %v6905_v57, %v6904_v54  ;;  %v7796_v32 = vld [vmem:[%s10561_s1 + $0x37c] ss:$84 sps:$4 sm:$0xff]   ;;  %v7815_v7 = vld [vmem:[%s10561_s1 + $0x4cc] ss:$84 sps:$4 sm:$0xff]  }
 0x1fe   : > { %3459 = vmatmul.mubr.bf16.gmra.mrb[228].mxu0 %v7784_v25 }
 0x1ff   : > { %v9201_v12 = vadd.f32 %v6906_v59, %v9035_v39  ;;  %3466 = vmatprep.mubr.bf16.mxu0 %v7789_v8  ;;  %7230 = vmatpush3.bf16.msra.mxu0 %v7823_v21 }
 0x200   : > { %7231 = vmatprep.subr.bf16.mxu0 %v7834_v63  ;;  %v7818_v63 = vld [vmem:[%s10561_s1 + $0x4c8] ss:$84 sps:$4 sm:$0xff]  }
 0x201   : > { %v6907_v48 = vpop.f32.mrb[124].mxu0 }
 0x202   : > { %v6908_v16 = vpop.f32.mrb[125].mxu0 }
 0x203   : > { %v6909_v22 = vadd.f32 %v6908_v16, %v6907_v48  ;;  %v6910_v37 = vpop.f32.mrb[126].mxu0  ;;  %7232 = vmatpush3.bf16.msra.mxu0 %v7836_v40  ;;  %v7827_v48 = vld [vmem:[%s10561_s1 + $0x574] ss:$84 sps:$4 sm:$0xff]  }
 0x204   : > { %v6911_v24 = vpop.f32.mrb[127].mxu0  ;;  %7287 = vmatprep.subr.bf16.mxu0 %v8891_v2  ;;  %v7804_v2 = vld [vmem:[%s10561_s1 + $0x424] ss:$84 sps:$4 sm:$0xff]  }
 0x205   : > { %v9212_v39 = vadd.f32 %v6909_v22, %v9046_v53  ;;  %v6912_v15 = vadd.f32 %v6911_v24, %v6910_v37 }
 0x206   : > { %3467 = vmatmul.mubr.bf16.gmra.mrb[232].mxu0 %v7792_v0 }
 0x207   : > { %v9215_v11 = vadd.f32 %v6912_v15, %v9055_v62  ;;  %3474 = vmatprep.mubr.bf16.mxu0 %v7796_v32  ;;  %v7830_v32 = vld [vmem:[%s10561_s1 + $0x570] ss:$84 sps:$4 sm:$0xff]  }
 0x209   : > { %v6913_v30 = vpop.f32.mrb[128].mxu0 }
 0x20a   : > { %v6914_v34 = vpop.f32.mrb[129].mxu0 }
 0x20b   : > { %v6915_v35 = vadd.f32 %v6914_v34, %v6913_v30  ;;  %v6916_v36 = vpop.f32.mrb[130].mxu0  ;;  %v7841_v30 = vld [vmem:[%s10561_s1 + $0x44] ss:$84 sps:$4 sm:$0xff]  }
 0x20c   : > { %v6917_v53 = vpop.f32.mrb[131].mxu0 }
 0x20d   : > { %v9224_v17 = vadd.f32 %v6915_v35, %v9064_v14  ;;  %v6918_v45 = vadd.f32 %v6917_v53, %v6916_v36 }
 0x20e   : > { %3475 = vmatmul.mubr.bf16.gmra.mrb[236].mxu0 %v7799_v46 }
 0x20f   : > { %v9227_v62 = vadd.f32 %v6918_v45, %v9073_v23  ;;  %3482 = vmatprep.mubr.bf16.mxu0 %v7804_v2  ;;  %v7839_v2 = vld [vmem:[%s10561_s1 + $0x40] ss:$84 sps:$4 sm:$0xff]  }
 0x211   : > { %v6919_v50 = vpop.f32.mrb[132].mxu0 }
 0x212   : > { %v6920_v29 = vpop.f32.mrb[133].mxu0 }
 0x213   : > { %v6921_v13 = vadd.f32 %v6920_v29, %v6919_v50  ;;  %v6922_v25 = vpop.f32.mrb[134].mxu0  ;;  %v7848_v50 = vld [vmem:[%s10561_s1 + $0xec] ss:$84 sps:$4 sm:$0xff]  }
 0x214   : > { %v6923_v14 = vpop.f32.mrb[135].mxu0 }
 0x215   : > { %v9236_v54 = vadd.f32 %v6921_v13, %v9082_v26  ;;  %v6924_v8 = vadd.f32 %v6923_v14, %v6922_v25 }
 0x216   : > { %3483 = vmatmul.mubr.bf16.gmra.mrb[240].mxu0 %v7806_v61 }
 0x217   : > { %v9239_v23 = vadd.f32 %v6924_v8, %v9091_v3  ;;  %3490 = vmatprep.mubr.bf16.mxu0 %v7815_v7  ;;  %v7846_v7 = vld [vmem:[%s10561_s1 + $0xe8] ss:$84 sps:$4 sm:$0xff]  }
 0x219   : > { %v6925_v21 = vpop.f32.mrb[136].mxu0 }
 0x21a   : > { %v6926_v57 = vpop.f32.mrb[137].mxu0 }
 0x21b   : > { %v6927_v59 = vadd.f32 %v6926_v57, %v6925_v21  ;;  %v6928_v40 = vpop.f32.mrb[138].mxu0 }
 0x21c   : > { %v6929_v26 = vpop.f32.mrb[139].mxu0 }
 0x21d   : > { %v9248_v16 = vadd.f32 %v6927_v59, %v9100_v55  ;;  %v6930_v0 = vadd.f32 %v6929_v26, %v6928_v40 }
 0x21e   : > { %3491 = vmatmul.mubr.bf16.gmra.mrb[244].mxu0 %v7818_v63  ;;  %v7853_v63 = vld [vmem:[%s10561_s1 + $0x190] ss:$84 sps:$4 sm:$0xff]  }
 0x21f   : > { %v9251_v3 = vadd.f32 %v6930_v0, %v9109_v5  ;;  %3498 = vmatprep.mubr.bf16.mxu0 %v7827_v48 }
 0x221   : > { %v6931_v22 = vpop.f32.mrb[140].mxu0 }
 0x222   : > { %v6932_v37 = vpop.f32.mrb[141].mxu0 }
 0x223   : > { %v6933_v24 = vadd.f32 %v6932_v37, %v6931_v22  ;;  %v6934_v15 = vpop.f32.mrb[142].mxu0 }
 0x224   : > { %v6935_v55 = vpop.f32.mrb[143].mxu0 }
 0x225   : > { %v9260_v34 = vadd.f32 %v6933_v24, %v9118_v42  ;;  %v6936_v46 = vadd.f32 %v6935_v55, %v6934_v15 }
 0x226   : > { %3499 = vmatmul.mubr.bf16.gmra.mrb[248].mxu0 %v7830_v32  ;;  %v7859_v32 = vld [vmem:[%s10561_s1 + $0x238] ss:$84 sps:$4 sm:$0xff]  }
 0x227   : > { %v9263_v5 = vadd.f32 %v6936_v46, %v9127_v56  ;;  %3644 = vmatprep.mubr.bf16.mxu0 %v7841_v30 }
 0x229   : > { %v6953_v35 = vpop.f32.mrb[144].mxu0 }
 0x22a   : > { %v6954_v36 = vpop.f32.mrb[145].mxu0 }
 0x22b   : > { %v6955_v53 = vadd.f32 %v6954_v36, %v6953_v35  ;;  %v6956_v45 = vpop.f32.mrb[146].mxu0 }
 0x22c   : > { %v6957_v42 = vpop.f32.mrb[147].mxu0 }
 0x22d   : > { %v9272_v29 = vadd.f32 %v6955_v53, %v9138_v1  ;;  %v6958_v61 = vadd.f32 %v6957_v42, %v6956_v45  ;;  %v7855_v1 = vld [vmem:[%s10561_s1 + $0x194] ss:$84 sps:$4 sm:$0xff]  }
 0x22e   : > { %3645 = vmatmul.mubr.bf16.vlgmr.msra.gmra.mrb[252].mxu0 %v7839_v2  ;;  %v7865_v45 = vld [vmem:[%s10561_s1 + $0x2e0] ss:$84 sps:$4 sm:$0xff]  }
 0x22f   : > { %v9275_v56 = vadd.f32 %v6958_v61, %v9147_v51  ;;  %7288 = vmatpush3.bf16.msra.mxu0 %v8897_v19  ;;  %3652 = vmatprep.mubr.bf16.mxu0 %v7848_v50  ;;  %v8308_v61 = vmov 0.0  }
 0x230   : > { %7289 = vmatprep.subr.bf16.mxu0 %v8905_v4 }
 0x231   : > { %v6959_v13 = vpop.f32.mrb[148].mxu0 }
 0x232   : > { %v6960_v25 = vpop.f32.mrb[149].mxu0 }
 0x233   : > { %v6961_v14 = vadd.f32 %v6960_v25, %v6959_v13  ;;  %v6962_v8 = vpop.f32.mrb[150].mxu0  ;;  %7290 = vmatpush3.bf16.msra.mxu0 %v8912_v10 }
 0x234   : > { %v6963_v51 = vpop.f32.mrb[151].mxu0  ;;  %7291 = vmatprep.subr.bf16.mxu0 %v8927_v18 }
 0x235   : > { %v9288_v19 = vadd.f32 %v6961_v14, %v9160_v27  ;;  %v6964_v4 = vadd.f32 %v6963_v51, %v6962_v8  ;;  %v7861_v27 = vld [vmem:[%s10561_s1 + $0x23c] ss:$84 sps:$4 sm:$0xff]  }
 0x236   : > { %3653 = vmatmul.mubr.bf16.gmra.mrb[0].mxu0 %v7846_v7 }
 0x237   : > { %v9291_v21 = vadd.f32 %v6964_v4, %v9169_v43  ;;  %3660 = vmatprep.mubr.bf16.mxu0 %v7855_v1  ;;  %7292 = vmatpush3.bf16.msra.mxu0 %v8934_v20  ;;  %v7163_v20 = vpop.f32.mrb[0].mxu1 }
 0x238   : > { %7293 = vmatprep.subr.bf16.mxu0 %v8943_v28  ;;  %v7164_v48 = vpop.f32.mrb[1].mxu1 }
 0x239   : > { %v6965_v10 = vpop.f32.mrb[152].mxu0  ;;  %v9306_v26 = vadd.f32 %v7164_v48, %v7163_v20  ;;  %v7166_v0 = vpop.f32.mrb[2].mxu1 }
 0x23a   : > { %v6966_v57 = vpop.f32.mrb[153].mxu0 }
 0x23b   : > { %v6967_v18 = vadd.f32 %v6966_v57, %v6965_v10  ;;  %v6968_v59 = vpop.f32.mrb[154].mxu0  ;;  %7294 = vmatpush3.bf16.msra.mxu0 %v8950_v60  ;;  %v7167_v60 = vpop.f32.mrb[3].mxu1 }
 0x23c   : > { %v6969_v43 = vpop.f32.mrb[155].mxu0  ;;  %7295 = vmatprep.subr.bf16.mxu0 %v8965_v41  ;;  %v9313_v41 = vadd.f32 %v7167_v60, %v7166_v0 }
 0x23d   : > { %v9304_v28 = vadd.f32 %v6967_v18, %v9182_v58  ;;  %v6970_v40 = vadd.f32 %v6969_v43, %v6968_v59  ;;  %v7879_v18 = vld [vmem:[%s10561_s1 + $0x434] ss:$84 sps:$4 sm:$0xff]  }
 0x23e   : > { %3661 = vmatmul.mubr.bf16.gmra.mrb[4].mxu0 %v7853_v63 }
 0x23f   : > { %v9309_v22 = vadd.f32 %v6970_v40, %v9185_v47  ;;  %3668 = vmatprep.mubr.bf16.mxu0 %v7861_v27  ;;  %7296 = vmatpush3.bf16.msra.mxu0 %v8972_v6  ;;  %v7867_v47 = vld [vmem:[%s10561_s1 + $0x2e4] ss:$84 sps:$4 sm:$0xff]  }
 0x240   : > { %7297 = vmatprep.subr.bf16.mxu0 %v8981_v33  ;;  %v7169_v33 = vpop.f32.mrb[4].mxu1 }
 0x241   : > { %v6971_v37 = vpop.f32.mrb[156].mxu0  ;;  %v7170_v46 = vpop.f32.mrb[5].mxu1 }
 0x242   : > { %v6972_v58 = vpop.f32.mrb[157].mxu0  ;;  %v9326_v35 = vadd.f32 %v7170_v46, %v7169_v33  ;;  %v7172_v36 = vpop.f32.mrb[6].mxu1 }
 0x243   : > { %v6973_v24 = vadd.f32 %v6972_v58, %v6971_v37  ;;  %v6974_v15 = vpop.f32.mrb[158].mxu0  ;;  %7298 = vmatpush3.bf16.msra.mxu0 %v8988_v38  ;;  %v7173_v38 = vpop.f32.mrb[7].mxu1 }
 0x244   : > { %v6975_v6 = vpop.f32.mrb[159].mxu0  ;;  %7299 = vmatprep.subr.bf16.mxu0 %v8997_v44  ;;  %v9333_v44 = vadd.f32 %v7173_v38, %v7172_v36 }
 0x245   : > { %v9324_v30 = vadd.f32 %v6973_v24, %v9198_v52  ;;  %v6976_v55 = vadd.f32 %v6975_v6, %v6974_v15 }
 0x246   : > { %3669 = vmatmul.mubr.bf16.gmra.mrb[8].mxu0 %v7859_v32 }
 0x247   : > { %v9329_v2 = vadd.f32 %v6976_v55, %v9201_v12  ;;  %3676 = vmatprep.mubr.bf16.mxu0 %v7867_v47  ;;  %7300 = vmatpush3.bf16.msra.mxu0 %v9004_v9  ;;  %v7873_v12 = vld [vmem:[%s10561_s1 + $0x38c] ss:$84 sps:$4 sm:$0xff]   ;;  %v7885_v47 = vld [vmem:[%s10561_s1 + $0x4dc] ss:$84 sps:$4 sm:$0xff]  }
 0x248   : > { %7301 = vmatprep.subr.bf16.mxu0 %v9013_v31  ;;  %v7175_v31 = vpop.f32.mrb[8].mxu1 }
 0x249   : > { %v6977_v53 = vpop.f32.mrb[160].mxu0  ;;  %v7176_v7 = vpop.f32.mrb[9].mxu1 }
 0x24a   : > { %v6978_v52 = vpop.f32.mrb[161].mxu0  ;;  %v9346_v14 = vadd.f32 %v7176_v7, %v7175_v31  ;;  %v7178_v8 = vpop.f32.mrb[10].mxu1  ;;  %v7891_v31 = vld [vmem:[%s10561_s1 + $0x584] ss:$84 sps:$4 sm:$0xff]  }
 0x24b   : > { %v6979_v50 = vadd.f32 %v6978_v52, %v6977_v53  ;;  %v6980_v42 = vpop.f32.mrb[162].mxu0  ;;  %7302 = vmatpush3.bf16.msra.mxu0 %v9020_v49  ;;  %v7179_v51 = vpop.f32.mrb[11].mxu1 }
 0x24c   : > { %v6981_v9 = vpop.f32.mrb[163].mxu0  ;;  %7368 = vmatprep.subr.bf16.mxu0 %v8308_v61  ;;  %v9351_v49 = vadd.f32 %v7179_v51, %v7178_v8  ;;  %v7181_v27 = vpop.f32.mrb[12].mxu1 }
 0x24d   : > { %v9344_v13 = vadd.f32 %v6979_v50, %v9212_v39  ;;  %v6982_v25 = vadd.f32 %v6981_v9, %v6980_v42  ;;  %v7871_v39 = vld [vmem:[%s10561_s1 + $0x388] ss:$84 sps:$4 sm:$0xff]   ;;  %v7182_v20 = vpop.f32.mrb[13].mxu1 }
 0x24e   : > { %3677 = vmatmul.mubr.bf16.gmra.mrb[12].mxu0 %v7865_v45  ;;  %v9362_v40 = vadd.f32 %v7182_v20, %v7181_v27  ;;  %v7184_v48 = vpop.f32.mrb[14].mxu1  ;;  %v7897_v20 = vld [vmem:[%s10561_s1 + $0x4c] ss:$84 sps:$4 sm:$0xff]  }
 0x24f   : > { %v9349_v1 = vadd.f32 %v6982_v25, %v9215_v11  ;;  %3684 = vmatprep.mubr.bf16.mxu0 %v7873_v12  ;;  %v7185_v60 = vpop.f32.mrb[15].mxu1 }
 0x250   : > { %v9367_v37 = vadd.f32 %v7185_v60, %v7184_v48 }
 0x251   : > { %v6983_v4 = vpop.f32.mrb[164].mxu0 }
 0x252   : > { %v6984_v10 = vpop.f32.mrb[165].mxu0 }
 0x253   : > { %v6985_v57 = vadd.f32 %v6984_v10, %v6983_v4  ;;  %v6986_v63 = vpop.f32.mrb[166].mxu0 }
 0x254   : > { %v6987_v59 = vpop.f32.mrb[167].mxu0  ;;  %v7187_v33 = vpop.f32.mrb[16].mxu1 }
 0x255   : > { %v9360_v11 = vadd.f32 %v6985_v57, %v9224_v17  ;;  %v6988_v43 = vadd.f32 %v6987_v59, %v6986_v63  ;;  %v7877_v17 = vld [vmem:[%s10561_s1 + $0x430] ss:$84 sps:$4 sm:$0xff]   ;;  %v7188_v46 = vpop.f32.mrb[17].mxu1 }
 0x256   : > { %3685 = vmatmul.mubr.bf16.gmra.mrb[16].mxu0 %v7871_v39  ;;  %v9378_v36 = vadd.f32 %v7188_v46, %v7187_v33  ;;  %v7190_v38 = vpop.f32.mrb[18].mxu1 }
 0x257   : > { %v9365_v0 = vadd.f32 %v6988_v43, %v9227_v62  ;;  %3692 = vmatprep.mubr.bf16.mxu0 %v7879_v18  ;;  %v7191_v52 = vpop.f32.mrb[19].mxu1 }
 0x258   : > { %v9383_v45 = vadd.f32 %v7191_v52, %v7190_v38  ;;  %v7898_v52 = vld [vmem:[%s8376_s13 + $0x500] sm:$0xff]  }
 0x259   : > { %v6989_v58 = vpop.f32.mrb[168].mxu0 }
 0x25a   : > { %v6990_v32 = vpop.f32.mrb[169].mxu0 }
 0x25b   : > { %v6991_v24 = vadd.f32 %v6990_v32, %v6989_v58  ;;  %v6992_v15 = vpop.f32.mrb[170].mxu0 }
 0x25c   : > { %v6993_v6 = vpop.f32.mrb[171].mxu0  ;;  %v7193_v7 = vpop.f32.mrb[20].mxu1 }
 0x25d   : > { %v9376_v62 = vadd.f32 %v6991_v24, %v9236_v54  ;;  %v6994_v55 = vadd.f32 %v6993_v6, %v6992_v15  ;;  %v7883_v54 = vld [vmem:[%s10561_s1 + $0x4d8] ss:$84 sps:$4 sm:$0xff]   ;;  %v7194_v51 = vpop.f32.mrb[21].mxu1 }
 0x25e   : > { %3693 = vmatmul.mubr.bf16.gmra.mrb[20].mxu0 %v7877_v17  ;;  %v9394_v4 = vadd.f32 %v7194_v51, %v7193_v7  ;;  %v7196_v10 = vpop.f32.mrb[22].mxu1  ;;  %v7899_v7 = vld [vmem:[%s8376_s13 + $0x508] sm:$0xff]  }
 0x25f   : > { %v9381_v53 = vadd.f32 %v6994_v55, %v9239_v23  ;;  %3700 = vmatprep.mubr.bf16.mxu0 %v7885_v47  ;;  %v7197_v57 = vpop.f32.mrb[23].mxu1 }
 0x260   : > { %v9399_v63 = vadd.f32 %v7197_v57, %v7196_v10  ;;  %v7900_v57 = vld [vmem:[%s10561_s1 + $0x50] ss:$84 sps:$4 sm:$0xff]  }
 0x261   : > { %v6995_v50 = vpop.f32.mrb[172].mxu0 }
 0x262   : > { %v6996_v42 = vpop.f32.mrb[173].mxu0 }
 0x263   : > { %v6997_v12 = vadd.f32 %v6996_v42, %v6995_v50  ;;  %v6998_v9 = vpop.f32.mrb[174].mxu0 }
 0x264   : > { %v6999_v25 = vpop.f32.mrb[175].mxu0  ;;  %v7199_v60 = vpop.f32.mrb[24].mxu1 }
 0x265   : > { %v9392_v23 = vadd.f32 %v6997_v12, %v9248_v16  ;;  %v7000_v8 = vadd.f32 %v6999_v25, %v6998_v9  ;;  %v7889_v16 = vld [vmem:[%s10561_s1 + $0x580] ss:$84 sps:$4 sm:$0xff]   ;;  %v7200_v32 = vpop.f32.mrb[25].mxu1 }
 0x266   : > { %3701 = vmatmul.mubr.bf16.gmra.mrb[24].mxu0 %v7883_v54  ;;  %v9410_v17 = vadd.f32 %v7200_v32, %v7199_v60  ;;  %v7202_v24 = vpop.f32.mrb[26].mxu1 }
 0x267   : > { %v9397_v39 = vadd.f32 %v7000_v8, %v9251_v3  ;;  %3708 = vmatprep.mubr.bf16.mxu0 %v7891_v31  ;;  %v7203_v47 = vpop.f32.mrb[27].mxu1 }
 0x268   : > { %v9415_v6 = vadd.f32 %v7203_v47, %v7202_v24 }
 0x269   : > { %v7001_v18 = vpop.f32.mrb[176].mxu0 }
 0x26a   : > { %v7002_v59 = vpop.f32.mrb[177].mxu0 }
 0x26b   : > { %v7003_v27 = vadd.f32 %v7002_v59, %v7001_v18  ;;  %v7004_v43 = vpop.f32.mrb[178].mxu0 }
 0x26c   : > { %v7005_v48 = vpop.f32.mrb[179].mxu0  ;;  %v7205_v42 = vpop.f32.mrb[28].mxu1 }
 0x26d   : > { %v9408_v3 = vadd.f32 %v7003_v27, %v9260_v34  ;;  %v7006_v58 = vadd.f32 %v7005_v48, %v7004_v43  ;;  %v7895_v34 = vld [vmem:[%s10561_s1 + $0x48] ss:$84 sps:$4 sm:$0xff]   ;;  %v7206_v12 = vpop.f32.mrb[29].mxu1 }
 0x26e   : > { %3709 = vmatmul.mubr.bf16.gmra.mrb[28].mxu0 %v7889_v16  ;;  %v9424_v9 = vadd.f32 %v7206_v12, %v7205_v42  ;;  %v7208_v31 = vpop.f32.mrb[30].mxu1 }
 0x26f   : > { %v9413_v15 = vadd.f32 %v7006_v58, %v9263_v5  ;;  %3749 = vmatprep.mubr.bf16.mxu0 %v7897_v20  ;;  %v7209_v8 = vpop.f32.mrb[31].mxu1 }
 0x271   : > { %v7023_v33 = vpop.f32.mrb[180].mxu0 }
 0x272   : > { %v7024_v55 = vpop.f32.mrb[181].mxu0 }
 0x273   : > { %v7025_v46 = vadd.f32 %v7024_v55, %v7023_v33  ;;  %v7026_v38 = vpop.f32.mrb[182].mxu0 }
 0x274   : > { %v7027_v50 = vpop.f32.mrb[183].mxu0  ;;  %v7211_v16 = vpop.f32.mrb[32].mxu1 }
 0x275   : > { %v9422_v54 = vadd.f32 %v7025_v46, %v9272_v29  ;;  %v7028_v5 = vadd.f32 %v7027_v50, %v7026_v38  ;;  %v9433_v29 = vadd.f32 %v7209_v8, %v7208_v31  ;;  %v7212_v20 = vpop.f32.mrb[33].mxu1 }
 0x276   : > { %3750 = vmatmul.mubr.bf16.vlgmr.msra.gmra.mrb[32].mxu0 %v7895_v34  ;;  %v9442_v48 = vadd.f32 %v7212_v20, %v7211_v16  ;;  %v7214_v60 = vpop.f32.mrb[34].mxu1 }
 0x277   : > { %v9427_v25 = vadd.f32 %v7028_v5, %v9275_v56  ;;  %7369 = vmatpush3.bf16.msra.mxu0 %v7898_v52  ;;  %7372 = vmatprep.mubr.msk.bf16.mxu0 %vm8309_vm0, %v8308_v61  ;;  %v7215_v32 = vpop.f32.mrb[35].mxu1  ;;  %v7902_v5 = vld [vmem:[%s10561_s1 + $0x1a0] ss:$84 sps:$4 sm:$0xff]  }
 0x278   : > { %7370 = vmatprep.subr.bf16.mxu0 %v8308_v61  ;;  %v9449_v24 = vadd.f32 %v7215_v32, %v7214_v60 }
 0x279   : > { %v7029_v51 = vpop.f32.mrb[184].mxu0 }
 0x27a   : > { %v7030_v10 = vpop.f32.mrb[185].mxu0 }
 0x27b   : > { %v7031_v18 = vadd.f32 %v7030_v10, %v7029_v51  ;;  %v7032_v56 = vpop.f32.mrb[186].mxu0  ;;  %7371 = vmatpush3.bf16.msra.mxu0 %v7899_v7 }
 0x27c   : > { %v7033_v59 = vpop.f32.mrb[187].mxu0 }
 0x27d   : > { %v9439_v27 = vadd.f32 %v7031_v18, %v9288_v19  ;;  %v7034_v43 = vadd.f32 %v7033_v59, %v7032_v56  ;;  %v7901_v19 = vld [vmem:[%s10561_s1 + $0xf8] ss:$84 sps:$4 sm:$0xff]  }
 0x27e   : > { %7373 = vmatmul.mubr.msk.bf16.vlgmr.msra.gmra.mrb[36].mxu0 %vm2744_vm1, %v7900_v57 }
 0x27f   : > { %v9445_v58 = vadd.f32 %v7034_v43, %v9291_v21  ;;  %7376 = vmatprep.mubr.msk.bf16.mxu0 %vm8309_vm0, %v8308_v61 }
 0x281   : > { %v7035_v47 = vpop.f32.mrb[188].mxu0 }
 0x282   : > { %v7036_v33 = vpop.f32.mrb[189].mxu0 }
 0x283   : > { %v7037_v55 = vadd.f32 %v7036_v33, %v7035_v47  ;;  %v7038_v34 = vpop.f32.mrb[190].mxu0 }
 0x284   : > { %v7039_v46 = vpop.f32.mrb[191].mxu0 }
 0x285   : > { %v9455_v38 = vadd.f32 %v7037_v55, %v9304_v28  ;;  %v7040_v21 = vadd.f32 %v7039_v46, %v7038_v34 }
 0x286   : > { %7377 = vmatmul.mubr.msk.bf16.gmra.mrb[40].mxu0 %vm2744_vm1, %v7901_v19 }
 0x287   : > { %v9459_v52 = vadd.f32 %v7040_v21, %v9309_v22  ;;  %7380 = vmatprep.mubr.msk.bf16.mxu0 %vm8309_vm0, %v8308_v61 }
 0x288   : > { %v7309_v28 = vpop.f32.mrb[36].mxu1 }
 0x289   : > { %v7041_v50 = vpop.f32.mrb[192].mxu0  ;;  %v7310_v10 = vpop.f32.mrb[37].mxu1 }
 0x28a   : > { %v7042_v42 = vpop.f32.mrb[193].mxu0  ;;  %v9470_v22 = vadd.f32 %v7310_v10, %v7309_v28  ;;  %v7312_v57 = vpop.f32.mrb[38].mxu1 }
 0x28b   : > { %v7043_v12 = vadd.f32 %v7042_v42, %v7041_v50  ;;  %v7044_v31 = vpop.f32.mrb[194].mxu0  ;;  %v7313_v56 = vpop.f32.mrb[39].mxu1 }
 0x28c   : > { %v7045_v7 = vpop.f32.mrb[195].mxu0  ;;  %v9477_v59 = vadd.f32 %v7313_v56, %v7312_v57 }
 0x28d   : > { %v9467_v8 = vadd.f32 %v7043_v12, %v9324_v30  ;;  %v7046_v51 = vadd.f32 %v7045_v7, %v7044_v31  ;;  %v7903_v30 = vld [vmem:[%s10561_s1 + $0x248] ss:$84 sps:$4 sm:$0xff]  }
 0x28e   : > { %7381 = vmatmul.mubr.msk.bf16.gmra.mrb[44].mxu0 %vm2744_vm1, %v7902_v5 }
 0x28f   : > { %v9473_v18 = vadd.f32 %v7046_v51, %v9329_v2  ;;  %7384 = vmatprep.mubr.msk.bf16.mxu0 %vm8309_vm0, %v8308_v61 }
 0x290   : > { %v7315_v47 = vpop.f32.mrb[40].mxu1 }
 0x291   : > { %v7047_v16 = vpop.f32.mrb[196].mxu0  ;;  %v7316_v19 = vpop.f32.mrb[41].mxu1 }
 0x292   : > { %v7048_v43 = vpop.f32.mrb[197].mxu0  ;;  %v9486_v55 = vadd.f32 %v7316_v19, %v7315_v47  ;;  %v7318_v34 = vpop.f32.mrb[42].mxu1 }
 0x293   : > { %v7049_v20 = vadd.f32 %v7048_v43, %v7047_v16  ;;  %v7050_v60 = vpop.f32.mrb[198].mxu0  ;;  %v7319_v21 = vpop.f32.mrb[43].mxu1 }
 0x294   : > { %v7051_v32 = vpop.f32.mrb[199].mxu0  ;;  %v9493_v50 = vadd.f32 %v7319_v21, %v7318_v34 }
 0x295   : > { %v9483_v33 = vadd.f32 %v7049_v20, %v9344_v13  ;;  %v7052_v2 = vadd.f32 %v7051_v32, %v7050_v60  ;;  %v7904_v13 = vld [vmem:[%s10561_s1 + $0x2f0] ss:$84 sps:$4 sm:$0xff]  }
 0x296   : > { %7385 = vmatmul.mubr.msk.bf16.gmra.mrb[48].mxu0 %vm2744_vm1, %v7903_v30 }
 0x297   : > { %v9489_v46 = vadd.f32 %v7052_v2, %v9349_v1  ;;  %7388 = vmatprep.mubr.msk.bf16.mxu0 %vm8309_vm0, %v8308_v61 }
 0x298   : > { %v7321_v28 = vpop.f32.mrb[44].mxu1 }
 0x299   : > { %v7053_v42 = vpop.f32.mrb[200].mxu0  ;;  %v7322_v10 = vpop.f32.mrb[45].mxu1 }
 0x29a   : > { %v7054_v5 = vpop.f32.mrb[201].mxu0  ;;  %v9502_v57 = vadd.f32 %v7322_v10, %v7321_v28  ;;  %v7324_v56 = vpop.f32.mrb[46].mxu1 }
 0x29b   : > { %v7055_v12 = vadd.f32 %v7054_v5, %v7053_v42  ;;  %v7056_v31 = vpop.f32.mrb[202].mxu0  ;;  %v7325_v43 = vpop.f32.mrb[47].mxu1 }
 0x29c   : > { %v7057_v7 = vpop.f32.mrb[203].mxu0  ;;  %v9509_v30 = vadd.f32 %v7325_v43, %v7324_v56 }
 0x29d   : > { %v9499_v51 = vadd.f32 %v7055_v12, %v9360_v11  ;;  %v7058_v1 = vadd.f32 %v7057_v7, %v7056_v31  ;;  %v7905_v11 = vld [vmem:[%s10561_s1 + $0x398] ss:$84 sps:$4 sm:$0xff]  }
 0x29e   : > { %7389 = vmatmul.mubr.msk.bf16.gmra.mrb[52].mxu0 %vm2744_vm1, %v7904_v13 }
 0x29f   : > { %v9505_v16 = vadd.f32 %v7058_v1, %v9365_v0  ;;  %7392 = vmatprep.mubr.msk.bf16.mxu0 %vm8309_vm0, %v8308_v61 }
 0x2a0   : > { %v7327_v19 = vpop.f32.mrb[48].mxu1 }
 0x2a1   : > { %v7059_v20 = vpop.f32.mrb[204].mxu0  ;;  %v7328_v21 = vpop.f32.mrb[49].mxu1 }
 0x2a2   : > { %v7060_v60 = vpop.f32.mrb[205].mxu0  ;;  %v9518_v42 = vadd.f32 %v7328_v21, %v7327_v19  ;;  %v7330_v5 = vpop.f32.mrb[50].mxu1 }
 0x2a3   : > { %v7061_v32 = vadd.f32 %v7060_v60, %v7059_v20  ;;  %v7062_v47 = vpop.f32.mrb[206].mxu0  ;;  %v7331_v12 = vpop.f32.mrb[51].mxu1 }
 0x2a4   : > { %v7063_v2 = vpop.f32.mrb[207].mxu0  ;;  %v9525_v31 = vadd.f32 %v7331_v12, %v7330_v5 }
 0x2a5   : > { %v9515_v34 = vadd.f32 %v7061_v32, %v9376_v62  ;;  %v7064_v0 = vadd.f32 %v7063_v2, %v7062_v47  ;;  %v7906_v62 = vld [vmem:[%s10561_s1 + $0x440] ss:$84 sps:$4 sm:$0xff]  }
 0x2a6   : > { %7393 = vmatmul.mubr.msk.bf16.gmra.mrb[56].mxu0 %vm2744_vm1, %v7905_v11 }
 0x2a7   : > { %v9521_v13 = vadd.f32 %v7064_v0, %v9381_v53  ;;  %7396 = vmatprep.mubr.msk.bf16.mxu0 %vm8309_vm0, %v8308_v61 }
 0x2a8   : > { %v7333_v43 = vpop.f32.mrb[52].mxu1 }
 0x2a9   : > { %v7065_v7 = vpop.f32.mrb[208].mxu0  ;;  %v7334_v60 = vpop.f32.mrb[53].mxu1 }
 0x2aa   : > { %v7066_v28 = vpop.f32.mrb[209].mxu0  ;;  %v9534_v11 = vadd.f32 %v7334_v60, %v7333_v43  ;;  %v7336_v32 = vpop.f32.mrb[54].mxu1 }
 0x2ab   : > { %v7067_v1 = vadd.f32 %v7066_v28, %v7065_v7  ;;  %v7068_v10 = vpop.f32.mrb[210].mxu0  ;;  %v7337_v2 = vpop.f32.mrb[55].mxu1 }
 0x2ac   : > { %v7069_v56 = vpop.f32.mrb[211].mxu0  ;;  %v9541_v19 = vadd.f32 %v7337_v2, %v7336_v32 }
 0x2ad   : > { %v9531_v20 = vadd.f32 %v7067_v1, %v9392_v23  ;;  %v7070_v53 = vadd.f32 %v7069_v56, %v7068_v10  ;;  %v7907_v23 = vld [vmem:[%s10561_s1 + $0x4e8] ss:$84 sps:$4 sm:$0xff]  }
 0x2ae   : > { %7397 = vmatmul.mubr.msk.bf16.gmra.mrb[60].mxu0 %vm2744_vm1, %v7906_v62 }
 0x2af   : > { %v9537_v47 = vadd.f32 %v7070_v53, %v9397_v39  ;;  %7400 = vmatprep.mubr.msk.bf16.mxu0 %vm8309_vm0, %v8308_v61 }
 0x2b0   : > { %v7339_v28 = vpop.f32.mrb[56].mxu1 }
 0x2b1   : > { %v7071_v0 = vpop.f32.mrb[212].mxu0  ;;  %v7340_v1 = vpop.f32.mrb[57].mxu1 }
 0x2b2   : > { %v7072_v21 = vpop.f32.mrb[213].mxu0  ;;  %v9550_v10 = vadd.f32 %v7340_v1, %v7339_v28  ;;  %v7342_v56 = vpop.f32.mrb[58].mxu1 }
 0x2b3   : > { %v7073_v5 = vadd.f32 %v7072_v21, %v7071_v0  ;;  %v7074_v12 = vpop.f32.mrb[214].mxu0  ;;  %v7343_v53 = vpop.f32.mrb[59].mxu1 }
 0x2b4   : > { %v7075_v7 = vpop.f32.mrb[215].mxu0  ;;  %v9557_v60 = vadd.f32 %v7343_v53, %v7342_v56 }
 0x2b5   : > { %v9547_v62 = vadd.f32 %v7073_v5, %v9408_v3  ;;  %v7076_v39 = vadd.f32 %v7075_v7, %v7074_v12  ;;  %v7908_v3 = vld [vmem:[%s10561_s1 + $0x590] ss:$84 sps:$4 sm:$0xff]  }
 0x2b6   : > { %7401 = vmatmul.mubr.msk.bf16.gmra.mrb[64].mxu0 %vm2744_vm1, %v7907_v23 }
 0x2b7   : > { %v9553_v43 = vadd.f32 %v7076_v39, %v9413_v15  ;;  %7404 = vmatprep.mubr.msk.bf16.mxu0 %vm8309_vm0, %v8308_v61 }
 0x2b8   : > { %v7345_v5 = vpop.f32.mrb[60].mxu1 }
 0x2b9   : > { %v7093_v32 = vpop.f32.mrb[216].mxu0  ;;  %v7346_v7 = vpop.f32.mrb[61].mxu1 }
 0x2ba   : > { %v7094_v2 = vpop.f32.mrb[217].mxu0  ;;  %v9564_v61 = vadd.f32 %v7346_v7, %v7345_v5  ;;  %v7348_v28 = vpop.f32.mrb[62].mxu1 }
 0x2bb   : > { %v7095_v0 = vadd.f32 %v7094_v2, %v7093_v32  ;;  %v7096_v21 = vpop.f32.mrb[218].mxu0  ;;  %v7349_v56 = vpop.f32.mrb[63].mxu1 }
 0x2bc   : > { %v7097_v23 = vpop.f32.mrb[219].mxu0  ;;  %10569 = vst [vmem:[#allocation3_spill] sm:$0xff] %v9564_v61  ;;  %v9570_v53 = vadd.f32 %v7349_v56, %v7348_v28 }
 0x2bd   : > { %v3437_v12 = vadd.f32 %v7095_v0, %v9422_v54  ;;  %v7098_v15 = vadd.f32 %v7097_v23, %v7096_v21 }
 0x2be   : > { %7405 = vmatmul.mubr.msk.bf16.gmra.mrb[68].mxu0 %vm2744_vm1, %v7908_v3 }
 0x2bf   : > { %v3440_v39 = vadd.f32 %v7098_v15, %v9427_v25  ;;  %v9568_v1 = vadd.f32 %v9306_v26, %v3437_v12 }
 0x2c0   : > { %v7351_v3 = vpop.f32.mrb[64].mxu1 }
 0x2c1   : > { %v9573_v32 = vadd.f32 %v9313_v41, %v3440_v39  ;;  %v7099_v2 = vpop.f32.mrb[220].mxu0  ;;  %v7352_v61 = vpop.f32.mrb[65].mxu1 }
 0x2c2   : > { %v7100_v54 = vpop.f32.mrb[221].mxu0  ;;  %v9576_v25 = vadd.f32 %v7352_v61, %v7351_v3  ;;  %v7354_v26 = vpop.f32.mrb[66].mxu1 }
 0x2c3   : > { %v7101_v0 = vadd.f32 %v7100_v54, %v7099_v2  ;;  %v7102_v21 = vpop.f32.mrb[222].mxu0  ;;  %v7355_v41 = vpop.f32.mrb[67].mxu1 }
 0x2c4   : > { %v7103_v23 = vpop.f32.mrb[223].mxu0  ;;  %v9582_v28 = vadd.f32 %v7355_v41, %v7354_v26 }
 0x2c5   : > { %v3445_v5 = vadd.f32 %v7101_v0, %v9439_v27  ;;  %v7104_v7 = vadd.f32 %v7103_v23, %v7102_v21 }
 0x2c7   : > { %v3448_v12 = vadd.f32 %v7104_v7, %v9445_v58  ;;  %v9580_v15 = vadd.f32 %v9326_v35, %v3445_v5 }
 0x2c9   : > { %v9585_v39 = vadd.f32 %v9333_v44, %v3448_v12  ;;  %v7105_v56 = vpop.f32.mrb[224].mxu0 }
 0x2ca   : > { %v7106_v2 = vpop.f32.mrb[225].mxu0 }
 0x2cb   : > { %v7107_v54 = vadd.f32 %v7106_v2, %v7105_v56  ;;  %v7108_v27 = vpop.f32.mrb[226].mxu0  ;;  %v8310_v2 = vmov 0  }
 0x2cc   : > { %v7109_v0 = vpop.f32.mrb[227].mxu0  ;;  %3981 = vmatprep.subr.bf16.mxu1 %v8310_v2  ;;  %7466 = vset.pattern.permute.xlu0 %v8310_v2 }
 0x2cd   : > { %v3453_v61 = vadd.f32 %v7107_v54, %v9455_v38  ;;  %v7110_v21 = vadd.f32 %v7109_v0, %v7108_v27  ;;  %7467 = vset.pattern.permute.xlu1 %v8310_v2 }
 0x2cf   : > { %v3456_v23 = vadd.f32 %v7110_v21, %v9459_v52  ;;  %v9590_v58 = vadd.f32 %v9346_v14, %v3453_v61 }
 0x2d1   : > { %v9593_v35 = vadd.f32 %v9351_v49, %v3456_v23  ;;  %v7111_v3 = vpop.f32.mrb[228].mxu0 }
 0x2d2   : > { %v7112_v5 = vpop.f32.mrb[229].mxu0 }
 0x2d3   : > { %v7113_v44 = vadd.f32 %v7112_v5, %v7111_v3  ;;  %v7114_v7 = vpop.f32.mrb[230].mxu0 }
 0x2d4   : > { %v7115_v26 = vpop.f32.mrb[231].mxu0 }
 0x2d5   : > { %v3461_v12 = vadd.f32 %v7113_v44, %v9467_v8  ;;  %v7116_v41 = vadd.f32 %v7115_v26, %v7114_v7 }
 0x2d7   : > { %v3464_v56 = vadd.f32 %v7116_v41, %v9473_v18  ;;  %v9598_v38 = vadd.f32 %v9362_v40, %v3461_v12 }
 0x2d9   : > { %v9601_v52 = vadd.f32 %v9367_v37, %v3464_v56  ;;  %v7117_v14 = vpop.f32.mrb[232].mxu0 }
 0x2da   : > { %v7118_v49 = vpop.f32.mrb[233].mxu0 }
 0x2db   : > { %v7119_v54 = vadd.f32 %v7118_v49, %v7117_v14  ;;  %v7120_v8 = vpop.f32.mrb[234].mxu0 }
 0x2dc   : > { %v7121_v27 = vpop.f32.mrb[235].mxu0 }
 0x2dd   : > { %v3469_v18 = vadd.f32 %v7119_v54, %v9483_v33  ;;  %v7122_v0 = vadd.f32 %v7121_v27, %v7120_v8 }
 0x2df   : > { %v3472_v40 = vadd.f32 %v7122_v0, %v9489_v46  ;;  %v9609_v37 = vadd.f32 %v9378_v36, %v3469_v18 }
 0x2e1   : > { %v9612_v61 = vadd.f32 %v9383_v45, %v3472_v40  ;;  %v7123_v21 = vpop.f32.mrb[236].mxu0 }
 0x2e2   : > { %v7124_v23 = vpop.f32.mrb[237].mxu0 }
 0x2e3   : > { %v7125_v3 = vadd.f32 %v7124_v23, %v7123_v21  ;;  %v7126_v5 = vpop.f32.mrb[238].mxu0 }
 0x2e4   : > { %v7127_v44 = vpop.f32.mrb[239].mxu0 }
 0x2e5   : > { %v3477_v7 = vadd.f32 %v7125_v3, %v9499_v51  ;;  %v7128_v26 = vadd.f32 %v7127_v44, %v7126_v5 }
 0x2e7   : > { %v3480_v12 = vadd.f32 %v7128_v26, %v9505_v16  ;;  %v9617_v33 = vadd.f32 %v9394_v4, %v3477_v7 }
 0x2e9   : > { %v9620_v46 = vadd.f32 %v9399_v63, %v3480_v12  ;;  %v7129_v36 = vpop.f32.mrb[240].mxu0 }
 0x2ea   : > { %v7130_v41 = vpop.f32.mrb[241].mxu0 }
 0x2eb   : > { %v7131_v45 = vadd.f32 %v7130_v41, %v7129_v36  ;;  %v7132_v56 = vpop.f32.mrb[242].mxu0 }
 0x2ec   : > { %v7133_v14 = vpop.f32.mrb[243].mxu0 }
 0x2ed   : > { %v3485_v49 = vadd.f32 %v7131_v45, %v9515_v34  ;;  %v7134_v54 = vadd.f32 %v7133_v14, %v7132_v56 }
 0x2ef   : > { %v3488_v8 = vadd.f32 %v7134_v54, %v9521_v13  ;;  %v9625_v51 = vadd.f32 %v9410_v17, %v3485_v49 }
 0x2f1   : > { %v9628_v16 = vadd.f32 %v9415_v6, %v3488_v8  ;;  %v7135_v4 = vpop.f32.mrb[244].mxu0 }
 0x2f2   : > { %v7136_v27 = vpop.f32.mrb[245].mxu0 }
 0x2f3   : > { %v7137_v63 = vadd.f32 %v7136_v27, %v7135_v4  ;;  %v7138_v18 = vpop.f32.mrb[246].mxu0 }
 0x2f4   : > { %v7139_v0 = vpop.f32.mrb[247].mxu0 }
 0x2f5   : > { %v3493_v40 = vadd.f32 %v7137_v63, %v9531_v20  ;;  %v7140_v21 = vadd.f32 %v7139_v0, %v7138_v18 }
 0x2f7   : > { %v3496_v23 = vadd.f32 %v7140_v21, %v9537_v47  ;;  %v9633_v34 = vadd.f32 %v9424_v9, %v3493_v40 }
 0x2f9   : > { %v9636_v13 = vadd.f32 %v9433_v29, %v3496_v23  ;;  %v7141_v17 = vpop.f32.mrb[248].mxu0 }
 0x2fa   : > { %v7142_v3 = vpop.f32.mrb[249].mxu0 }
 0x2fb   : > { %v7143_v6 = vadd.f32 %v7142_v3, %v7141_v17  ;;  %v7144_v5 = vpop.f32.mrb[250].mxu0 }
 0x2fc   : > { %v7145_v44 = vpop.f32.mrb[251].mxu0 }
 0x2fd   : > { %v3501_v7 = vadd.f32 %v7143_v6, %v9547_v62  ;;  %v7146_v26 = vadd.f32 %v7145_v44, %v7144_v5 }
 0x2ff   : > { %v3504_v12 = vadd.f32 %v7146_v26, %v9553_v43  ;;  %v9641_v20 = vadd.f32 %v9442_v48, %v3501_v7 }
 0x301   : > { %v9644_v47 = vadd.f32 %v9449_v24, %v3504_v12  ;;  %v7233_v9 = vpop.f32.mrb[252].mxu0  ;;  %v3957_v12 = vld [vmem:[%s10563_s3 + $0x8] sm:$0xff] }
 0x302   : > { %v7234_v36 = vpop.f32.mrb[253].mxu0 }
 0x303   : > { %v7235_v29 = vadd.f32 %v7234_v36, %v7233_v9  ;;  %v7236_v41 = vpop.f32.mrb[254].mxu0 }
 0x304   : > { %v7237_v45 = vpop.f32.mrb[255].mxu0 }
 0x305   : > { %v9647_v56 = vadd.f32 %v7235_v29, %v9568_v1  ;;  %v7238_v14 = vadd.f32 %v7237_v45, %v7236_v41 }
 0x307   : > { %v9650_v62 = vadd.f32 %v7238_v14, %v9573_v32 }
 0x309   : > { %v7239_v49 = vpop.f32.mrb[0].mxu0 }
 0x30a   : > { %v7240_v43 = vpop.f32.mrb[1].mxu0 }
 0x30b   : > { %v7241_v54 = vadd.f32 %v7240_v43, %v7239_v49  ;;  %v7242_v48 = vpop.f32.mrb[2].mxu0 }
 0x30c   : > { %v7243_v8 = vpop.f32.mrb[3].mxu0 }
 0x30d   : > { %v3655_v24 = vadd.f32 %v7241_v54, %v9580_v15  ;;  %v7244_v4 = vadd.f32 %v7243_v8, %v7242_v48 }
 0x30f   : > { %v3658_v27 = vadd.f32 %v7244_v4, %v9585_v39  ;;  %v9655_v63 = vadd.f32 %v9470_v22, %v3655_v24 }
 0x311   : > { %v7245_v18 = vpop.f32.mrb[4].mxu0  ;;  %v9658_v1 = vadd.f32 %v9477_v59, %v3658_v27  ;;  %v7911_v59 = vld [vmem:[%s10562_s2 + $0x4] ss:$8 sps:$4 sm:$0xff]  }
 0x312   : > { %v7246_v0 = vpop.f32.mrb[5].mxu0  ;;  %6397 = vmatprep.mubr.msk.bf16.mxu1 %vm3977_vm2, %v7911_v59 }
 0x313   : > { %v7247_v32 = vadd.f32 %v7246_v0, %v7245_v18  ;;  %v7248_v40 = vpop.f32.mrb[6].mxu0 }
 0x314   : > { %v7249_v21 = vpop.f32.mrb[7].mxu0 }
 0x315   : > { %v3663_v23 = vadd.f32 %v7247_v32, %v9590_v58  ;;  %v7250_v17 = vadd.f32 %v7249_v21, %v7248_v40 }
 0x317   : > { %v3666_v3 = vadd.f32 %v7250_v17, %v9593_v35  ;;  %v9663_v15 = vadd.f32 %v9486_v55, %v3663_v23  ;;  %v3956_v55 = vld [vmem:[%s10563_s3] sm:$0xff] }
 0x318   : > { %3960 = vperm.xlu0 %7466, %v3956_v55  }
 0x319   : > { %v7251_v39 = vpop.f32.mrb[8].mxu0  ;;  %v9666_v22 = vadd.f32 %v9493_v50, %v3666_v3 }
 0x31a   : > { %v7252_v6 = vpop.f32.mrb[9].mxu0 }
 0x31b   : > { %v7253_v5 = vadd.f32 %v7252_v6, %v7251_v39  ;;  %v7254_v44 = vpop.f32.mrb[10].mxu0 }
 0x31c   : > { %v7255_v7 = vpop.f32.mrb[11].mxu0  ;;  %3965 = vperm.xlu0 %7466, %v3957_v12  }
 0x31d   : > { %v3671_v58 = vadd.f32 %v7253_v5, %v9598_v38  ;;  %v7256_v35 = vadd.f32 %v7255_v7, %v7254_v44 }
 0x31f   : > { %v3674_v50 = vadd.f32 %v7256_v35, %v9601_v52  ;;  %v9677_v26 = vadd.f32 %v9502_v57, %v3671_v58 }
 0x321   : > { %v7257_v9 = vpop.f32.mrb[12].mxu0  ;;  %v9683_v36 = vadd.f32 %v9509_v30, %v3674_v50 }
 0x322   : > { %v7258_v38 = vpop.f32.mrb[13].mxu0 }
 0x323   : > { %v7259_v29 = vadd.f32 %v7258_v38, %v7257_v9  ;;  %v7260_v41 = vpop.f32.mrb[14].mxu0 }
 0x324   : > { %v7261_v45 = vpop.f32.mrb[15].mxu0 }
 0x325   : > { %v3679_v14 = vadd.f32 %v7259_v29, %v9609_v37  ;;  %v7262_v49 = vadd.f32 %v7261_v45, %v7260_v41 }
 0x327   : > { %v3682_v52 = vadd.f32 %v7262_v49, %v9612_v61  ;;  %v9688_v57 = vadd.f32 %v9518_v42, %v3679_v14 }
 0x329   : > { %v7263_v43 = vpop.f32.mrb[16].mxu0  ;;  %v9691_v54 = vadd.f32 %v9525_v31, %v3682_v52 }
 0x32a   : > { %v7264_v48 = vpop.f32.mrb[17].mxu0 }
 0x32b   : > { %v7265_v30 = vadd.f32 %v7264_v48, %v7263_v43  ;;  %v7266_v8 = vpop.f32.mrb[18].mxu0 }
 0x32c   : > { %v7267_v24 = vpop.f32.mrb[19].mxu0 }
 0x32d   : > { %v3687_v4 = vadd.f32 %v7265_v30, %v9617_v33  ;;  %v7268_v27 = vadd.f32 %v7267_v24, %v7266_v8 }
 0x32f   : > { %v3690_v18 = vadd.f32 %v7268_v27, %v9620_v46  ;;  %v9696_v37 = vadd.f32 %v9534_v11, %v3687_v4 }
 0x331   : > { %v7269_v61 = vpop.f32.mrb[20].mxu0  ;;  %v9699_v42 = vadd.f32 %v9541_v19, %v3690_v18 }
 0x332   : > { %v7270_v0 = vpop.f32.mrb[21].mxu0 }
 0x333   : > { %v7271_v32 = vadd.f32 %v7270_v0, %v7269_v61  ;;  %v7272_v31 = vpop.f32.mrb[22].mxu0 }
 0x334   : > { %v7273_v40 = vpop.f32.mrb[23].mxu0 }
 0x335   : > { %v3695_v21 = vadd.f32 %v7271_v32, %v9625_v51  ;;  %v7274_v23 = vadd.f32 %v7273_v40, %v7272_v31  ;;  %v10570_v51 = vld [vmem:[#allocation3_spill] sm:$0xff] }
 0x337   : > { %v3698_v17 = vadd.f32 %v7274_v23, %v9628_v16  ;;  %v9704_v33 = vadd.f32 %v9550_v10, %v3695_v21 }
 0x339   : > { %v7275_v46 = vpop.f32.mrb[24].mxu0  ;;  %v9707_v11 = vadd.f32 %v9557_v60, %v3698_v17 }
 0x33a   : > { %v7276_v3 = vpop.f32.mrb[25].mxu0 }
 0x33b   : > { %v7277_v39 = vadd.f32 %v7276_v3, %v7275_v46  ;;  %v7278_v19 = vpop.f32.mrb[26].mxu0 }
 0x33c   : > { %v7279_v6 = vpop.f32.mrb[27].mxu0 }
 0x33d   : > { %v3703_v59 = vadd.f32 %v7277_v39, %v9633_v34  ;;  %v7280_v5 = vadd.f32 %v7279_v6, %v7278_v19 }
 0x33f   : > { %v3706_v44 = vadd.f32 %v7280_v5, %v9636_v13  ;;  %v9712_v7 = vadd.f32 %v10570_v51, %v3703_v59 }
 0x341   : > { %v7281_v16 = vpop.f32.mrb[28].mxu0  ;;  %v9715_v10 = vadd.f32 %v9570_v53, %v3706_v44 }
 0x342   : > { %v7282_v58 = vpop.f32.mrb[29].mxu0 }
 0x343   : > { %v7283_v35 = vadd.f32 %v7282_v58, %v7281_v16  ;;  %v7284_v60 = vpop.f32.mrb[30].mxu0 }
 0x344   : > { %v7285_v55 = vpop.f32.mrb[31].mxu0 }
 0x345   : > { %v3711_v50 = vadd.f32 %v7283_v35, %v9641_v20  ;;  %v7286_v12 = vadd.f32 %v7285_v55, %v7284_v60 }
 0x347   : > { %v3714_v9 = vadd.f32 %v7286_v12, %v9644_v47  ;;  %v9720_v34 = vadd.f32 %v9576_v25, %v3711_v50 }
 0x349   : > { %v7303_v13 = vpop.f32.mrb[32].mxu0  ;;  %v9723_v38 = vadd.f32 %v9582_v28, %v3714_v9 }
 0x34a   : > { %v7304_v29 = vpop.f32.mrb[33].mxu0 }
 0x34b   : > { %v7305_v41 = vadd.f32 %v7304_v29, %v7303_v13  ;;  %v7306_v53 = vpop.f32.mrb[34].mxu0 }
 0x34c   : > { %v7307_v45 = vpop.f32.mrb[35].mxu0 }
 0x34d   : > { %v7308_v14 = vadd.f32 %v7307_v45, %v7306_v53  ;;  %v3752_v49 = vadd.f32 %v7305_v41, %v9647_v56 }
 0x34f   : > { %v3755_v52 = vadd.f32 %v7308_v14, %v9650_v62 }
 0x351   : > { %v3856_v20 = vpop.f32.mrb[36].mxu0 }
 0x352   : > { %v3857_v43 = vadd.f32 %v3856_v20, %v3752_v49  ;;  %v7374_v48 = vpop.f32.mrb[37].mxu0 }
 0x353   : > { %v3859_v47 = vpop.f32.mrb[38].mxu0 }
 0x354   : > { %v3860_v30 = vadd.f32 %v3859_v47, %v3755_v52  ;;  %v7375_v25 = vpop.f32.mrb[39].mxu0  ;;  %v3927_v8 = vmax.f32 %v3857_v43, 0.0 }
 0x356   : > { %v3928_v24 = vmax.f32 %v3860_v30, 0.0 }
 0x358   : > { %v3945_v4 = vpack.c.bf16 %v3928_v24, %v3927_v8 }
 0x359   : > { %v3864_v28 = vpop.f32.mrb[40].mxu0 }
 0x35a   : > { %v3865_v27 = vadd.f32 %v3864_v28, %v9655_v63  ;;  %v7378_v18 = vpop.f32.mrb[41].mxu0  ;;  %3982 = vmatpush1.bf16.msra.mxu1 %v3945_v4 }
 0x35b   : > { %v3867_v61 = vpop.f32.mrb[42].mxu0  ;;  %3983 = vmatprep.subr.bf16.mxu1 %v8310_v2 }
 0x35c   : > { %v3868_v56 = vadd.f32 %v3867_v61, %v9658_v1  ;;  %v7379_v62 = vpop.f32.mrb[43].mxu0  ;;  %v3929_v0 = vmax.f32 %v3865_v27, 0.0 }
 0x35e   : > { %v3930_v32 = vmax.f32 %v3868_v56, 0.0 }
 0x360   : > { %v3946_v31 = vpack.c.bf16 %v3930_v32, %v3929_v0 }
 0x361   : > { %v3872_v40 = vpop.f32.mrb[44].mxu0 }
 0x362   : > { %v3873_v21 = vadd.f32 %v3872_v40, %v9663_v15  ;;  %v7382_v23 = vpop.f32.mrb[45].mxu0  ;;  %3984 = vmatpush1.bf16.msra.mxu1 %v3946_v31 }
 0x363   : > { %v3875_v17 = vpop.f32.mrb[46].mxu0  ;;  %3985 = vmatprep.subr.bf16.mxu1 %v8310_v2 }
 0x364   : > { %v3876_v63 = vadd.f32 %v3875_v17, %v9666_v22  ;;  %v7383_v46 = vpop.f32.mrb[47].mxu0  ;;  %v3931_v3 = vmax.f32 %v3873_v21, 0.0  ;;  %v7909_v17 = vld [vmem:[%s10562_s2] ss:$8 sps:$4 sm:$0xff]  }
 0x365   : > { %v7918_v46 = vld [vmem:[%s10564_s4 + $0x20] ss:$8 sps:$4 sm:$0xff]  }
 0x366   : > { %v3932_v39 = vmax.f32 %v3876_v63, 0.0  ;;  %v7920_v63 = vld [vmem:[%s10564_s4 + $0x24] ss:$8 sps:$4 sm:$0xff]  }
 0x368   : > { %v3947_v19 = vpack.c.bf16 %v3932_v39, %v3931_v3  ;;  %v7923_v3 = vld [vmem:[%s10564_s4 + $0x34] ss:$8 sps:$4 sm:$0xff]   ;;  %v7921_v39 = vld [vmem:[%s10564_s4 + $0x30] ss:$8 sps:$4 sm:$0xff]  }
 0x369   : > { %v3880_v6 = vpop.f32.mrb[48].mxu0 }
 0x36a   : > { %v3881_v1 = vadd.f32 %v3880_v6, %v9677_v26  ;;  %v7386_v59 = vpop.f32.mrb[49].mxu0  ;;  %3986 = vmatpush1.bf16.msra.mxu1 %v3947_v19  ;;  %v7926_v19 = vld [vmem:[%s10564_s4 + $0x44] ss:$8 sps:$4 sm:$0xff]   ;;  %v7924_v6 = vld [vmem:[%s10564_s4 + $0x40] ss:$8 sps:$4 sm:$0xff]  }
 0x36b   : > { %v3883_v5 = vpop.f32.mrb[50].mxu0  ;;  %3987 = vmatprep.subr.bf16.mxu1 %v8310_v2  ;;  %v7927_v59 = vld [vmem:[%s10564_s4 + $0x50] ss:$8 sps:$4 sm:$0xff]  }
 0x36c   : > { %v3884_v15 = vadd.f32 %v3883_v5, %v9683_v36  ;;  %v7387_v44 = vpop.f32.mrb[51].mxu0  ;;  %v3933_v51 = vmax.f32 %v3881_v1, 0.0  ;;  %v7929_v1 = vld [vmem:[%s10564_s4 + $0x54] ss:$8 sps:$4 sm:$0xff]   ;;  %v7932_v5 = vld [vmem:[%s10564_s4 + $0x64] ss:$8 sps:$4 sm:$0xff]  }
 0x36d   : > { %v7935_v44 = vld [vmem:[%s10564_s4 + $0x74] ss:$8 sps:$4 sm:$0xff]  }
 0x36e   : > { %v3934_v16 = vmax.f32 %v3884_v15, 0.0  ;;  %v7930_v15 = vld [vmem:[%s10564_s4 + $0x60] ss:$8 sps:$4 sm:$0xff]  }
 0x370   : > { %v3948_v58 = vpack.c.bf16 %v3934_v16, %v3933_v51  ;;  %v7933_v51 = vld [vmem:[%s10564_s4 + $0x70] ss:$8 sps:$4 sm:$0xff]   ;;  %v7938_v16 = vld [vmem:[%s10564_s4 + $0x84] ss:$8 sps:$4 sm:$0xff]  }
 0x371   : > { %v3888_v35 = vpop.f32.mrb[52].mxu0 }
 0x372   : > { %v3889_v22 = vadd.f32 %v3888_v35, %v9688_v57  ;;  %v7390_v60 = vpop.f32.mrb[53].mxu0  ;;  %3988 = vmatpush1.bf16.msra.mxu1 %v3948_v58  ;;  %v7936_v58 = vld [vmem:[%s10564_s4 + $0x80] ss:$8 sps:$4 sm:$0xff]   ;;  %v7941_v35 = vld [vmem:[%s10564_s4 + $0x94] ss:$8 sps:$4 sm:$0xff]  }
 0x373   : > { %v3891_v55 = vpop.f32.mrb[54].mxu0  ;;  %3989 = vmatprep.subr.bf16.mxu1 %v8310_v2  ;;  %v7944_v60 = vld [vmem:[%s10564_s4 + $0xa4] ss:$8 sps:$4 sm:$0xff]  }
 0x374   : > { %v3892_v26 = vadd.f32 %v3891_v55, %v9691_v54  ;;  %v7391_v50 = vpop.f32.mrb[55].mxu0  ;;  %v3935_v12 = vmax.f32 %v3889_v22, 0.0  ;;  %v7939_v22 = vld [vmem:[%s10564_s4 + $0x90] ss:$8 sps:$4 sm:$0xff]   ;;  %v7942_v55 = vld [vmem:[%s10564_s4 + $0xa0] ss:$8 sps:$4 sm:$0xff]  }
 0x375   : > { %v7945_v50 = vld [vmem:[%s10564_s4 + $0xb0] ss:$8 sps:$4 sm:$0xff]  }
 0x376   : > { %v3936_v9 = vmax.f32 %v3892_v26, 0.0  ;;  %v7947_v26 = vld [vmem:[%s10564_s4 + $0xb4] ss:$8 sps:$4 sm:$0xff]  }
 0x378   : > { %v3949_v13 = vpack.c.bf16 %v3936_v9, %v3935_v12  ;;  %v7950_v12 = vld [vmem:[%s10564_s4 + $0xc4] ss:$8 sps:$4 sm:$0xff]   ;;  %v7948_v9 = vld [vmem:[%s10564_s4 + $0xc0] ss:$8 sps:$4 sm:$0xff]  }
 0x379   : > { %v3896_v29 = vpop.f32.mrb[56].mxu0 }
 0x37a   : > { %v3897_v36 = vadd.f32 %v3896_v29, %v9696_v37  ;;  %v7394_v41 = vpop.f32.mrb[57].mxu0  ;;  %3990 = vmatpush1.bf16.msra.mxu1 %v3949_v13  ;;  %v7953_v13 = vld [vmem:[%s10564_s4 + $0xd4] ss:$8 sps:$4 sm:$0xff]   ;;  %v7951_v29 = vld [vmem:[%s10564_s4 + $0xd0] ss:$8 sps:$4 sm:$0xff]  }
 0x37b   : > { %v3899_v53 = vpop.f32.mrb[58].mxu0  ;;  %3991 = vmatprep.subr.bf16.mxu1 %v8310_v2  ;;  %v7954_v41 = vld [vmem:[%s10564_s4 + $0xe0] ss:$8 sps:$4 sm:$0xff]  }
 0x37c   : > { %v3900_v57 = vadd.f32 %v3899_v53, %v9699_v42  ;;  %v7395_v45 = vpop.f32.mrb[59].mxu0  ;;  %v3937_v14 = vmax.f32 %v3897_v36, 0.0  ;;  %v7956_v36 = vld [vmem:[%s10564_s4 + $0xe4] ss:$8 sps:$4 sm:$0xff]   ;;  %v7959_v53 = vld [vmem:[%s10564_s4 + $0xf4] ss:$8 sps:$4 sm:$0xff]  }
 0x37d   : > { %v7962_v45 = vld [vmem:[%s10564_s4 + $0x104] ss:$8 sps:$4 sm:$0xff]  }
 0x37e   : > { %v3938_v49 = vmax.f32 %v3900_v57, 0.0  ;;  %v7957_v57 = vld [vmem:[%s10564_s4 + $0xf0] ss:$8 sps:$4 sm:$0xff]  }
 0x380   : > { %v3950_v52 = vpack.c.bf16 %v3938_v49, %v3937_v14 }
 0x381   : > { %v3904_v20 = vpop.f32.mrb[60].mxu0 }
 0x382   : > { %v3905_v54 = vadd.f32 %v3904_v20, %v9704_v33  ;;  %v7398_v43 = vpop.f32.mrb[61].mxu0  ;;  %3992 = vmatpush1.bf16.msra.mxu1 %v3950_v52 }
 0x383   : > { %v3907_v48 = vpop.f32.mrb[62].mxu0  ;;  %3993 = vmatprep.subr.bf16.mxu1 %v8310_v2 }
 0x384   : > { %v3908_v37 = vadd.f32 %v3907_v48, %v9707_v11  ;;  %v7399_v47 = vpop.f32.mrb[63].mxu0  ;;  %v3939_v30 = vmax.f32 %v3905_v54, 0.0 }
 0x386   : > { %v3940_v25 = vmax.f32 %v3908_v37, 0.0 }
 0x388   : > { %v3951_v8 = vpack.c.bf16 %v3940_v25, %v3939_v30  ;;  %v7960_v25 = vld [vmem:[%s10564_s4 + $0x100] ss:$8 sps:$4 sm:$0xff]  }
 0x389   : > { %v3912_v24 = vpop.f32.mrb[64].mxu0 }
 0x38a   : > { %v3913_v42 = vadd.f32 %v3912_v24, %v9712_v7  ;;  %v7402_v4 = vpop.f32.mrb[65].mxu0  ;;  %3994 = vmatpush1.bf16.msra.mxu1 %v3951_v8  ;;  %v7965_v24 = vld [vmem:[%s10564_s4 + $0x114] ss:$8 sps:$4 sm:$0xff]  }
 0x38b   : > { %v3915_v28 = vpop.f32.mrb[66].mxu0  ;;  %3995 = vmatprep.subr.bf16.mxu1 %v8310_v2  ;;  %v7963_v4 = vld [vmem:[%s10564_s4 + $0x110] ss:$8 sps:$4 sm:$0xff]  }
 0x38c   : > { %v3916_v33 = vadd.f32 %v3915_v28, %v9715_v10  ;;  %v7403_v27 = vpop.f32.mrb[67].mxu0  ;;  %v3941_v18 = vmax.f32 %v3913_v42, 0.0  ;;  %v7914_v10 = vld [vmem:[%s10564_s4 + $0x4] ss:$8 sps:$4 sm:$0xff]  }
 0x38d   : > { %v7968_v28 = vld [vmem:[%s10564_s4 + $0x124] ss:$8 sps:$4 sm:$0xff]   ;;  %v7971_v27 = vld [vmem:[%s10564_s4 + $0x134] ss:$8 sps:$4 sm:$0xff]  }
 0x38e   : > { %v3942_v61 = vmax.f32 %v3916_v33, 0.0  ;;  %v7966_v33 = vld [vmem:[%s10564_s4 + $0x120] ss:$8 sps:$4 sm:$0xff]  }
 0x390   : > { %v3952_v56 = vpack.c.bf16 %v3942_v61, %v3941_v18  ;;  %v7969_v18 = vld [vmem:[%s10564_s4 + $0x130] ss:$8 sps:$4 sm:$0xff]   ;;  %v7974_v61 = vld [vmem:[%s10564_s4 + $0x144] ss:$8 sps:$4 sm:$0xff]  }
 0x391   : > { %v3920_v62 = vpop.f32.mrb[68].mxu0 }
 0x392   : > { %v3921_v11 = vadd.f32 %v3920_v62, %v9720_v34  ;;  %v7406_v0 = vpop.f32.mrb[69].mxu0  ;;  %3996 = vmatpush1.bf16.msra.mxu1 %v3952_v56  ;;  %v7912_v34 = vld [vmem:[%s10564_s4] ss:$8 sps:$4 sm:$0xff]   ;;  %v7977_v62 = vld [vmem:[%s10564_s4 + $0x154] ss:$8 sps:$4 sm:$0xff]  }
 0x393   : > { %v3923_v32 = vpop.f32.mrb[70].mxu0  ;;  %3997 = vmatprep.subr.bf16.mxu1 %v8310_v2  ;;  %v7917_v2 = vld [vmem:[%s10564_s4 + $0x14] ss:$8 sps:$4 sm:$0xff]   ;;  %v7972_v56 = vld [vmem:[%s10564_s4 + $0x140] ss:$8 sps:$4 sm:$0xff]  }
 0x394   : > { %v3924_v7 = vadd.f32 %v3923_v32, %v9723_v38  ;;  %v7407_v31 = vpop.f32.mrb[71].mxu0  ;;  %v3943_v40 = vmax.f32 %v3921_v11, 0.0  ;;  %v7915_v38 = vld [vmem:[%s10564_s4 + $0x10] ss:$8 sps:$4 sm:$0xff]   ;;  %v7980_v0 = vld [vmem:[%s10564_s4 + $0x164] ss:$8 sps:$4 sm:$0xff]  }
 0x395   : > { %v7975_v11 = vld [vmem:[%s10564_s4 + $0x150] ss:$8 sps:$4 sm:$0xff]   ;;  %v7978_v32 = vld [vmem:[%s10564_s4 + $0x160] ss:$8 sps:$4 sm:$0xff]  }
 0x396   : > { %v3944_v21 = vmax.f32 %v3924_v7, 0.0  ;;  %v7983_v7 = vld [vmem:[%s10564_s4 + $0x174] ss:$8 sps:$4 sm:$0xff]   ;;  %v7981_v31 = vld [vmem:[%s10564_s4 + $0x170] ss:$8 sps:$4 sm:$0xff]  }
 0x397   : > { %v3961_v14 = vpop.permute.xlu0 %3960 }
 0x398   : > { %v3953_v23 = vpack.c.bf16 %v3944_v21, %v3943_v40  ;;  %v7986_v40 = vld [vmem:[%s10564_s4 + $0x184] ss:$8 sps:$4 sm:$0xff]   ;;  %v7984_v21 = vld [vmem:[%s10564_s4 + $0x180] ss:$8 sps:$4 sm:$0xff]  }
 0x39a   : > { %3998 = vmatpush1.bf16.msra.mxu1 %v3953_v23  ;;  %v7987_v23 = vld [vmem:[%s10564_s4 + $0x190] ss:$8 sps:$4 sm:$0xff]  }
 0x39b   : > { %5618 = vmatprep.subr.bf16.mxu1 %v7914_v10  ;;  %v7989_v10 = vld [vmem:[%s10564_s4 + $0x194] ss:$8 sps:$4 sm:$0xff]  }
 0x39d   : > { %4014 = vmatmul.mubr.bf16.vlgmr.msra.gmra.mrb[68].mxu1 %v7909_v17  ;;  %v7992_v17 = vld [vmem:[%s10564_s4 + $0x1a4] ss:$8 sps:$4 sm:$0xff]  }
 0x39e   : > { %5619 = vmatpush1.bf16.msra.mxu1 %v7912_v34  ;;  %v7990_v34 = vld [vmem:[%s10564_s4 + $0x1a0] ss:$8 sps:$4 sm:$0xff]  }
 0x39f   : > { %5620 = vmatprep.subr.bf16.mxu1 %v7917_v2  ;;  %v7995_v2 = vld [vmem:[%s10564_s4 + $0x1b4] ss:$8 sps:$4 sm:$0xff]  }
 0x3a2   : > { %5621 = vmatpush1.bf16.msra.mxu1 %v7915_v38  ;;  %v7993_v38 = vld [vmem:[%s10564_s4 + $0x1b0] ss:$8 sps:$4 sm:$0xff]  }
 0x3a3   : > { %5622 = vmatprep.subr.bf16.mxu1 %v7920_v63  ;;  %v7998_v63 = vld [vmem:[%s10564_s4 + $0x1c4] ss:$8 sps:$4 sm:$0xff]  }
 0x3a6   : > { %5623 = vmatpush1.bf16.msra.mxu1 %v7918_v46  ;;  %v7996_v46 = vld [vmem:[%s10564_s4 + $0x1c0] ss:$8 sps:$4 sm:$0xff]  }
 0x3a7   : > { %5624 = vmatprep.subr.bf16.mxu1 %v7923_v3  ;;  %v8001_v3 = vld [vmem:[%s10564_s4 + $0x1d4] ss:$8 sps:$4 sm:$0xff]  }
 0x3aa   : > { %5625 = vmatpush1.bf16.msra.mxu1 %v7921_v39  ;;  %v7999_v39 = vld [vmem:[%s10564_s4 + $0x1d0] ss:$8 sps:$4 sm:$0xff]  }
 0x3ab   : > { %5626 = vmatprep.subr.bf16.mxu1 %v7926_v19  ;;  %v8004_v19 = vld [vmem:[%s10564_s4 + $0x1e4] ss:$8 sps:$4 sm:$0xff]  }
 0x3ae   : > { %5627 = vmatpush1.bf16.msra.mxu1 %v7924_v6  ;;  %v8002_v6 = vld [vmem:[%s10564_s4 + $0x1e0] ss:$8 sps:$4 sm:$0xff]  }
 0x3af   : > { %5628 = vmatprep.subr.bf16.mxu1 %v7929_v1  ;;  %v8007_v1 = vld [vmem:[%s10564_s4 + $0x1f4] ss:$8 sps:$4 sm:$0xff]  }
 0x3b2   : > { %5629 = vmatpush1.bf16.msra.mxu1 %v7927_v59  ;;  %v8005_v59 = vld [vmem:[%s10564_s4 + $0x1f0] ss:$8 sps:$4 sm:$0xff]  }
 0x3b3   : > { %5630 = vmatprep.subr.bf16.mxu1 %v7932_v5 }
 0x3b6   : > { %5631 = vmatpush1.bf16.msra.mxu1 %v7930_v15  ;;  %v8010_v15 = vld [vmem:[%s10564_s4 + $0x204] ss:$8 sps:$4 sm:$0xff]  }
 0x3b7   : > { %5632 = vmatprep.subr.bf16.mxu1 %v7935_v44 }
 0x3ba   : > { %5633 = vmatpush1.bf16.msra.mxu1 %v7933_v51  ;;  %v8008_v51 = vld [vmem:[%s10564_s4 + $0x200] ss:$8 sps:$4 sm:$0xff]  }
 0x3bb   : > { %5634 = vmatprep.subr.bf16.mxu1 %v7938_v16 }
 0x3be   : > { %5635 = vmatpush1.bf16.msra.mxu1 %v7936_v58  ;;  %v8013_v58 = vld [vmem:[%s10564_s4 + $0x214] ss:$8 sps:$4 sm:$0xff]  }
 0x3bf   : > { %5636 = vmatprep.subr.bf16.mxu1 %v7941_v35 }
 0x3c2   : > { %5637 = vmatpush1.bf16.msra.mxu1 %v7939_v22  ;;  %v8011_v22 = vld [vmem:[%s10564_s4 + $0x210] ss:$8 sps:$4 sm:$0xff]  }
 0x3c3   : > { %5638 = vmatprep.subr.bf16.mxu1 %v7944_v60  ;;  %v8016_v60 = vld [vmem:[%s10564_s4 + $0x224] ss:$8 sps:$4 sm:$0xff]  }
 0x3c6   : > { %5639 = vmatpush1.bf16.msra.mxu1 %v7942_v55  ;;  %v8014_v55 = vld [vmem:[%s10564_s4 + $0x220] ss:$8 sps:$4 sm:$0xff]  }
 0x3c7   : > { %5640 = vmatprep.subr.bf16.mxu1 %v7947_v26  ;;  %v8019_v26 = vld [vmem:[%s10564_s4 + $0x234] ss:$8 sps:$4 sm:$0xff]  }
 0x3ca   : > { %5641 = vmatpush1.bf16.msra.mxu1 %v7945_v50  ;;  %v8017_v50 = vld [vmem:[%s10564_s4 + $0x230] ss:$8 sps:$4 sm:$0xff]  }
 0x3cb   : > { %5642 = vmatprep.subr.bf16.mxu1 %v7950_v12  ;;  %v8022_v12 = vld [vmem:[%s10564_s4 + $0x244] ss:$8 sps:$4 sm:$0xff]  }
 0x3ce   : > { %5643 = vmatpush1.bf16.msra.mxu1 %v7948_v9  ;;  %v8020_v9 = vld [vmem:[%s10564_s4 + $0x240] ss:$8 sps:$4 sm:$0xff]  }
 0x3cf   : > { %5644 = vmatprep.subr.bf16.mxu1 %v7953_v13  ;;  %v8025_v13 = vld [vmem:[%s10564_s4 + $0x254] ss:$8 sps:$4 sm:$0xff]  }
 0x3d2   : > { %5645 = vmatpush1.bf16.msra.mxu1 %v7951_v29  ;;  %v8023_v29 = vld [vmem:[%s10564_s4 + $0x250] ss:$8 sps:$4 sm:$0xff]  }
 0x3d3   : > { %5646 = vmatprep.subr.bf16.mxu1 %v7956_v36  ;;  %v8028_v36 = vld [vmem:[%s10564_s4 + $0x264] ss:$8 sps:$4 sm:$0xff]  }
 0x3d6   : > { %5647 = vmatpush1.bf16.msra.mxu1 %v7954_v41  ;;  %v8026_v41 = vld [vmem:[%s10564_s4 + $0x260] ss:$8 sps:$4 sm:$0xff]  }
 0x3d7   : > { %5648 = vmatprep.subr.bf16.mxu1 %v7959_v53  ;;  %v8031_v53 = vld [vmem:[%s10564_s4 + $0x274] ss:$8 sps:$4 sm:$0xff]  }
 0x3da   : > { %5649 = vmatpush1.bf16.msra.mxu1 %v7957_v57  ;;  %v8029_v57 = vld [vmem:[%s10564_s4 + $0x270] ss:$8 sps:$4 sm:$0xff]  }
 0x3db   : > { %5659 = vmatprep.subr.bf16.mxu1 %v7962_v45  ;;  %v8034_v45 = vld [vmem:[%s10564_s4 + $0x284] ss:$8 sps:$4 sm:$0xff]  }
 0x470   : > { %v4015_v49 = vpop.f32.mrb[68].mxu1 }
 0x471   : > { %v4016_v52 = vadd.f32 %v4015_v49, %v3961_v14  ;;  %v4017_v20 = vpop.f32.mrb[69].mxu1  ;;  %v8032_v14 = vld [vmem:[%s10564_s4 + $0x280] ss:$8 sps:$4 sm:$0xff]   ;;  %v8037_v49 = vld [vmem:[%s10564_s4 + $0x294] ss:$8 sps:$4 sm:$0xff]  }
 0x472   : > { %v9853_v54 = vpop.f32.mrb[70].mxu1  ;;  %v8040_v20 = vld [vmem:[%s10564_s4 + $0x2a4] ss:$8 sps:$4 sm:$0xff]  }
 0x473   : > { %v9855_v43 = vmax.f32 %v4016_v52, 0.0  ;;  %v4020_v48 = vpop.f32.mrb[71].mxu1  ;;  %v8035_v52 = vld [vmem:[%s10564_s4 + $0x290] ss:$8 sps:$4 sm:$0xff]  }
 0x474   : > { %v8038_v48 = vld [vmem:[%s10564_s4 + $0x2a0] ss:$8 sps:$4 sm:$0xff]  }
 0x475   : > { %v4025_v37 = vrot.slane %v9855_v43, 1  ;;  %v4029_v47 = vrot.slane %v9855_v43, 3  ;;  %v4054_v8 = vpack.c.bf16 %v9855_v43, %v9855_v43  ;;  %v4027_v5 = vrot.slane %v9855_v43, 2 }
 0x476   : > { %v4033_v44 = vrot.slane %v9855_v43, 5 }
 0x477   : > { %v4055_v30 = vpack.c.bf16 %v4025_v37, %v4025_v37  ;;  %v4057_v42 = vpack.c.bf16 %v4029_v47, %v4029_v47  ;;  %v4056_v16 = vpack.c.bf16 %v4027_v5, %v4027_v5  ;;  %v8043_v37 = vld [vmem:[%s10564_s4 + $0x2b4] ss:$8 sps:$4 sm:$0xff]   ;;  %v8041_v47 = vld [vmem:[%s10564_s4 + $0x2b0] ss:$8 sps:$4 sm:$0xff]  }
 0x478   : > { %v4059_v35 = vpack.c.bf16 %v4033_v44, %v4033_v44  ;;  %v8091_v5 = vld [vmem:[%s10564_s4 + $0x3b4] ss:$8 sps:$4 sm:$0xff]   ;;  %v8094_v44 = vld [vmem:[%s10564_s4 + $0x3c4] ss:$8 sps:$4 sm:$0xff]  }
 0x479   : > { %5650 = vmatprep.mubr.bf16.mxu1 %v4055_v30  ;;  %v8046_v30 = vld [vmem:[%s10564_s4 + $0x2c4] ss:$8 sps:$4 sm:$0xff]  }
 0x47a   : > { %5651 = vmatmul.mubr.bf16.vlgmr.msra.gmra.mrb[72].mxu1 %v4054_v8  ;;  %v8049_v8 = vld [vmem:[%s10564_s4 + $0x2d4] ss:$8 sps:$4 sm:$0xff]  }
 0x47b   : > { %5660 = vmatpush1.bf16.msra.mxu1 %v7960_v25  ;;  %5691 = vmatprep.mubr.bf16.mxu1 %v4057_v42  ;;  %v8044_v25 = vld [vmem:[%s10564_s4 + $0x2c0] ss:$8 sps:$4 sm:$0xff]   ;;  %v8052_v42 = vld [vmem:[%s10564_s4 + $0x2e4] ss:$8 sps:$4 sm:$0xff]  }
 0x47c   : > { %5661 = vmatprep.subr.bf16.mxu1 %v7965_v24  ;;  %v8047_v24 = vld [vmem:[%s10564_s4 + $0x2d0] ss:$8 sps:$4 sm:$0xff]  }
 0x47f   : > { %5662 = vmatpush1.bf16.msra.mxu1 %v7963_v4  ;;  %v8050_v4 = vld [vmem:[%s10564_s4 + $0x2e0] ss:$8 sps:$4 sm:$0xff]  }
 0x480   : > { %5663 = vmatprep.subr.bf16.mxu1 %v7968_v28  ;;  %v8055_v28 = vld [vmem:[%s10564_s4 + $0x2f4] ss:$8 sps:$4 sm:$0xff]  }
 0x483   : > { %5664 = vmatpush1.bf16.msra.mxu1 %v7966_v33  ;;  %v8053_v33 = vld [vmem:[%s10564_s4 + $0x2f0] ss:$8 sps:$4 sm:$0xff]  }
 0x484   : > { %5665 = vmatprep.subr.bf16.mxu1 %v7971_v27  ;;  %v4031_v27 = vrot.slane %v9855_v43, 4 }
 0x487   : > { %5666 = vmatpush1.bf16.msra.mxu1 %v7969_v18  ;;  %v8058_v18 = vld [vmem:[%s10564_s4 + $0x304] ss:$8 sps:$4 sm:$0xff]  }
 0x488   : > { %5667 = vmatprep.subr.bf16.mxu1 %v7974_v61  ;;  %v4037_v61 = vrot.slane %v9855_v43, 7 }
 0x48b   : > { %5668 = vmatpush1.bf16.msra.mxu1 %v7972_v56  ;;  %v8056_v56 = vld [vmem:[%s10564_s4 + $0x300] ss:$8 sps:$4 sm:$0xff]  }
 0x48c   : > { %5669 = vmatprep.subr.bf16.mxu1 %v7977_v62  ;;  %v4058_v62 = vpack.c.bf16 %v4031_v27, %v4031_v27  ;;  %v8134_v27 = vld [vmem:[%s10564_s4 + $0x4a0] ss:$8 sps:$4 sm:$0xff]  }
 0x48f   : > { %5670 = vmatpush1.bf16.msra.mxu1 %v7975_v11  ;;  %v8061_v11 = vld [vmem:[%s10564_s4 + $0x314] ss:$8 sps:$4 sm:$0xff]  }
 0x490   : > { %5671 = vmatprep.subr.bf16.mxu1 %v7980_v0  ;;  %v4061_v0 = vpack.c.bf16 %v4037_v61, %v4037_v61  ;;  %v8137_v61 = vld [vmem:[%s10564_s4 + $0x4b0] ss:$8 sps:$4 sm:$0xff]  }
 0x493   : > { %5672 = vmatpush1.bf16.msra.mxu1 %v7978_v32  ;;  %v8059_v32 = vld [vmem:[%s10564_s4 + $0x310] ss:$8 sps:$4 sm:$0xff]  }
 0x494   : > { %5673 = vmatprep.subr.bf16.mxu1 %v7983_v7  ;;  %v8064_v7 = vld [vmem:[%s10564_s4 + $0x324] ss:$8 sps:$4 sm:$0xff]  }
 0x497   : > { %5674 = vmatpush1.bf16.msra.mxu1 %v7981_v31  ;;  %v8062_v31 = vld [vmem:[%s10564_s4 + $0x320] ss:$8 sps:$4 sm:$0xff]  }
 0x498   : > { %5675 = vmatprep.subr.bf16.mxu1 %v7986_v40  ;;  %v8067_v40 = vld [vmem:[%s10564_s4 + $0x334] ss:$8 sps:$4 sm:$0xff]  }
 0x49b   : > { %5676 = vmatpush1.bf16.msra.mxu1 %v7984_v21  ;;  %v8065_v21 = vld [vmem:[%s10564_s4 + $0x330] ss:$8 sps:$4 sm:$0xff]  }
 0x49c   : > { %5677 = vmatprep.subr.bf16.mxu1 %v7989_v10  ;;  %v8070_v10 = vld [vmem:[%s10564_s4 + $0x344] ss:$8 sps:$4 sm:$0xff]  }
 0x49f   : > { %5678 = vmatpush1.bf16.msra.mxu1 %v7987_v23  ;;  %v8068_v23 = vld [vmem:[%s10564_s4 + $0x340] ss:$8 sps:$4 sm:$0xff]  }
 0x4a0   : > { %5679 = vmatprep.subr.bf16.mxu1 %v7992_v17  ;;  %v8073_v17 = vld [vmem:[%s10564_s4 + $0x354] ss:$8 sps:$4 sm:$0xff]  }
 0x4a3   : > { %5680 = vmatpush1.bf16.msra.mxu1 %v7990_v34  ;;  %v8071_v34 = vld [vmem:[%s10564_s4 + $0x350] ss:$8 sps:$4 sm:$0xff]  }
 0x4a4   : > { %5681 = vmatprep.subr.bf16.mxu1 %v7995_v2  ;;  %v8076_v2 = vld [vmem:[%s10564_s4 + $0x364] ss:$8 sps:$4 sm:$0xff]  }
 0x4a7   : > { %5682 = vmatpush1.bf16.msra.mxu1 %v7993_v38  ;;  %v8074_v38 = vld [vmem:[%s10564_s4 + $0x360] ss:$8 sps:$4 sm:$0xff]  }
 0x4a8   : > { %5683 = vmatprep.subr.bf16.mxu1 %v7998_v63  ;;  %v8079_v63 = vld [vmem:[%s10564_s4 + $0x374] ss:$8 sps:$4 sm:$0xff]  }
 0x4ab   : > { %5684 = vmatpush1.bf16.msra.mxu1 %v7996_v46  ;;  %v8077_v46 = vld [vmem:[%s10564_s4 + $0x370] ss:$8 sps:$4 sm:$0xff]  }
 0x4ac   : > { %5685 = vmatprep.subr.bf16.mxu1 %v8001_v3  ;;  %v8082_v3 = vld [vmem:[%s10564_s4 + $0x384] ss:$8 sps:$4 sm:$0xff]  }
 0x4af   : > { %5686 = vmatpush1.bf16.msra.mxu1 %v7999_v39  ;;  %v8080_v39 = vld [vmem:[%s10564_s4 + $0x380] ss:$8 sps:$4 sm:$0xff]  }
 0x4b0   : > { %5687 = vmatprep.subr.bf16.mxu1 %v8004_v19  ;;  %v8085_v19 = vld [vmem:[%s10564_s4 + $0x394] ss:$8 sps:$4 sm:$0xff]  }
 0x4b3   : > { %5688 = vmatpush1.bf16.msra.mxu1 %v8002_v6  ;;  %v8083_v6 = vld [vmem:[%s10564_s4 + $0x390] ss:$8 sps:$4 sm:$0xff]  }
 0x4b4   : > { %5689 = vmatprep.subr.bf16.mxu1 %v8007_v1  ;;  %v8088_v1 = vld [vmem:[%s10564_s4 + $0x3a4] ss:$8 sps:$4 sm:$0xff]  }
 0x4b7   : > { %5690 = vmatpush1.bf16.msra.mxu1 %v8005_v59  ;;  %v8086_v59 = vld [vmem:[%s10564_s4 + $0x3a0] ss:$8 sps:$4 sm:$0xff]  }
 0x4b8   : > { %5700 = vmatprep.subr.bf16.mxu1 %v8010_v15  ;;  %v8089_v15 = vld [vmem:[%s10564_s4 + $0x3b0] ss:$8 sps:$4 sm:$0xff]  }
 0x4ba   : > { %5692 = vmatmul.mubr.bf16.vlgmr.msra.gmra.mrb[72].mxu1 %v4056_v16  ;;  %v8097_v16 = vld [vmem:[%s10564_s4 + $0x3d4] ss:$8 sps:$4 sm:$0xff]  }
 0x4bb   : > { %5701 = vmatpush1.bf16.msra.mxu1 %v8008_v51  ;;  %5732 = vmatprep.mubr.bf16.mxu1 %v4059_v35  ;;  %v8092_v51 = vld [vmem:[%s10564_s4 + $0x3c0] ss:$8 sps:$4 sm:$0xff]   ;;  %v3966_v35 = vpop.permute.xlu0 %3965 }
 0x4bc   : > { %5702 = vmatprep.subr.bf16.mxu1 %v8013_v58  ;;  %v8095_v58 = vld [vmem:[%s10564_s4 + $0x3d0] ss:$8 sps:$4 sm:$0xff]  }
 0x4bf   : > { %5703 = vmatpush1.bf16.msra.mxu1 %v8011_v22  ;;  %v8100_v22 = vld [vmem:[%s10564_s4 + $0x3e4] ss:$8 sps:$4 sm:$0xff]  }
 0x4c0   : > { %5704 = vmatprep.subr.bf16.mxu1 %v8016_v60  ;;  %v4019_v60 = vadd.f32 %v9853_v54, %v3966_v35  ;;  %v4035_v54 = vrot.slane %v9855_v43, 6  ;;  %v8107_v43 = vld [vmem:[%s10564_s4 + $0x410] ss:$8 sps:$4 sm:$0xff]   ;;  %v8181_v35 = vld [vmem:[%s10564_s4 + $0x594] ss:$8 sps:$4 sm:$0xff]  }
 0x4c3   : > { %5705 = vmatpush1.bf16.msra.mxu1 %v8014_v55  ;;  %v8098_v55 = vld [vmem:[%s10564_s4 + $0x3e0] ss:$8 sps:$4 sm:$0xff]  }
 0x4c4   : > { %5706 = vmatprep.subr.bf16.mxu1 %v8019_v26  ;;  %v8103_v26 = vld [vmem:[%s10564_s4 + $0x3f4] ss:$8 sps:$4 sm:$0xff]  }
 0x4c7   : > { %5707 = vmatpush1.bf16.msra.mxu1 %v8017_v50  ;;  %v10148_v50 = vmax.f32 %v4019_v60, 0.0  ;;  %v8184_v60 = vld [vmem:[%s10564_s4 + $0x5a4] ss:$8 sps:$4 sm:$0xff]  }
 0x4c8   : > { %5708 = vmatprep.subr.bf16.mxu1 %v8022_v12  ;;  %v8101_v12 = vld [vmem:[%s10564_s4 + $0x3f0] ss:$8 sps:$4 sm:$0xff]  }
 0x4cb   : > { %5709 = vmatpush1.bf16.msra.mxu1 %v8020_v9  ;;  %v8106_v9 = vld [vmem:[%s10564_s4 + $0x404] ss:$8 sps:$4 sm:$0xff]  }
 0x4cc   : > { %5710 = vmatprep.subr.bf16.mxu1 %v8025_v13  ;;  %v4040_v13 = vrot.slane %v10148_v50, 1 }
 0x4cf   : > { %5711 = vmatpush1.bf16.msra.mxu1 %v8023_v29  ;;  %v8104_v29 = vld [vmem:[%s10564_s4 + $0x400] ss:$8 sps:$4 sm:$0xff]  }
 0x4d0   : > { %5712 = vmatprep.subr.bf16.mxu1 %v8028_v36  ;;  %v4060_v36 = vpack.c.bf16 %v4035_v54, %v4035_v54  ;;  %v8190_v54 = vld [vmem:[%s10564_s4 + $0x5c4] ss:$8 sps:$4 sm:$0xff]  }
 0x4d3   : > { %5713 = vmatpush1.bf16.msra.mxu1 %v8026_v41  ;;  %v8109_v41 = vld [vmem:[%s10564_s4 + $0x414] ss:$8 sps:$4 sm:$0xff]  }
 0x4d4   : > { %5714 = vmatprep.subr.bf16.mxu1 %v8031_v53  ;;  %v4063_v53 = vpack.c.bf16 %v4040_v13, %v4040_v13  ;;  %v8193_v13 = vld [vmem:[%s10564_s4 + $0x5d4] ss:$8 sps:$4 sm:$0xff]  }
 0x4d7   : > { %5715 = vmatpush1.bf16.msra.mxu1 %v8029_v57  ;;  %v8112_v57 = vld [vmem:[%s10564_s4 + $0x424] ss:$8 sps:$4 sm:$0xff]  }
 0x4d8   : > { %5716 = vmatprep.subr.bf16.mxu1 %v8034_v45  ;;  %v8110_v45 = vld [vmem:[%s10564_s4 + $0x420] ss:$8 sps:$4 sm:$0xff]  }
 0x4db   : > { %5717 = vmatpush1.bf16.msra.mxu1 %v8032_v14  ;;  %v8115_v14 = vld [vmem:[%s10564_s4 + $0x434] ss:$8 sps:$4 sm:$0xff]  }
 0x4dc   : > { %5718 = vmatprep.subr.bf16.mxu1 %v8037_v49  ;;  %v8113_v49 = vld [vmem:[%s10564_s4 + $0x430] ss:$8 sps:$4 sm:$0xff]  }
 0x4df   : > { %5719 = vmatpush1.bf16.msra.mxu1 %v8035_v52  ;;  %v8118_v52 = vld [vmem:[%s10564_s4 + $0x444] ss:$8 sps:$4 sm:$0xff]  }
 0x4e0   : > { %5720 = vmatprep.subr.bf16.mxu1 %v8040_v20  ;;  %v8116_v20 = vld [vmem:[%s10564_s4 + $0x440] ss:$8 sps:$4 sm:$0xff]  }
 0x4e3   : > { %5721 = vmatpush1.bf16.msra.mxu1 %v8038_v48  ;;  %v8121_v48 = vld [vmem:[%s10564_s4 + $0x454] ss:$8 sps:$4 sm:$0xff]  }
 0x4e4   : > { %5722 = vmatprep.subr.bf16.mxu1 %v8043_v37  ;;  %v8119_v37 = vld [vmem:[%s10564_s4 + $0x450] ss:$8 sps:$4 sm:$0xff]  }
 0x4e7   : > { %5723 = vmatpush1.bf16.msra.mxu1 %v8041_v47  ;;  %v8124_v47 = vld [vmem:[%s10564_s4 + $0x464] ss:$8 sps:$4 sm:$0xff]  }
 0x4e8   : > { %5724 = vmatprep.subr.bf16.mxu1 %v8046_v30  ;;  %v8122_v30 = vld [vmem:[%s10564_s4 + $0x460] ss:$8 sps:$4 sm:$0xff]  }
 0x4eb   : > { %5725 = vmatpush1.bf16.msra.mxu1 %v8044_v25  ;;  %v8127_v25 = vld [vmem:[%s10564_s4 + $0x474] ss:$8 sps:$4 sm:$0xff]  }
 0x4ec   : > { %5726 = vmatprep.subr.bf16.mxu1 %v8049_v8  ;;  %v8125_v8 = vld [vmem:[%s10564_s4 + $0x470] ss:$8 sps:$4 sm:$0xff]  }
 0x4ef   : > { %5727 = vmatpush1.bf16.msra.mxu1 %v8047_v24  ;;  %v8130_v24 = vld [vmem:[%s10564_s4 + $0x484] ss:$8 sps:$4 sm:$0xff]  }
 0x4f0   : > { %5728 = vmatprep.subr.bf16.mxu1 %v8052_v42  ;;  %v8128_v42 = vld [vmem:[%s10564_s4 + $0x480] ss:$8 sps:$4 sm:$0xff]  }
 0x4f3   : > { %5729 = vmatpush1.bf16.msra.mxu1 %v8050_v4  ;;  %v8133_v4 = vld [vmem:[%s10564_s4 + $0x494] ss:$8 sps:$4 sm:$0xff]  }
 0x4f4   : > { %5730 = vmatprep.subr.bf16.mxu1 %v8055_v28  ;;  %v8131_v28 = vld [vmem:[%s10564_s4 + $0x490] ss:$8 sps:$4 sm:$0xff]  }
 0x4f7   : > { %5731 = vmatpush1.bf16.msra.mxu1 %v8053_v33  ;;  %v8136_v33 = vld [vmem:[%s10564_s4 + $0x4a4] ss:$8 sps:$4 sm:$0xff]  }
 0x4f8   : > { %5741 = vmatprep.subr.bf16.mxu1 %v8058_v18  ;;  %v8139_v18 = vld [vmem:[%s10564_s4 + $0x4b4] ss:$8 sps:$4 sm:$0xff]  }
 0x4fa   : > { %5733 = vmatmul.mubr.bf16.vlgmr.msra.gmra.mrb[72].mxu1 %v4058_v62  ;;  %v8140_v62 = vld [vmem:[%s10564_s4 + $0x4c0] ss:$8 sps:$4 sm:$0xff]  }
 0x4fb   : > { %5742 = vmatpush1.bf16.msra.mxu1 %v8056_v56  ;;  %5773 = vmatprep.mubr.bf16.mxu1 %v4061_v0  ;;  %v8142_v56 = vld [vmem:[%s10564_s4 + $0x4c4] ss:$8 sps:$4 sm:$0xff]   ;;  %v8143_v0 = vld [vmem:[%s10564_s4 + $0x4d0] ss:$8 sps:$4 sm:$0xff]  }
 0x4fc   : > { %5743 = vmatprep.subr.bf16.mxu1 %v8061_v11  ;;  %v8145_v11 = vld [vmem:[%s10564_s4 + $0x4d4] ss:$8 sps:$4 sm:$0xff]  }
 0x4ff   : > { %5744 = vmatpush1.bf16.msra.mxu1 %v8059_v32  ;;  %v8148_v32 = vld [vmem:[%s10564_s4 + $0x4e4] ss:$8 sps:$4 sm:$0xff]  }
 0x500   : > { %5745 = vmatprep.subr.bf16.mxu1 %v8064_v7  ;;  %v8146_v7 = vld [vmem:[%s10564_s4 + $0x4e0] ss:$8 sps:$4 sm:$0xff]  }
 0x503   : > { %5746 = vmatpush1.bf16.msra.mxu1 %v8062_v31  ;;  %v8151_v31 = vld [vmem:[%s10564_s4 + $0x4f4] ss:$8 sps:$4 sm:$0xff]  }
 0x504   : > { %5747 = vmatprep.subr.bf16.mxu1 %v8067_v40  ;;  %v8149_v40 = vld [vmem:[%s10564_s4 + $0x4f0] ss:$8 sps:$4 sm:$0xff]  }
 0x507   : > { %5748 = vmatpush1.bf16.msra.mxu1 %v8065_v21  ;;  %v8154_v21 = vld [vmem:[%s10564_s4 + $0x504] ss:$8 sps:$4 sm:$0xff]  }
 0x508   : > { %5749 = vmatprep.subr.bf16.mxu1 %v8070_v10  ;;  %v4044_v10 = vrot.slane %v10148_v50, 3 }
 0x50b   : > { %5750 = vmatpush1.bf16.msra.mxu1 %v8068_v23  ;;  %v8152_v23 = vld [vmem:[%s10564_s4 + $0x500] ss:$8 sps:$4 sm:$0xff]  }
 0x50c   : > { %5751 = vmatprep.subr.bf16.mxu1 %v8073_v17  ;;  %v4062_v17 = vpack.c.bf16 %v10148_v50, %v10148_v50 }
 0x50f   : > { %5752 = vmatpush1.bf16.msra.mxu1 %v8071_v34  ;;  %v8157_v34 = vld [vmem:[%s10564_s4 + $0x514] ss:$8 sps:$4 sm:$0xff]  }
 0x510   : > { %5753 = vmatprep.subr.bf16.mxu1 %v8076_v2  ;;  %v4065_v2 = vpack.c.bf16 %v4044_v10, %v4044_v10  ;;  %v8236_v10 = vld [vmem:[%s10564_s4 + $0x6c0] ss:$8 sps:$4 sm:$0xff]  }
 0x513   : > { %5754 = vmatpush1.bf16.msra.mxu1 %v8074_v38  ;;  %v8155_v38 = vld [vmem:[%s10564_s4 + $0x510] ss:$8 sps:$4 sm:$0xff]  }
 0x514   : > { %5755 = vmatprep.subr.bf16.mxu1 %v8079_v63  ;;  %v8160_v63 = vld [vmem:[%s10564_s4 + $0x524] ss:$8 sps:$4 sm:$0xff]  }
 0x517   : > { %5756 = vmatpush1.bf16.msra.mxu1 %v8077_v46  ;;  %v8158_v46 = vld [vmem:[%s10564_s4 + $0x520] ss:$8 sps:$4 sm:$0xff]  }
 0x518   : > { %5757 = vmatprep.subr.bf16.mxu1 %v8082_v3  ;;  %v8163_v3 = vld [vmem:[%s10564_s4 + $0x534] ss:$8 sps:$4 sm:$0xff]  }
 0x51b   : > { %5758 = vmatpush1.bf16.msra.mxu1 %v8080_v39  ;;  %v8161_v39 = vld [vmem:[%s10564_s4 + $0x530] ss:$8 sps:$4 sm:$0xff]  }
 0x51c   : > { %5759 = vmatprep.subr.bf16.mxu1 %v8085_v19  ;;  %v8166_v19 = vld [vmem:[%s10564_s4 + $0x544] ss:$8 sps:$4 sm:$0xff]  }
 0x51f   : > { %5760 = vmatpush1.bf16.msra.mxu1 %v8083_v6  ;;  %v8164_v6 = vld [vmem:[%s10564_s4 + $0x540] ss:$8 sps:$4 sm:$0xff]  }
 0x520   : > { %5761 = vmatprep.subr.bf16.mxu1 %v8088_v1  ;;  %v8169_v1 = vld [vmem:[%s10564_s4 + $0x554] ss:$8 sps:$4 sm:$0xff]  }
 0x523   : > { %5762 = vmatpush1.bf16.msra.mxu1 %v8086_v59  ;;  %v8167_v59 = vld [vmem:[%s10564_s4 + $0x550] ss:$8 sps:$4 sm:$0xff]  }
 0x524   : > { %5763 = vmatprep.subr.bf16.mxu1 %v8091_v5  ;;  %v8172_v5 = vld [vmem:[%s10564_s4 + $0x564] ss:$8 sps:$4 sm:$0xff]  }
 0x527   : > { %5764 = vmatpush1.bf16.msra.mxu1 %v8089_v15  ;;  %v8170_v15 = vld [vmem:[%s10564_s4 + $0x560] ss:$8 sps:$4 sm:$0xff]  }
 0x528   : > { %5765 = vmatprep.subr.bf16.mxu1 %v8094_v44  ;;  %v8175_v44 = vld [vmem:[%s10564_s4 + $0x574] ss:$8 sps:$4 sm:$0xff]  }
 0x52b   : > { %5766 = vmatpush1.bf16.msra.mxu1 %v8092_v51  ;;  %v8173_v51 = vld [vmem:[%s10564_s4 + $0x570] ss:$8 sps:$4 sm:$0xff]  }
 0x52c   : > { %5767 = vmatprep.subr.bf16.mxu1 %v8097_v16  ;;  %v8178_v16 = vld [vmem:[%s10564_s4 + $0x584] ss:$8 sps:$4 sm:$0xff]  }
 0x52f   : > { %5768 = vmatpush1.bf16.msra.mxu1 %v8095_v58  ;;  %v8176_v58 = vld [vmem:[%s10564_s4 + $0x580] ss:$8 sps:$4 sm:$0xff]  }
 0x530   : > { %5769 = vmatprep.subr.bf16.mxu1 %v8100_v22  ;;  %v8179_v22 = vld [vmem:[%s10564_s4 + $0x590] ss:$8 sps:$4 sm:$0xff]  }
 0x533   : > { %5770 = vmatpush1.bf16.msra.mxu1 %v8098_v55  ;;  %v8182_v55 = vld [vmem:[%s10564_s4 + $0x5a0] ss:$8 sps:$4 sm:$0xff]  }
 0x534   : > { %5771 = vmatprep.subr.bf16.mxu1 %v8103_v26  ;;  %v8187_v26 = vld [vmem:[%s10564_s4 + $0x5b4] ss:$8 sps:$4 sm:$0xff]  }
 0x537   : > { %5772 = vmatpush1.bf16.msra.mxu1 %v8101_v12  ;;  %v8185_v12 = vld [vmem:[%s10564_s4 + $0x5b0] ss:$8 sps:$4 sm:$0xff]  }
 0x538   : > { %5782 = vmatprep.subr.bf16.mxu1 %v8106_v9  ;;  %v8188_v9 = vld [vmem:[%s10564_s4 + $0x5c0] ss:$8 sps:$4 sm:$0xff]  }
 0x53a   : > { %5774 = vmatmul.mubr.bf16.vlgmr.msra.gmra.mrb[72].mxu1 %v4060_v36  ;;  %v8196_v36 = vld [vmem:[%s10564_s4 + $0x5e4] ss:$8 sps:$4 sm:$0xff]  }
 0x53b   : > { %5783 = vmatpush1.bf16.msra.mxu1 %v8104_v29  ;;  %5814 = vmatprep.mubr.bf16.mxu1 %v4063_v53  ;;  %v8191_v29 = vld [vmem:[%s10564_s4 + $0x5d0] ss:$8 sps:$4 sm:$0xff]   ;;  %v8199_v53 = vld [vmem:[%s10564_s4 + $0x5f4] ss:$8 sps:$4 sm:$0xff]  }
 0x53c   : > { %5784 = vmatprep.subr.bf16.mxu1 %v8109_v41  ;;  %v8194_v41 = vld [vmem:[%s10564_s4 + $0x5e0] ss:$8 sps:$4 sm:$0xff]  }
 0x53f   : > { %5785 = vmatpush1.bf16.msra.mxu1 %v8107_v43  ;;  %v8197_v43 = vld [vmem:[%s10564_s4 + $0x5f0] ss:$8 sps:$4 sm:$0xff]  }
 0x540   : > { %5786 = vmatprep.subr.bf16.mxu1 %v8112_v57  ;;  %v4042_v57 = vrot.slane %v10148_v50, 2 }
 0x543   : > { %5787 = vmatpush1.bf16.msra.mxu1 %v8110_v45  ;;  %v8202_v45 = vld [vmem:[%s10564_s4 + $0x604] ss:$8 sps:$4 sm:$0xff]  }
 0x544   : > { %5788 = vmatprep.subr.bf16.mxu1 %v8115_v14  ;;  %v4048_v14 = vrot.slane %v10148_v50, 5 }
 0x547   : > { %5789 = vmatpush1.bf16.msra.mxu1 %v8113_v49  ;;  %v8200_v49 = vld [vmem:[%s10564_s4 + $0x600] ss:$8 sps:$4 sm:$0xff]  }
 0x548   : > { %5790 = vmatprep.subr.bf16.mxu1 %v8118_v52  ;;  %v4064_v52 = vpack.c.bf16 %v4042_v57, %v4042_v57  ;;  %v8281_v57 = vld [vmem:[%s10564_s4 + $0x7b0] ss:$8 sps:$4 sm:$0xff]  }
 0x54b   : > { %5791 = vmatpush1.bf16.msra.mxu1 %v8116_v20  ;;  %v8205_v20 = vld [vmem:[%s10564_s4 + $0x614] ss:$8 sps:$4 sm:$0xff]  }
 0x54c   : > { %5792 = vmatprep.subr.bf16.mxu1 %v8121_v48  ;;  %v4067_v48 = vpack.c.bf16 %v4048_v14, %v4048_v14  ;;  %v8284_v14 = vld [vmem:[%s10564_s4 + $0x7c0] ss:$8 sps:$4 sm:$0xff]  }
 0x54f   : > { %5793 = vmatpush1.bf16.msra.mxu1 %v8119_v37  ;;  %v8203_v37 = vld [vmem:[%s10564_s4 + $0x610] ss:$8 sps:$4 sm:$0xff]  }
 0x550   : > { %5794 = vmatprep.subr.bf16.mxu1 %v8124_v47  ;;  %v8208_v47 = vld [vmem:[%s10564_s4 + $0x624] ss:$8 sps:$4 sm:$0xff]  }
 0x553   : > { %5795 = vmatpush1.bf16.msra.mxu1 %v8122_v30  ;;  %v8206_v30 = vld [vmem:[%s10564_s4 + $0x620] ss:$8 sps:$4 sm:$0xff]  }
 0x554   : > { %5796 = vmatprep.subr.bf16.mxu1 %v8127_v25  ;;  %v8211_v25 = vld [vmem:[%s10564_s4 + $0x634] ss:$8 sps:$4 sm:$0xff]  }
 0x557   : > { %5797 = vmatpush1.bf16.msra.mxu1 %v8125_v8  ;;  %v8209_v8 = vld [vmem:[%s10564_s4 + $0x630] ss:$8 sps:$4 sm:$0xff]  }
 0x558   : > { %5798 = vmatprep.subr.bf16.mxu1 %v8130_v24  ;;  %v8214_v24 = vld [vmem:[%s10564_s4 + $0x644] ss:$8 sps:$4 sm:$0xff]  }
 0x55b   : > { %5799 = vmatpush1.bf16.msra.mxu1 %v8128_v42  ;;  %v8212_v42 = vld [vmem:[%s10564_s4 + $0x640] ss:$8 sps:$4 sm:$0xff]  }
 0x55c   : > { %5800 = vmatprep.subr.bf16.mxu1 %v8133_v4  ;;  %v8217_v4 = vld [vmem:[%s10564_s4 + $0x654] ss:$8 sps:$4 sm:$0xff]  }
 0x55f   : > { %5801 = vmatpush1.bf16.msra.mxu1 %v8131_v28  ;;  %v8215_v28 = vld [vmem:[%s10564_s4 + $0x650] ss:$8 sps:$4 sm:$0xff]  }
 0x560   : > { %5802 = vmatprep.subr.bf16.mxu1 %v8136_v33  ;;  %v8220_v33 = vld [vmem:[%s10564_s4 + $0x664] ss:$8 sps:$4 sm:$0xff]  }
 0x563   : > { %5803 = vmatpush1.bf16.msra.mxu1 %v8134_v27  ;;  %v8218_v27 = vld [vmem:[%s10564_s4 + $0x660] ss:$8 sps:$4 sm:$0xff]  }
 0x564   : > { %5804 = vmatprep.subr.bf16.mxu1 %v8139_v18  ;;  %v8223_v18 = vld [vmem:[%s10564_s4 + $0x674] ss:$8 sps:$4 sm:$0xff]  }
 0x567   : > { %5805 = vmatpush1.bf16.msra.mxu1 %v8137_v61  ;;  %v8221_v61 = vld [vmem:[%s10564_s4 + $0x670] ss:$8 sps:$4 sm:$0xff]  }
 0x568   : > { %5806 = vmatprep.subr.bf16.mxu1 %v8142_v56  ;;  %v8226_v56 = vld [vmem:[%s10564_s4 + $0x684] ss:$8 sps:$4 sm:$0xff]  }
 0x56b   : > { %5807 = vmatpush1.bf16.msra.mxu1 %v8140_v62  ;;  %v8224_v62 = vld [vmem:[%s10564_s4 + $0x680] ss:$8 sps:$4 sm:$0xff]  }
 0x56c   : > { %5808 = vmatprep.subr.bf16.mxu1 %v8145_v11  ;;  %v8229_v11 = vld [vmem:[%s10564_s4 + $0x694] ss:$8 sps:$4 sm:$0xff]  }
 0x56f   : > { %5809 = vmatpush1.bf16.msra.mxu1 %v8143_v0  ;;  %v8227_v0 = vld [vmem:[%s10564_s4 + $0x690] ss:$8 sps:$4 sm:$0xff]  }
 0x570   : > { %5810 = vmatprep.subr.bf16.mxu1 %v8148_v32  ;;  %v8232_v32 = vld [vmem:[%s10564_s4 + $0x6a4] ss:$8 sps:$4 sm:$0xff]  }
 0x573   : > { %5811 = vmatpush1.bf16.msra.mxu1 %v8146_v7  ;;  %v8230_v7 = vld [vmem:[%s10564_s4 + $0x6a0] ss:$8 sps:$4 sm:$0xff]  }
 0x574   : > { %5812 = vmatprep.subr.bf16.mxu1 %v8151_v31  ;;  %v8235_v31 = vld [vmem:[%s10564_s4 + $0x6b4] ss:$8 sps:$4 sm:$0xff]  }
 0x577   : > { %5813 = vmatpush1.bf16.msra.mxu1 %v8149_v40  ;;  %v8233_v40 = vld [vmem:[%s10564_s4 + $0x6b0] ss:$8 sps:$4 sm:$0xff]  }
 0x578   : > { %5823 = vmatprep.subr.bf16.mxu1 %v8154_v21  ;;  %v8238_v21 = vld [vmem:[%s10564_s4 + $0x6c4] ss:$8 sps:$4 sm:$0xff]  }
 0x57a   : > { %5815 = vmatmul.mubr.bf16.vlgmr.msra.gmra.mrb[72].mxu1 %v4062_v17  ;;  %v8239_v17 = vld [vmem:[%s10564_s4 + $0x6d0] ss:$8 sps:$4 sm:$0xff]  }
 0x57b   : > { %5824 = vmatpush1.bf16.msra.mxu1 %v8152_v23  ;;  %5855 = vmatprep.mubr.bf16.mxu1 %v4065_v2  ;;  %v8241_v23 = vld [vmem:[%s10564_s4 + $0x6d4] ss:$8 sps:$4 sm:$0xff]   ;;  %v8242_v2 = vld [vmem:[%s10564_s4 + $0x6e0] ss:$8 sps:$4 sm:$0xff]  }
 0x57c   : > { %5825 = vmatprep.subr.bf16.mxu1 %v8157_v34  ;;  %v8244_v34 = vld [vmem:[%s10564_s4 + $0x6e4] ss:$8 sps:$4 sm:$0xff]  }
 0x57f   : > { %5826 = vmatpush1.bf16.msra.mxu1 %v8155_v38  ;;  %v8247_v38 = vld [vmem:[%s10564_s4 + $0x6f4] ss:$8 sps:$4 sm:$0xff]  }
 0x580   : > { %5827 = vmatprep.subr.bf16.mxu1 %v8160_v63  ;;  %v8245_v63 = vld [vmem:[%s10564_s4 + $0x6f0] ss:$8 sps:$4 sm:$0xff]  }
 0x583   : > { %5828 = vmatpush1.bf16.msra.mxu1 %v8158_v46  ;;  %v4046_v46 = vrot.slane %v10148_v50, 4 }
 0x584   : > { %5829 = vmatprep.subr.bf16.mxu1 %v8163_v3  ;;  %v8250_v3 = vld [vmem:[%s10564_s4 + $0x704] ss:$8 sps:$4 sm:$0xff]  }
 0x587   : > { %5830 = vmatpush1.bf16.msra.mxu1 %v8161_v39  ;;  %v4052_v39 = vrot.slane %v10148_v50, 7 }
 0x588   : > { %5831 = vmatprep.subr.bf16.mxu1 %v8166_v19  ;;  %v8248_v19 = vld [vmem:[%s10564_s4 + $0x700] ss:$8 sps:$4 sm:$0xff]  }
 0x58b   : > { %5832 = vmatpush1.bf16.msra.mxu1 %v8164_v6  ;;  %v4066_v6 = vpack.c.bf16 %v4046_v46, %v4046_v46 }
 0x58c   : > { %5833 = vmatprep.subr.bf16.mxu1 %v8169_v1  ;;  %v8253_v1 = vld [vmem:[%s10564_s4 + $0x714] ss:$8 sps:$4 sm:$0xff]  }
 0x58f   : > { %5834 = vmatpush1.bf16.msra.mxu1 %v8167_v59  ;;  %v4069_v59 = vpack.c.bf16 %v4052_v39, %v4052_v39 }
 0x590   : > { %5835 = vmatprep.subr.bf16.mxu1 %v8172_v5  ;;  %v8251_v5 = vld [vmem:[%s10564_s4 + $0x710] ss:$8 sps:$4 sm:$0xff]  }
 0x593   : > { %5836 = vmatpush1.bf16.msra.mxu1 %v8170_v15  ;;  %v8256_v15 = vld [vmem:[%s10564_s4 + $0x724] ss:$8 sps:$4 sm:$0xff]  }
 0x594   : > { %5837 = vmatprep.subr.bf16.mxu1 %v8175_v44  ;;  %v8254_v44 = vld [vmem:[%s10564_s4 + $0x720] ss:$8 sps:$4 sm:$0xff]  }
 0x597   : > { %5838 = vmatpush1.bf16.msra.mxu1 %v8173_v51  ;;  %v8259_v51 = vld [vmem:[%s10564_s4 + $0x734] ss:$8 sps:$4 sm:$0xff]  }
 0x598   : > { %5839 = vmatprep.subr.bf16.mxu1 %v8178_v16  ;;  %v8257_v16 = vld [vmem:[%s10564_s4 + $0x730] ss:$8 sps:$4 sm:$0xff]  }
 0x59b   : > { %5840 = vmatpush1.bf16.msra.mxu1 %v8176_v58  ;;  %v8262_v58 = vld [vmem:[%s10564_s4 + $0x744] ss:$8 sps:$4 sm:$0xff]  }
 0x59c   : > { %5841 = vmatprep.subr.bf16.mxu1 %v8181_v35  ;;  %v8260_v35 = vld [vmem:[%s10564_s4 + $0x740] ss:$8 sps:$4 sm:$0xff]  }
 0x59f   : > { %5842 = vmatpush1.bf16.msra.mxu1 %v8179_v22  ;;  %v8265_v22 = vld [vmem:[%s10564_s4 + $0x754] ss:$8 sps:$4 sm:$0xff]  }
 0x5a0   : > { %5843 = vmatprep.subr.bf16.mxu1 %v8184_v60  ;;  %v8263_v60 = vld [vmem:[%s10564_s4 + $0x750] ss:$8 sps:$4 sm:$0xff]  }
 0x5a3   : > { %5844 = vmatpush1.bf16.msra.mxu1 %v8182_v55  ;;  %v8268_v55 = vld [vmem:[%s10564_s4 + $0x764] ss:$8 sps:$4 sm:$0xff]  }
 0x5a4   : > { %5845 = vmatprep.subr.bf16.mxu1 %v8187_v26  ;;  %v8266_v26 = vld [vmem:[%s10564_s4 + $0x760] ss:$8 sps:$4 sm:$0xff]  }
 0x5a7   : > { %5846 = vmatpush1.bf16.msra.mxu1 %v8185_v12  ;;  %v8271_v12 = vld [vmem:[%s10564_s4 + $0x774] ss:$8 sps:$4 sm:$0xff]  }
 0x5a8   : > { %5847 = vmatprep.subr.bf16.mxu1 %v8190_v54  ;;  %v8269_v54 = vld [vmem:[%s10564_s4 + $0x770] ss:$8 sps:$4 sm:$0xff]  }
 0x5ab   : > { %5848 = vmatpush1.bf16.msra.mxu1 %v8188_v9  ;;  %v8274_v9 = vld [vmem:[%s10564_s4 + $0x784] ss:$8 sps:$4 sm:$0xff]  }
 0x5ac   : > { %5849 = vmatprep.subr.bf16.mxu1 %v8193_v13  ;;  %v8272_v13 = vld [vmem:[%s10564_s4 + $0x780] ss:$8 sps:$4 sm:$0xff]  }
 0x5af   : > { %5850 = vmatpush1.bf16.msra.mxu1 %v8191_v29  ;;  %v8277_v29 = vld [vmem:[%s10564_s4 + $0x794] ss:$8 sps:$4 sm:$0xff]  }
 0x5b0   : > { %5851 = vmatprep.subr.bf16.mxu1 %v8196_v36  ;;  %v8275_v36 = vld [vmem:[%s10564_s4 + $0x790] ss:$8 sps:$4 sm:$0xff]  }
 0x5b3   : > { %5852 = vmatpush1.bf16.msra.mxu1 %v8194_v41  ;;  %v8280_v41 = vld [vmem:[%s10564_s4 + $0x7a4] ss:$8 sps:$4 sm:$0xff]  }
 0x5b4   : > { %5853 = vmatprep.subr.bf16.mxu1 %v8199_v53  ;;  %v8278_v53 = vld [vmem:[%s10564_s4 + $0x7a0] ss:$8 sps:$4 sm:$0xff]  }
 0x5b7   : > { %5854 = vmatpush1.bf16.msra.mxu1 %v8197_v43  ;;  %v8283_v43 = vld [vmem:[%s10564_s4 + $0x7b4] ss:$8 sps:$4 sm:$0xff]  }
 0x5b8   : > { %5864 = vmatprep.subr.bf16.mxu1 %v8202_v45  ;;  %v8286_v45 = vld [vmem:[%s10564_s4 + $0x7c4] ss:$8 sps:$4 sm:$0xff]  }
 0x5ba   : > { %5856 = vmatmul.mubr.bf16.vlgmr.msra.gmra.mrb[72].mxu1 %v4064_v52  ;;  %v8287_v52 = vld [vmem:[%s10564_s4 + $0x7d0] ss:$8 sps:$4 sm:$0xff]  }
 0x5bb   : > { %5865 = vmatpush1.bf16.msra.mxu1 %v8200_v49  ;;  %5896 = vmatprep.mubr.bf16.mxu1 %v4067_v48  ;;  %v8289_v49 = vld [vmem:[%s10564_s4 + $0x7d4] ss:$8 sps:$4 sm:$0xff]   ;;  %v8290_v48 = vld [vmem:[%s10564_s4 + $0x7e0] ss:$8 sps:$4 sm:$0xff]  }
 0x5bc   : > { %5866 = vmatprep.subr.bf16.mxu1 %v8205_v20  ;;  %v8292_v20 = vld [vmem:[%s10564_s4 + $0x7e4] ss:$8 sps:$4 sm:$0xff]  }
 0x5bf   : > { %5867 = vmatpush1.bf16.msra.mxu1 %v8203_v37  ;;  %v8295_v37 = vld [vmem:[%s10564_s4 + $0x7f4] ss:$8 sps:$4 sm:$0xff]  }
 0x5c0   : > { %5868 = vmatprep.subr.bf16.mxu1 %v8208_v47  ;;  %v8293_v47 = vld [vmem:[%s10564_s4 + $0x7f0] ss:$8 sps:$4 sm:$0xff]  }
 0x5c3   : > { %5869 = vmatpush1.bf16.msra.mxu1 %v8206_v30  ;;  %v4050_v30 = vrot.slane %v10148_v50, 6 }
 0x5c4   : > { %5870 = vmatprep.subr.bf16.mxu1 %v8211_v25 }
 0x5c5   : > { %v4068_v25 = vpack.c.bf16 %v4050_v30, %v4050_v30 }
 0x5c7   : > { %5871 = vmatpush1.bf16.msra.mxu1 %v8209_v8  ;;  %v5608_v8 = vlaneseq }
 0x5c8   : > { %5872 = vmatprep.subr.bf16.mxu1 %v8214_v24 }
 0x5c9   : > { %v5609_v24 = vshrl.u32 %v5608_v8, 7 }
 0x5cb   : > { %5873 = vmatpush1.bf16.msra.mxu1 %v8212_v42  ;;  %v5610_v42 = vsub.s32 0, %v5609_v24 }
 0x5cc   : > { %5874 = vmatprep.subr.bf16.mxu1 %v8217_v4  ;;  %v4326_v4 = vld [vmem:[%s10565_s5] sm:$0x3] }
 0x5cf   : > { %5875 = vmatpush1.bf16.msra.mxu1 %v8215_v28  ;;  %v5614_v28 = vsub.s32 1, %v5609_v24 }
 0x5d0   : > { %5876 = vmatprep.subr.bf16.mxu1 %v8220_v33  ;;  %v5611_v33 = vrot.slane %v4326_v4, %v5610_v42 }
 0x5d3   : > { %5877 = vmatpush1.bf16.msra.mxu1 %v8218_v27  ;;  %v5615_v27 = vrot.slane %v4326_v4, %v5614_v28 }
 0x5d4   : > { %5878 = vmatprep.subr.bf16.mxu1 %v8223_v18  ;;  %v5948_v18 = vld [vmem:[%s10566_s6] sm:$0x3] }
 0x5d7   : > { %5879 = vmatpush1.bf16.msra.mxu1 %v8221_v61 }
 0x5d8   : > { %5880 = vmatprep.subr.bf16.mxu1 %v8226_v56 }
 0x5db   : > { %5881 = vmatpush1.bf16.msra.mxu1 %v8224_v62  ;;  %v5953_v62 = vrot.slane %v5948_v18, %v5610_v42 }
 0x5dc   : > { %5882 = vmatprep.subr.bf16.mxu1 %v8229_v11 }
 0x5df   : > { %5883 = vmatpush1.bf16.msra.mxu1 %v8227_v0 }
 0x5e0   : > { %5884 = vmatprep.subr.bf16.mxu1 %v8232_v32  ;;  %v5957_v32 = vrot.slane %v5948_v18, %v5614_v28 }
 0x5e3   : > { %5885 = vmatpush1.bf16.msra.mxu1 %v8230_v7 }
 0x5e4   : > { %5886 = vmatprep.subr.bf16.mxu1 %v8235_v31 }
 0x5e7   : > { %5887 = vmatpush1.bf16.msra.mxu1 %v8233_v40 }
 0x5e8   : > { %5888 = vmatprep.subr.bf16.mxu1 %v8238_v21 }
 0x5eb   : > { %5889 = vmatpush1.bf16.msra.mxu1 %v8236_v10 }
 0x5ec   : > { %5890 = vmatprep.subr.bf16.mxu1 %v8241_v23 }
 0x5ef   : > { %5891 = vmatpush1.bf16.msra.mxu1 %v8239_v17 }
 0x5f0   : > { %5892 = vmatprep.subr.bf16.mxu1 %v8244_v34 }
 0x5f3   : > { %5893 = vmatpush1.bf16.msra.mxu1 %v8242_v2  ;;  %v5968_v2 = vld [vmem:[#allocation2] sm:$0x1] }
 0x5f4   : > { %5894 = vmatprep.subr.bf16.mxu1 %v8247_v38 }
 0x5f7   : > { %5895 = vmatpush1.bf16.msra.mxu1 %v8245_v63 }
 0x5f8   : > { %5905 = vmatprep.subr.bf16.mxu1 %v8250_v3 }
 0x5fa   : > { %5897 = vmatmul.mubr.bf16.vlgmr.msra.gmra.mrb[72].mxu1 %v4066_v6 }
 0x5fb   : > { %5906 = vmatpush1.bf16.msra.mxu1 %v8248_v19  ;;  %5937 = vmatprep.mubr.bf16.mxu1 %v4069_v59 }
 0x5fc   : > { %5907 = vmatprep.subr.bf16.mxu1 %v8253_v1 }
 0x5ff   : > { %5908 = vmatpush1.bf16.msra.mxu1 %v8251_v5 }
 0x600   : > { %5909 = vmatprep.subr.bf16.mxu1 %v8256_v15 }
 0x603   : > { %5910 = vmatpush1.bf16.msra.mxu1 %v8254_v44 }
 0x604   : > { %5911 = vmatprep.subr.bf16.mxu1 %v8259_v51 }
 0x607   : > { %5912 = vmatpush1.bf16.msra.mxu1 %v8257_v16 }
 0x608   : > { %5913 = vmatprep.subr.bf16.mxu1 %v8262_v58 }
 0x60b   : > { %5914 = vmatpush1.bf16.msra.mxu1 %v8260_v35 }
 0x60c   : > { %5915 = vmatprep.subr.bf16.mxu1 %v8265_v22 }
 0x60f   : > { %5916 = vmatpush1.bf16.msra.mxu1 %v8263_v60 }
 0x610   : > { %5917 = vmatprep.subr.bf16.mxu1 %v8268_v55 }
 0x613   : > { %5918 = vmatpush1.bf16.msra.mxu1 %v8266_v26 }
 0x614   : > { %5919 = vmatprep.subr.bf16.mxu1 %v8271_v12 }
 0x617   : > { %5920 = vmatpush1.bf16.msra.mxu1 %v8269_v54 }
 0x618   : > { %5921 = vmatprep.subr.bf16.mxu1 %v8274_v9 }
 0x61b   : > { %5922 = vmatpush1.bf16.msra.mxu1 %v8272_v13 }
 0x61c   : > { %5923 = vmatprep.subr.bf16.mxu1 %v8277_v29 }
 0x61f   : > { %5924 = vmatpush1.bf16.msra.mxu1 %v8275_v36 }
 0x620   : > { %5925 = vmatprep.subr.bf16.mxu1 %v8280_v41 }
 0x623   : > { %5926 = vmatpush1.bf16.msra.mxu1 %v8278_v53 }
 0x624   : > { %5927 = vmatprep.subr.bf16.mxu1 %v8283_v43 }
 0x627   : > { %5928 = vmatpush1.bf16.msra.mxu1 %v8281_v57 }
 0x628   : > { %5929 = vmatprep.subr.bf16.mxu1 %v8286_v45 }
 0x62b   : > { %5930 = vmatpush1.bf16.msra.mxu1 %v8284_v14 }
 0x62c   : > { %5931 = vmatprep.subr.bf16.mxu1 %v8289_v49 }
 0x62f   : > { %5932 = vmatpush1.bf16.msra.mxu1 %v8287_v52 }
 0x630   : > { %5933 = vmatprep.subr.bf16.mxu1 %v8292_v20 }
 0x633   : > { %5934 = vmatpush1.bf16.msra.mxu1 %v8290_v48 }
 0x634   : > { %5935 = vmatprep.subr.bf16.mxu1 %v8295_v37 }
 0x637   : > { %5936 = vmatpush1.bf16.msra.mxu1 %v8293_v47 }
 0x63a   : > { %5938 = vmatmul.mubr.bf16.vlgmr.msra.gmra.mrb[72].mxu1 %v4068_v25 }
 0x70d   : > { %v5939_v61 = vpop.f32.mrb[72].mxu1 }
 0x70e   : > { %v7424_v56 = vadd.f32 %v5939_v61, %v5611_v33  ;;  %v5941_v50 = vpop.f32.mrb[73].mxu1 }
 0x70f   : > { %v7425_v11 = vadd.f32 %v5941_v50, %v5615_v27  ;;  %v5943_v0 = vpop.f32.mrb[74].mxu1 }
 0x710   : > { %v5946_v7 = vmax.f32 %v7424_v56, 0.0  ;;  %v5944_v31 = vpop.f32.mrb[75].mxu1 }
 0x711   : > { %v5947_v40 = vmax.f32 %v7425_v11, 0.0 }
 0x712   : > { %v5960_v21 = vmul.f32 %v5953_v62, %v5946_v7 }
 0x713   : > { %v5961_v10 = vmul.f32 %v5957_v32, %v5947_v40 }
 0x714   : > { %v5963_v23 = vsel %vm5962_vm3, %v5960_v21, 0.0 }
 0x715   : > { %v5964_v17 = vsel %vm5962_vm3, %v5961_v10, 0.0 }
 0x716   : > { %v5965_v34 = vadd.f32 %v5964_v17, %v5963_v23 }
 0x718   : > { %5966 = vadd.xlane.f32.xlu1 %v5965_v34 }
 0x7a5   : > { %v5967_v38 = vpop.xlane.xlu1 %5966 }
 0x7a6   : > { %v5969_v63 = vadd.f32 %v5968_v2, %v5967_v38 }
 0x7a8   : > { %v6654_v46 = vmul.f32 -1.442695, %v5969_v63 }
 0x7aa   : > { %8296 = vpow2.f32 %v6654_v46 }
 0x7b4   : > { %v8297_v3 = vpop.eup %8296 }
 0x7b5   : > { %v5973_v39 = vadd.f32 1.0, %v8297_v3 }
 0x7b7   : > { %8298 = vrcp.f32 %v5973_v39 }
 0x7c1   : > { %v8299_v19 = vpop.eup %8298 }
 0x7c2   : > { %5978 = vperm.xlu1 %7467, %v8299_v19  }
 0x841   : > { %v5979_v6 = vpop.permute.xlu1 %5978 }
 0x842   : > { %5981 = vst [vmem:[%s303_s10] sm:$0x1] %v5979_v6 }
 0x843 PF: > { %s20_s29 = sadd.s32 1, %s8306_s29  }
 0x844   : > { %p17_p4 = scmp.ge.s32.totalorder %s20_s29, 4  }
 0x846   :  { %19 = sbr.rel (!%p17_p4) target bundleno = 3 (0x3), region = 82 }

</bundles_post_ra>
